<compile_context>
chip_gen: v5e
topology: v5e:2x2
jax: 0.10.0
libtpu: 0.0.40
codegen_flags: <defaults>
</compile_context>

<pallas_src>
import functools

import jax
import jax.numpy as jnp
from jax import lax
from jax.experimental import pallas as pl
from jax.experimental.pallas import tpu as pltpu

NEG_LARGE = float(jnp.finfo(jnp.float32).min)  # -inf surrogate for maxpool padding


def _round_up(v, m):
    return (v + m - 1) // m * m


def _dw3x3(get, w_ref):
    """3x3 depthwise conv; `get(dh, dw)` returns the (H, W, C) shifted tap input."""
    acc = get(0, 0) * w_ref[0:1, 0:1, :]
    for dh in range(3):
        for dw in range(3):
            if dh == 0 and dw == 0:
                continue
            acc = acc + get(dh, dw) * w_ref[dh:dh + 1, dw:dw + 1, :]
    return acc


def _double_sep_block_kernel(xp_ref, dw1_ref, pw1_ref, b1_ref,
                             dw2_ref, pw2_ref, b2_ref, wres_ref,
                             out_ref, apad_ref, bpad_ref, *, H, W):
    Ho, Wo, Cout = out_ref.shape[1], out_ref.shape[2], out_ref.shape[3]
    Cin = xp_ref.shape[3]

    # ---- residual: 1x1 stride-2 conv on the input block already in VMEM ----
    # W-subsample = strided (stride-2) sublane read; H-subsample = pair reshape
    # on the non-tiled row dim (both avoid any extra HBM input).
    xw = xp_ref[:, :, pl.ds(1, Wo, 2), :]                      # (1, Hp, Wo, Cin), cols 1,3,...
    xs = xw[0, 1:2 * Ho + 1].reshape(Ho, 2, Wo, Cin)[:, 0]     # rows 1,3,...,2*Ho-1
    idn = jnp.dot(xs.reshape(Ho * Wo, Cin), wres_ref[...],
                  preferred_element_type=jnp.float32)
    idn = idn.reshape(Ho, Wo, Cout)
    # NOTE: for production channel counts on v6e/v7x the matmul operands can be
    # cast to bf16 (keep preferred_element_type=f32) to double MXU throughput.

    # ---- SeperableConv1 (BN1 scale folded into pw1) + shift + ReLU ----
    a = _dw3x3(lambda i, j: xp_ref[0, i:i + H, j:j + W, :], dw1_ref)   # (H, W, Cin)
    a = jnp.dot(a.reshape(H * W, Cin), pw1_ref[...],
                preferred_element_type=jnp.float32).reshape(H, W, Cout)
    a = jnp.maximum(a + b1_ref[...], 0.0)

    # ---- zero-padded `a` scratch (halo for depthwise2) ----
    # Re-initialized every step: the scratch persists across grid steps and the
    # batch axis is "parallel", so init-once-at-step-0 is not safe on megacore.
    apad_ref[...] = jnp.zeros(apad_ref.shape, apad_ref.dtype)
    apad_ref[1:H + 1, 1:W + 1, :] = a

    # ---- SeperableConv2 (BN2 scale folded into pw2) + shift ----
    b = _dw3x3(lambda i, j: apad_ref[i:i + H, j:j + W, :], dw2_ref)    # (H, W, Cout)
    b = jnp.dot(b.reshape(H * W, Cout), pw2_ref[...],
                preferred_element_type=jnp.float32).reshape(H, W, Cout)
    b = b + b2_ref[...]

    # ---- MaxPool2d(kernel=3, stride=2, padding=1) with -inf-surrogate border ----
    bpad_ref[...] = jnp.full(bpad_ref.shape, NEG_LARGE, bpad_ref.dtype)
    bpad_ref[1:H + 1, 1:W + 1, :] = b
    # W window: three stride-2 sublane reads of the padded buffer.
    c0 = bpad_ref[:, pl.ds(0, Wo, 2), :]                       # cols 0,2,...
    c1 = bpad_ref[:, pl.ds(1, Wo, 2), :]                       # cols 1,3,...
    c2 = bpad_ref[:, pl.ds(2, Wo, 2), :]                       # cols 2,4,...
    zw = jnp.maximum(jnp.maximum(c0, c1), c2)                  # (Hp, Wo, Cout)
    # H window: pair reshape on the (non-tiled) row dim at stride 2.
    q0 = zw[0:2 * Ho].reshape(Ho, 2, Wo, Cout)
    q1 = zw[2:2 * Ho + 2].reshape(Ho, 2, Wo, Cout)
    pooled = jnp.maximum(jnp.maximum(q0[:, 0], q0[:, 1]), q1[:, 0])    # (Ho, Wo, Cout)

    out_ref[0] = jnp.maximum(pooled + idn, 0.0).astype(out_ref.dtype)


def double_seperable_block(x_nchw, params):
    """params = (dw1(3,3,Cin), pw1(Cin,Cout), s1(Cout), b1(Cout),
                 dw2(3,3,Cout), pw2(Cout,Cout), s2(Cout), b2(Cout), wres(Cin,Cout))."""
    dw1, pw1, s1, b1, dw2, pw2, s2, b2, wres = params
    x = jnp.transpose(x_nchw, (0, 2, 3, 1)).astype(jnp.float32)   # NCHW -> NHWC
    N, H, W, Cin = x.shape
    Cout = pw1.shape[1]
    Ho = (H - 1) // 2 + 1
    Wo = (W - 1) // 2 + 1
    Hp = 2 * Ho + 2                      # >= H + 2, also covers the last pool window row
    Wp = _round_up(2 * Wo + 2, 8)        # >= W + 2, sublane-aligned padded width

    # Fold BN scales into the pointwise weights (free at trace time); keep shifts.
    pw1s = (pw1 * s1[None, :]).astype(jnp.float32)
    pw2s = (pw2 * s2[None, :]).astype(jnp.float32)
    b1r = b1.reshape(1, 1, Cout).astype(jnp.float32)
    b2r = b2.reshape(1, 1, Cout).astype(jnp.float32)

    # Zero-pad H/W once in the wrapper so every depthwise tap is a static slice
    # of the VMEM block (no in-kernel concatenates).
    xp = jnp.pad(x, ((0, 0), (1, Hp - H - 1), (1, Wp - W - 1), (0, 0)))

    kernel = functools.partial(_double_sep_block_kernel, H=H, W=W)
    out_nhwc = pl.pallas_call(
        kernel,
        out_shape=jax.ShapeDtypeStruct((N, Ho, Wo, Cout), jnp.float32),
        grid=(N,),
        in_specs=[
            pl.BlockSpec((1, Hp, Wp, Cin), lambda n: (n, 0, 0, 0)),
            pl.BlockSpec((3, 3, Cin), lambda n: (0, 0, 0)),
            pl.BlockSpec((Cin, Cout), lambda n: (0, 0)),
            pl.BlockSpec((1, 1, Cout), lambda n: (0, 0, 0)),
            pl.BlockSpec((3, 3, Cout), lambda n: (0, 0, 0)),
            pl.BlockSpec((Cout, Cout), lambda n: (0, 0)),
            pl.BlockSpec((1, 1, Cout), lambda n: (0, 0, 0)),
            pl.BlockSpec((Cin, Cout), lambda n: (0, 0)),
        ],
        out_specs=pl.BlockSpec((1, Ho, Wo, Cout), lambda n: (n, 0, 0, 0)),
        scratch_shapes=[
            pltpu.VMEM((Hp, Wp, Cout), jnp.float32),   # zero-padded `a`
            pltpu.VMEM((Hp, Wp, Cout), jnp.float32),   # -inf-padded `b`
        ],
        compiler_params=pltpu.CompilerParams(dimension_semantics=("parallel",)),
    )(xp, dw1, pw1s, b1r, dw2, pw2s, b2r, wres)

    return jnp.transpose(out_nhwc, (0, 3, 1, 2))   # NHWC -> NCHW


def reference_forward(x_nchw, params):
    """Pure-JAX (XLA) reference for correctness checking."""
    dw1, pw1, s1, b1, dw2, pw2, s2, b2, wres = params
    x = jnp.transpose(x_nchw, (0, 2, 3, 1)).astype(jnp.float32)
    dn = ('NHWC', 'HWIO', 'NHWC')

    def dwconv(v, w):
        C = v.shape[-1]
        return lax.conv_general_dilated(v, w.reshape(3, 3, 1, C), (1, 1),
                                        ((1, 1), (1, 1)), dimension_numbers=dn,
                                        feature_group_count=C)

    def pwconv(v, w, stride=1):
        return lax.conv_general_dilated(v, w[None, None], (stride, stride),
                                        'VALID', dimension_numbers=dn)

    def bn(v, scale, shift):
        return v * scale.reshape(1, 1, 1, -1) + shift.reshape(1, 1, 1, -1)

    idn = pwconv(x, wres, stride=2)
    a = jnp.maximum(bn(pwconv(dwconv(x, dw1), pw1), s1, b1), 0.0)
    c = bn(pwconv(dwconv(a, dw2), pw2), s2, b2)
    pooled = lax.reduce_window(c, -jnp.inf, lax.max, (1, 3, 3, 1), (1, 2, 2, 1),
                               ((0, 0), (1, 1), (1, 1), (0, 0)))
    out = jnp.maximum(pooled + idn, 0.0)
    return jnp.transpose(out, (0, 3, 1, 2))


if __name__ == "__main__":
    N, Cin, Cout, H, W = 2, 4, 8, 16, 16
    key = jax.random.PRNGKey(0)
    ks = jax.random.split(key, 16)

    # PyTorch-style NCHW input
    x = jax.random.normal(ks[0], (N, Cin, H, W), dtype=jnp.float32)

    # deterministic synthetic parameters (shapes match the module's __init__)
    dw1 = 0.3 * jax.random.normal(ks[1], (3, 3, Cin), jnp.float32)     # depthwise1
    pw1 = 0.3 * jax.random.normal(ks[2], (Cin, Cout), jnp.float32)     # pointwise1
    dw2 = 0.3 * jax.random.normal(ks[3], (3, 3, Cout), jnp.float32)    # depthwise2
    pw2 = 0.3 * jax.random.normal(ks[4], (Cout, Cout), jnp.float32)    # pointwise2
    wres = 0.3 * jax.random.normal(ks[5], (Cin, Cout), jnp.float32)    # residual 1x1 s2

    def bn_fold(kg, kb, km, kv, C, eps=1e-5):
        gamma = jax.random.uniform(kg, (C,), jnp.float32, 0.5, 1.5)
        beta = 0.1 * jax.random.normal(kb, (C,), jnp.float32)
        mean = 0.1 * jax.random.normal(km, (C,), jnp.float32)
        var = jax.random.uniform(kv, (C,), jnp.float32, 0.5, 1.5)
        scale = gamma / jnp.sqrt(var + eps)
        shift = beta - mean * scale
        return scale, shift

    s1, b1 = bn_fold(ks[6], ks[7], ks[8], ks[9], Cout)
    s2, b2 = bn_fold(ks[10], ks[11], ks[12], ks[13], Cout)

    params = (dw1, pw1, s1, b1, dw2, pw2, s2, b2, wres)

    out = double_seperable_block(x, params)
    out = jax.block_until_ready(out)
    assert out.shape == (N, Cout, 8, 8), out.shape

    ref = reference_forward(x, params)
    if not bool(jnp.allclose(out, ref, rtol=2e-2, atol=2e-2)):
        max_err = float(jnp.max(jnp.abs(out - ref)))
        raise AssertionError(f"Pallas kernel mismatch vs reference, max abs err = {max_err}")

    print("KERNEL_OK")
</pallas_src>

<mosaic_0001>
module attributes {stable_mosaic.version = 11 : i64} {
  func.func @_double_sep_block_kernel(%arg0: i32, %arg1: memref<1x18x24x4xf32, #tpu.memory_space<vmem>>, %arg2: memref<3x3x4xf32, #tpu.memory_space<vmem>>, %arg3: memref<4x8xf32, #tpu.memory_space<vmem>>, %arg4: memref<1x1x8xf32, #tpu.memory_space<vmem>>, %arg5: memref<3x3x8xf32, #tpu.memory_space<vmem>>, %arg6: memref<8x8xf32, #tpu.memory_space<vmem>>, %arg7: memref<1x1x8xf32, #tpu.memory_space<vmem>>, %arg8: memref<4x8xf32, #tpu.memory_space<vmem>>, %arg9: memref<1x8x8x8xf32, #tpu.memory_space<vmem>>, %arg10: memref<18x24x8xf32, #tpu.memory_space<vmem>>, %arg11: memref<18x24x8xf32, #tpu.memory_space<vmem>>) attributes {dimension_semantics = [#tpu.dimension_semantics<parallel>], iteration_bounds = array<i64: 2>, scalar_prefetch = 0 : i64, scratch_operands = 2 : i64, tpu.core_type = #tpu.core_type<tc>, window_params = [{transform_indices = @transform_0, window_bounds = array<i64: 1, 18, 24, 4>}, {pipeline_mode = #tpu.pipeline_mode<synchronous>, transform_indices = @transform_1, window_bounds = array<i64: 3, 3, 4>}, {pipeline_mode = #tpu.pipeline_mode<synchronous>, transform_indices = @transform_2, window_bounds = array<i64: 4, 8>}, {pipeline_mode = #tpu.pipeline_mode<synchronous>, transform_indices = @transform_3, window_bounds = array<i64: 1, 1, 8>}, {pipeline_mode = #tpu.pipeline_mode<synchronous>, transform_indices = @transform_4, window_bounds = array<i64: 3, 3, 8>}, {pipeline_mode = #tpu.pipeline_mode<synchronous>, transform_indices = @transform_5, window_bounds = array<i64: 8, 8>}, {pipeline_mode = #tpu.pipeline_mode<synchronous>, transform_indices = @transform_6, window_bounds = array<i64: 1, 1, 8>}, {pipeline_mode = #tpu.pipeline_mode<synchronous>, transform_indices = @transform_7, window_bounds = array<i64: 4, 8>}, {transform_indices = @transform_8, window_bounds = array<i64: 1, 8, 8, 8>}]} {
    %c0 = arith.constant 0 : index
    %c0_0 = arith.constant 0 : index
    %c1 = arith.constant 1 : index
    %c0_1 = arith.constant 0 : index
    %0 = tpu.strided_load %arg1[%c0, %c0_0, %c1, %c0_1] {strides = array<i32: 1, 1, 2, 1>} : memref<1x18x24x4xf32, #tpu.memory_space<vmem>>, vector<1x18x8x4xf32>
    %1 = vector.extract_strided_slice %0 {offsets = [0, 1, 0, 0], sizes = [1, 16, 8, 4], strides = [1, 1, 1, 1]} : vector<1x18x8x4xf32> to vector<1x16x8x4xf32>
    %2 = vector.shape_cast %1 : vector<1x16x8x4xf32> to vector<16x8x4xf32>
    %3 = vector.shape_cast %2 : vector<16x8x4xf32> to vector<8x2x8x4xf32>
    %4 = vector.extract_strided_slice %3 {offsets = [0, 0, 0, 0], sizes = [8, 1, 8, 4], strides = [1, 1, 1, 1]} : vector<8x2x8x4xf32> to vector<8x1x8x4xf32>
    %5 = vector.shape_cast %4 : vector<8x1x8x4xf32> to vector<8x8x4xf32>
    %6 = vector.shape_cast %5 : vector<8x8x4xf32> to vector<64x4xf32>
    %c0_2 = arith.constant 0 : index
    %c0_3 = arith.constant 0 : index
    %7 = vector.load %arg8[%c0_2, %c0_3] : memref<4x8xf32, #tpu.memory_space<vmem>>, vector<4x8xf32>
    %cst = arith.constant dense<0.000000e+00> : vector<64x8xf32>
    %8 = tpu.matmul %6, %7, %cst {dimension_numbers = #tpu.dot_dimension_numbers<[1], [0], [0], [1], [0, 0, 1, 1], [], []>} : vector<64x4xf32>, vector<4x8xf32>, vector<64x8xf32> -> vector<64x8xf32>
    %9 = vector.shape_cast %8 : vector<64x8xf32> to vector<8x8x8xf32>
    %c0_4 = arith.constant 0 : index
    %c0_5 = arith.constant 0 : index
    %c0_6 = arith.constant 0 : index
    %c0_7 = arith.constant 0 : index
    %10 = vector.load %arg1[%c0_4, %c0_5, %c0_6, %c0_7] : memref<1x18x24x4xf32, #tpu.memory_space<vmem>>, vector<1x16x16x4xf32>
    %11 = vector.shape_cast %10 : vector<1x16x16x4xf32> to vector<16x16x4xf32>
    %c0_8 = arith.constant 0 : index
    %c0_9 = arith.constant 0 : index
    %c0_10 = arith.constant 0 : index
    %12 = vector.load %arg2[%c0_8, %c0_9, %c0_10] : memref<3x3x4xf32, #tpu.memory_space<vmem>>, vector<1x1x4xf32>
    %13 = vector.broadcast %12 : vector<1x1x4xf32> to vector<16x16x4xf32>
    %14 = arith.mulf %11, %13 : vector<16x16x4xf32>
    %c0_11 = arith.constant 0 : index
    %c0_12 = arith.constant 0 : index
    %c1_13 = arith.constant 1 : index
    %c0_14 = arith.constant 0 : index
    %15 = vector.load %arg1[%c0_11, %c0_12, %c1_13, %c0_14] : memref<1x18x24x4xf32, #tpu.memory_space<vmem>>, vector<1x16x16x4xf32>
    %16 = vector.shape_cast %15 : vector<1x16x16x4xf32> to vector<16x16x4xf32>
    %c0_15 = arith.constant 0 : index
    %c1_16 = arith.constant 1 : index
    %c0_17 = arith.constant 0 : index
    %17 = vector.load %arg2[%c0_15, %c1_16, %c0_17] : memref<3x3x4xf32, #tpu.memory_space<vmem>>, vector<1x1x4xf32>
    %18 = vector.broadcast %17 : vector<1x1x4xf32> to vector<16x16x4xf32>
    %19 = arith.mulf %16, %18 : vector<16x16x4xf32>
    %20 = arith.addf %14, %19 : vector<16x16x4xf32>
    %c0_18 = arith.constant 0 : index
    %c0_19 = arith.constant 0 : index
    %c2 = arith.constant 2 : index
    %c0_20 = arith.constant 0 : index
    %21 = vector.load %arg1[%c0_18, %c0_19, %c2, %c0_20] : memref<1x18x24x4xf32, #tpu.memory_space<vmem>>, vector<1x16x16x4xf32>
    %22 = vector.shape_cast %21 : vector<1x16x16x4xf32> to vector<16x16x4xf32>
    %c0_21 = arith.constant 0 : index
    %c2_22 = arith.constant 2 : index
    %c0_23 = arith.constant 0 : index
    %23 = vector.load %arg2[%c0_21, %c2_22, %c0_23] : memref<3x3x4xf32, #tpu.memory_space<vmem>>, vector<1x1x4xf32>
    %24 = vector.broadcast %23 : vector<1x1x4xf32> to vector<16x16x4xf32>
    %25 = arith.mulf %22, %24 : vector<16x16x4xf32>
    %26 = arith.addf %20, %25 : vector<16x16x4xf32>
    %c0_24 = arith.constant 0 : index
    %c1_25 = arith.constant 1 : index
    %c0_26 = arith.constant 0 : index
    %c0_27 = arith.constant 0 : index
    %27 = vector.load %arg1[%c0_24, %c1_25, %c0_26, %c0_27] : memref<1x18x24x4xf32, #tpu.memory_space<vmem>>, vector<1x16x16x4xf32>
    %28 = vector.shape_cast %27 : vector<1x16x16x4xf32> to vector<16x16x4xf32>
    %c1_28 = arith.constant 1 : index
    %c0_29 = arith.constant 0 : index
    %c0_30 = arith.constant 0 : index
    %29 = vector.load %arg2[%c1_28, %c0_29, %c0_30] : memref<3x3x4xf32, #tpu.memory_space<vmem>>, vector<1x1x4xf32>
    %30 = vector.broadcast %29 : vector<1x1x4xf32> to vector<16x16x4xf32>
    %31 = arith.mulf %28, %30 : vector<16x16x4xf32>
    %32 = arith.addf %26, %31 : vector<16x16x4xf32>
    %c0_31 = arith.constant 0 : index
    %c1_32 = arith.constant 1 : index
    %c1_33 = arith.constant 1 : index
    %c0_34 = arith.constant 0 : index
    %33 = vector.load %arg1[%c0_31, %c1_32, %c1_33, %c0_34] : memref<1x18x24x4xf32, #tpu.memory_space<vmem>>, vector<1x16x16x4xf32>
    %34 = vector.shape_cast %33 : vector<1x16x16x4xf32> to vector<16x16x4xf32>
    %c1_35 = arith.constant 1 : index
    %c1_36 = arith.constant 1 : index
    %c0_37 = arith.constant 0 : index
    %35 = vector.load %arg2[%c1_35, %c1_36, %c0_37] : memref<3x3x4xf32, #tpu.memory_space<vmem>>, vector<1x1x4xf32>
    %36 = vector.broadcast %35 : vector<1x1x4xf32> to vector<16x16x4xf32>
    %37 = arith.mulf %34, %36 : vector<16x16x4xf32>
    %38 = arith.addf %32, %37 : vector<16x16x4xf32>
    %c0_38 = arith.constant 0 : index
    %c1_39 = arith.constant 1 : index
    %c2_40 = arith.constant 2 : index
    %c0_41 = arith.constant 0 : index
    %39 = vector.load %arg1[%c0_38, %c1_39, %c2_40, %c0_41] : memref<1x18x24x4xf32, #tpu.memory_space<vmem>>, vector<1x16x16x4xf32>
    %40 = vector.shape_cast %39 : vector<1x16x16x4xf32> to vector<16x16x4xf32>
    %c1_42 = arith.constant 1 : index
    %c2_43 = arith.constant 2 : index
    %c0_44 = arith.constant 0 : index
    %41 = vector.load %arg2[%c1_42, %c2_43, %c0_44] : memref<3x3x4xf32, #tpu.memory_space<vmem>>, vector<1x1x4xf32>
    %42 = vector.broadcast %41 : vector<1x1x4xf32> to vector<16x16x4xf32>
    %43 = arith.mulf %40, %42 : vector<16x16x4xf32>
    %44 = arith.addf %38, %43 : vector<16x16x4xf32>
    %c0_45 = arith.constant 0 : index
    %c2_46 = arith.constant 2 : index
    %c0_47 = arith.constant 0 : index
    %c0_48 = arith.constant 0 : index
    %45 = vector.load %arg1[%c0_45, %c2_46, %c0_47, %c0_48] : memref<1x18x24x4xf32, #tpu.memory_space<vmem>>, vector<1x16x16x4xf32>
    %46 = vector.shape_cast %45 : vector<1x16x16x4xf32> to vector<16x16x4xf32>
    %c2_49 = arith.constant 2 : index
    %c0_50 = arith.constant 0 : index
    %c0_51 = arith.constant 0 : index
    %47 = vector.load %arg2[%c2_49, %c0_50, %c0_51] : memref<3x3x4xf32, #tpu.memory_space<vmem>>, vector<1x1x4xf32>
    %48 = vector.broadcast %47 : vector<1x1x4xf32> to vector<16x16x4xf32>
    %49 = arith.mulf %46, %48 : vector<16x16x4xf32>
    %50 = arith.addf %44, %49 : vector<16x16x4xf32>
    %c0_52 = arith.constant 0 : index
    %c2_53 = arith.constant 2 : index
    %c1_54 = arith.constant 1 : index
    %c0_55 = arith.constant 0 : index
    %51 = vector.load %arg1[%c0_52, %c2_53, %c1_54, %c0_55] : memref<1x18x24x4xf32, #tpu.memory_space<vmem>>, vector<1x16x16x4xf32>
    %52 = vector.shape_cast %51 : vector<1x16x16x4xf32> to vector<16x16x4xf32>
    %c2_56 = arith.constant 2 : index
    %c1_57 = arith.constant 1 : index
    %c0_58 = arith.constant 0 : index
    %53 = vector.load %arg2[%c2_56, %c1_57, %c0_58] : memref<3x3x4xf32, #tpu.memory_space<vmem>>, vector<1x1x4xf32>
    %54 = vector.broadcast %53 : vector<1x1x4xf32> to vector<16x16x4xf32>
    %55 = arith.mulf %52, %54 : vector<16x16x4xf32>
    %56 = arith.addf %50, %55 : vector<16x16x4xf32>
    %c0_59 = arith.constant 0 : index
    %c2_60 = arith.constant 2 : index
    %c2_61 = arith.constant 2 : index
    %c0_62 = arith.constant 0 : index
    %57 = vector.load %arg1[%c0_59, %c2_60, %c2_61, %c0_62] : memref<1x18x24x4xf32, #tpu.memory_space<vmem>>, vector<1x16x16x4xf32>
    %58 = vector.shape_cast %57 : vector<1x16x16x4xf32> to vector<16x16x4xf32>
    %c2_63 = arith.constant 2 : index
    %c2_64 = arith.constant 2 : index
    %c0_65 = arith.constant 0 : index
    %59 = vector.load %arg2[%c2_63, %c2_64, %c0_65] : memref<3x3x4xf32, #tpu.memory_space<vmem>>, vector<1x1x4xf32>
    %60 = vector.broadcast %59 : vector<1x1x4xf32> to vector<16x16x4xf32>
    %61 = arith.mulf %58, %60 : vector<16x16x4xf32>
    %62 = arith.addf %56, %61 : vector<16x16x4xf32>
    %63 = vector.shape_cast %62 : vector<16x16x4xf32> to vector<256x4xf32>
    %c0_66 = arith.constant 0 : index
    %c0_67 = arith.constant 0 : index
    %64 = vector.load %arg3[%c0_66, %c0_67] : memref<4x8xf32, #tpu.memory_space<vmem>>, vector<4x8xf32>
    %cst_68 = arith.constant dense<0.000000e+00> : vector<256x8xf32>
    %65 = tpu.matmul %63, %64, %cst_68 {dimension_numbers = #tpu.dot_dimension_numbers<[1], [0], [0], [1], [0, 0, 1, 1], [], []>} : vector<256x4xf32>, vector<4x8xf32>, vector<256x8xf32> -> vector<256x8xf32>
    %66 = vector.shape_cast %65 : vector<256x8xf32> to vector<16x16x8xf32>
    %c0_69 = arith.constant 0 : index
    %c0_70 = arith.constant 0 : index
    %c0_71 = arith.constant 0 : index
    %67 = vector.load %arg4[%c0_69, %c0_70, %c0_71] : memref<1x1x8xf32, #tpu.memory_space<vmem>>, vector<1x1x8xf32>
    %68 = vector.broadcast %67 : vector<1x1x8xf32> to vector<16x16x8xf32>
    %69 = arith.addf %66, %68 : vector<16x16x8xf32>
    %cst_72 = arith.constant 0.000000e+00 : f32
    %70 = vector.broadcast %cst_72 : f32 to vector<16x16x8xf32>
    %71 = arith.maximumf %69, %70 : vector<16x16x8xf32>
    %cst_73 = arith.constant 0.000000e+00 : f32
    %72 = vector.broadcast %cst_73 : f32 to vector<18x24x8xf32>
    %c0_74 = arith.constant 0 : index
    %c0_75 = arith.constant 0 : index
    %c0_76 = arith.constant 0 : index
    %73 = vector.load %arg10[%c0_74, %c0_75, %c0_76] : memref<18x24x8xf32, #tpu.memory_space<vmem>>, vector<18x24x8xf32>
    tpu.vector_store %arg10[%c0_74, %c0_75, %c0_76], %72 {strides = array<i32>} : memref<18x24x8xf32, #tpu.memory_space<vmem>>, vector<18x24x8xf32>,
    %c1_77 = arith.constant 1 : index
    %c1_78 = arith.constant 1 : index
    %c0_79 = arith.constant 0 : index
    %74 = vector.load %arg10[%c1_77, %c1_78, %c0_79] : memref<18x24x8xf32, #tpu.memory_space<vmem>>, vector<16x16x8xf32>
    tpu.vector_store %arg10[%c1_77, %c1_78, %c0_79], %71 {strides = array<i32>} : memref<18x24x8xf32, #tpu.memory_space<vmem>>, vector<16x16x8xf32>,
    %c0_80 = arith.constant 0 : index
    %c0_81 = arith.constant 0 : index
    %c0_82 = arith.constant 0 : index
    %75 = vector.load %arg10[%c0_80, %c0_81, %c0_82] : memref<18x24x8xf32, #tpu.memory_space<vmem>>, vector<16x16x8xf32>
    %c0_83 = arith.constant 0 : index
    %c0_84 = arith.constant 0 : index
    %c0_85 = arith.constant 0 : index
    %76 = vector.load %arg5[%c0_83, %c0_84, %c0_85] : memref<3x3x8xf32, #tpu.memory_space<vmem>>, vector<1x1x8xf32>
    %77 = vector.broadcast %76 : vector<1x1x8xf32> to vector<16x16x8xf32>
    %78 = arith.mulf %75, %77 : vector<16x16x8xf32>
    %c0_86 = arith.constant 0 : index
    %c1_87 = arith.constant 1 : index
    %c0_88 = arith.constant 0 : index
    %79 = vector.load %arg10[%c0_86, %c1_87, %c0_88] : memref<18x24x8xf32, #tpu.memory_space<vmem>>, vector<16x16x8xf32>
    %c0_89 = arith.constant 0 : index
    %c1_90 = arith.constant 1 : index
    %c0_91 = arith.constant 0 : index
    %80 = vector.load %arg5[%c0_89, %c1_90, %c0_91] : memref<3x3x8xf32, #tpu.memory_space<vmem>>, vector<1x1x8xf32>
    %81 = vector.broadcast %80 : vector<1x1x8xf32> to vector<16x16x8xf32>
    %82 = arith.mulf %79, %81 : vector<16x16x8xf32>
    %83 = arith.addf %78, %82 : vector<16x16x8xf32>
    %c0_92 = arith.constant 0 : index
    %c2_93 = arith.constant 2 : index
    %c0_94 = arith.constant 0 : index
    %84 = vector.load %arg10[%c0_92, %c2_93, %c0_94] : memref<18x24x8xf32, #tpu.memory_space<vmem>>, vector<16x16x8xf32>
    %c0_95 = arith.constant 0 : index
    %c2_96 = arith.constant 2 : index
    %c0_97 = arith.constant 0 : index
    %85 = vector.load %arg5[%c0_95, %c2_96, %c0_97] : memref<3x3x8xf32, #tpu.memory_space<vmem>>, vector<1x1x8xf32>
    %86 = vector.broadcast %85 : vector<1x1x8xf32> to vector<16x16x8xf32>
    %87 = arith.mulf %84, %86 : vector<16x16x8xf32>
    %88 = arith.addf %83, %87 : vector<16x16x8xf32>
    %c1_98 = arith.constant 1 : index
    %c0_99 = arith.constant 0 : index
    %c0_100 = arith.constant 0 : index
    %89 = vector.load %arg10[%c1_98, %c0_99, %c0_100] : memref<18x24x8xf32, #tpu.memory_space<vmem>>, vector<16x16x8xf32>
    %c1_101 = arith.constant 1 : index
    %c0_102 = arith.constant 0 : index
    %c0_103 = arith.constant 0 : index
    %90 = vector.load %arg5[%c1_101, %c0_102, %c0_103] : memref<3x3x8xf32, #tpu.memory_space<vmem>>, vector<1x1x8xf32>
    %91 = vector.broadcast %90 : vector<1x1x8xf32> to vector<16x16x8xf32>
    %92 = arith.mulf %89, %91 : vector<16x16x8xf32>
    %93 = arith.addf %88, %92 : vector<16x16x8xf32>
    %c1_104 = arith.constant 1 : index
    %c1_105 = arith.constant 1 : index
    %c0_106 = arith.constant 0 : index
    %94 = vector.load %arg10[%c1_104, %c1_105, %c0_106] : memref<18x24x8xf32, #tpu.memory_space<vmem>>, vector<16x16x8xf32>
    %c1_107 = arith.constant 1 : index
    %c1_108 = arith.constant 1 : index
    %c0_109 = arith.constant 0 : index
    %95 = vector.load %arg5[%c1_107, %c1_108, %c0_109] : memref<3x3x8xf32, #tpu.memory_space<vmem>>, vector<1x1x8xf32>
    %96 = vector.broadcast %95 : vector<1x1x8xf32> to vector<16x16x8xf32>
    %97 = arith.mulf %94, %96 : vector<16x16x8xf32>
    %98 = arith.addf %93, %97 : vector<16x16x8xf32>
    %c1_110 = arith.constant 1 : index
    %c2_111 = arith.constant 2 : index
    %c0_112 = arith.constant 0 : index
    %99 = vector.load %arg10[%c1_110, %c2_111, %c0_112] : memref<18x24x8xf32, #tpu.memory_space<vmem>>, vector<16x16x8xf32>
    %c1_113 = arith.constant 1 : index
    %c2_114 = arith.constant 2 : index
    %c0_115 = arith.constant 0 : index
    %100 = vector.load %arg5[%c1_113, %c2_114, %c0_115] : memref<3x3x8xf32, #tpu.memory_space<vmem>>, vector<1x1x8xf32>
    %101 = vector.broadcast %100 : vector<1x1x8xf32> to vector<16x16x8xf32>
    %102 = arith.mulf %99, %101 : vector<16x16x8xf32>
    %103 = arith.addf %98, %102 : vector<16x16x8xf32>
    %c2_116 = arith.constant 2 : index
    %c0_117 = arith.constant 0 : index
    %c0_118 = arith.constant 0 : index
    %104 = vector.load %arg10[%c2_116, %c0_117, %c0_118] : memref<18x24x8xf32, #tpu.memory_space<vmem>>, vector<16x16x8xf32>
    %c2_119 = arith.constant 2 : index
    %c0_120 = arith.constant 0 : index
    %c0_121 = arith.constant 0 : index
    %105 = vector.load %arg5[%c2_119, %c0_120, %c0_121] : memref<3x3x8xf32, #tpu.memory_space<vmem>>, vector<1x1x8xf32>
    %106 = vector.broadcast %105 : vector<1x1x8xf32> to vector<16x16x8xf32>
    %107 = arith.mulf %104, %106 : vector<16x16x8xf32>
    %108 = arith.addf %103, %107 : vector<16x16x8xf32>
    %c2_122 = arith.constant 2 : index
    %c1_123 = arith.constant 1 : index
    %c0_124 = arith.constant 0 : index
    %109 = vector.load %arg10[%c2_122, %c1_123, %c0_124] : memref<18x24x8xf32, #tpu.memory_space<vmem>>, vector<16x16x8xf32>
    %c2_125 = arith.constant 2 : index
    %c1_126 = arith.constant 1 : index
    %c0_127 = arith.constant 0 : index
    %110 = vector.load %arg5[%c2_125, %c1_126, %c0_127] : memref<3x3x8xf32, #tpu.memory_space<vmem>>, vector<1x1x8xf32>
    %111 = vector.broadcast %110 : vector<1x1x8xf32> to vector<16x16x8xf32>
    %112 = arith.mulf %109, %111 : vector<16x16x8xf32>
    %113 = arith.addf %108, %112 : vector<16x16x8xf32>
    %c2_128 = arith.constant 2 : index
    %c2_129 = arith.constant 2 : index
    %c0_130 = arith.constant 0 : index
    %114 = vector.load %arg10[%c2_128, %c2_129, %c0_130] : memref<18x24x8xf32, #tpu.memory_space<vmem>>, vector<16x16x8xf32>
    %c2_131 = arith.constant 2 : index
    %c2_132 = arith.constant 2 : index
    %c0_133 = arith.constant 0 : index
    %115 = vector.load %arg5[%c2_131, %c2_132, %c0_133] : memref<3x3x8xf32, #tpu.memory_space<vmem>>, vector<1x1x8xf32>
    %116 = vector.broadcast %115 : vector<1x1x8xf32> to vector<16x16x8xf32>
    %117 = arith.mulf %114, %116 : vector<16x16x8xf32>
    %118 = arith.addf %113, %117 : vector<16x16x8xf32>
    %119 = vector.shape_cast %118 : vector<16x16x8xf32> to vector<256x8xf32>
    %c0_134 = arith.constant 0 : index
    %c0_135 = arith.constant 0 : index
    %120 = vector.load %arg6[%c0_134, %c0_135] : memref<8x8xf32, #tpu.memory_space<vmem>>, vector<8x8xf32>
    %cst_136 = arith.constant dense<0.000000e+00> : vector<256x8xf32>
    %121 = tpu.matmul %119, %120, %cst_136 {dimension_numbers = #tpu.dot_dimension_numbers<[1], [0], [0], [1], [0, 0, 1, 1], [], []>} : vector<256x8xf32>, vector<8x8xf32>, vector<256x8xf32> -> vector<256x8xf32>
    %122 = vector.shape_cast %121 : vector<256x8xf32> to vector<16x16x8xf32>
    %c0_137 = arith.constant 0 : index
    %c0_138 = arith.constant 0 : index
    %c0_139 = arith.constant 0 : index
    %123 = vector.load %arg7[%c0_137, %c0_138, %c0_139] : memref<1x1x8xf32, #tpu.memory_space<vmem>>, vector<1x1x8xf32>
    %124 = vector.broadcast %123 : vector<1x1x8xf32> to vector<16x16x8xf32>
    %125 = arith.addf %122, %124 : vector<16x16x8xf32>
    %cst_140 = arith.constant -3.40282347E+38 : f32
    %126 = vector.broadcast %cst_140 : f32 to vector<18x24x8xf32>
    %c0_141 = arith.constant 0 : index
    %c0_142 = arith.constant 0 : index
    %c0_143 = arith.constant 0 : index
    %127 = vector.load %arg11[%c0_141, %c0_142, %c0_143] : memref<18x24x8xf32, #tpu.memory_space<vmem>>, vector<18x24x8xf32>
    tpu.vector_store %arg11[%c0_141, %c0_142, %c0_143], %126 {strides = array<i32>} : memref<18x24x8xf32, #tpu.memory_space<vmem>>, vector<18x24x8xf32>,
    %c1_144 = arith.constant 1 : index
    %c1_145 = arith.constant 1 : index
    %c0_146 = arith.constant 0 : index
    %128 = vector.load %arg11[%c1_144, %c1_145, %c0_146] : memref<18x24x8xf32, #tpu.memory_space<vmem>>, vector<16x16x8xf32>
    tpu.vector_store %arg11[%c1_144, %c1_145, %c0_146], %125 {strides = array<i32>} : memref<18x24x8xf32, #tpu.memory_space<vmem>>, vector<16x16x8xf32>,
    %c0_147 = arith.constant 0 : index
    %c0_148 = arith.constant 0 : index
    %c0_149 = arith.constant 0 : index
    %129 = tpu.strided_load %arg11[%c0_147, %c0_148, %c0_149] {strides = array<i32: 1, 2, 1>} : memref<18x24x8xf32, #tpu.memory_space<vmem>>, vector<18x8x8xf32>
    %c0_150 = arith.constant 0 : index
    %c1_151 = arith.constant 1 : index
    %c0_152 = arith.constant 0 : index
    %130 = tpu.strided_load %arg11[%c0_150, %c1_151, %c0_152] {strides = array<i32: 1, 2, 1>} : memref<18x24x8xf32, #tpu.memory_space<vmem>>, vector<18x8x8xf32>
    %c0_153 = arith.constant 0 : index
    %c2_154 = arith.constant 2 : index
    %c0_155 = arith.constant 0 : index
    %131 = tpu.strided_load %arg11[%c0_153, %c2_154, %c0_155] {strides = array<i32: 1, 2, 1>} : memref<18x24x8xf32, #tpu.memory_space<vmem>>, vector<18x8x8xf32>
    %132 = arith.maximumf %129, %130 : vector<18x8x8xf32>
    %133 = arith.maximumf %132, %131 : vector<18x8x8xf32>
    %134 = vector.extract_strided_slice %133 {offsets = [0, 0, 0], sizes = [16, 8, 8], strides = [1, 1, 1]} : vector<18x8x8xf32> to vector<16x8x8xf32>
    %135 = vector.shape_cast %134 : vector<16x8x8xf32> to vector<8x2x8x8xf32>
    %136 = vector.extract_strided_slice %133 {offsets = [2, 0, 0], sizes = [16, 8, 8], strides = [1, 1, 1]} : vector<18x8x8xf32> to vector<16x8x8xf32>
    %137 = vector.shape_cast %136 : vector<16x8x8xf32> to vector<8x2x8x8xf32>
    %138 = vector.extract_strided_slice %135 {offsets = [0, 0, 0, 0], sizes = [8, 1, 8, 8], strides = [1, 1, 1, 1]} : vector<8x2x8x8xf32> to vector<8x1x8x8xf32>
    %139 = vector.shape_cast %138 : vector<8x1x8x8xf32> to vector<8x8x8xf32>
    %140 = vector.extract_strided_slice %135 {offsets = [0, 1, 0, 0], sizes = [8, 1, 8, 8], strides = [1, 1, 1, 1]} : vector<8x2x8x8xf32> to vector<8x1x8x8xf32>
    %141 = vector.shape_cast %140 : vector<8x1x8x8xf32> to vector<8x8x8xf32>
    %142 = arith.maximumf %139, %141 : vector<8x8x8xf32>
    %143 = vector.extract_strided_slice %137 {offsets = [0, 0, 0, 0], sizes = [8, 1, 8, 8], strides = [1, 1, 1, 1]} : vector<8x2x8x8xf32> to vector<8x1x8x8xf32>
    %144 = vector.shape_cast %143 : vector<8x1x8x8xf32> to vector<8x8x8xf32>
    %145 = arith.maximumf %142, %144 : vector<8x8x8xf32>
    %146 = arith.addf %145, %9 : vector<8x8x8xf32>
    %cst_156 = arith.constant 0.000000e+00 : f32
    %147 = vector.broadcast %cst_156 : f32 to vector<8x8x8xf32>
    %148 = arith.maximumf %146, %147 : vector<8x8x8xf32>
    %c0_157 = arith.constant 0 : index
    %c0_158 = arith.constant 0 : index
    %c0_159 = arith.constant 0 : index
    %c0_160 = arith.constant 0 : index
    %149 = vector.load %arg9[%c0_157, %c0_158, %c0_159, %c0_160] : memref<1x8x8x8xf32, #tpu.memory_space<vmem>>, vector<1x8x8x8xf32>
    %150 = vector.shape_cast %149 : vector<1x8x8x8xf32> to vector<8x8x8xf32>
    %151 = vector.shape_cast %148 : vector<8x8x8xf32> to vector<1x8x8x8xf32>
    tpu.vector_store %arg9[%c0_157, %c0_158, %c0_159, %c0_160], %151 {strides = array<i32>} : memref<1x8x8x8xf32, #tpu.memory_space<vmem>>, vector<1x8x8x8xf32>,
    return
  }
  func.func @transform_0(%arg0: i32) -> (i32, i32, i32, i32) {
    %c0_i32 = arith.constant 0 : i32
    %c0_i32_0 = arith.constant 0 : i32
    %c0_i32_1 = arith.constant 0 : i32
    %c0_i32_2 = arith.constant 0 : i32
    return %arg0, %c0_i32, %c0_i32_0, %c0_i32_1 : i32, i32, i32, i32
  }
  func.func @transform_1(%arg0: i32) -> (i32, i32, i32) {
    %c0_i32 = arith.constant 0 : i32
    %c0_i32_0 = arith.constant 0 : i32
    %c0_i32_1 = arith.constant 0 : i32
    %c0_i32_2 = arith.constant 0 : i32
    return %c0_i32, %c0_i32_0, %c0_i32_1 : i32, i32, i32
  }
  func.func @transform_2(%arg0: i32) -> (i32, i32) {
    %c0_i32 = arith.constant 0 : i32
    %c0_i32_0 = arith.constant 0 : i32
    %c0_i32_1 = arith.constant 0 : i32
    return %c0_i32, %c0_i32_0 : i32, i32
  }
  func.func @transform_3(%arg0: i32) -> (i32, i32, i32) {
    %c0_i32 = arith.constant 0 : i32
    %c0_i32_0 = arith.constant 0 : i32
    %c0_i32_1 = arith.constant 0 : i32
    %c0_i32_2 = arith.constant 0 : i32
    return %c0_i32, %c0_i32_0, %c0_i32_1 : i32, i32, i32
  }
  func.func @transform_4(%arg0: i32) -> (i32, i32, i32) {
    %c0_i32 = arith.constant 0 : i32
    %c0_i32_0 = arith.constant 0 : i32
    %c0_i32_1 = arith.constant 0 : i32
    %c0_i32_2 = arith.constant 0 : i32
    return %c0_i32, %c0_i32_0, %c0_i32_1 : i32, i32, i32
  }
  func.func @transform_5(%arg0: i32) -> (i32, i32) {
    %c0_i32 = arith.constant 0 : i32
    %c0_i32_0 = arith.constant 0 : i32
    %c0_i32_1 = arith.constant 0 : i32
    return %c0_i32, %c0_i32_0 : i32, i32
  }
  func.func @transform_6(%arg0: i32) -> (i32, i32, i32) {
    %c0_i32 = arith.constant 0 : i32
    %c0_i32_0 = arith.constant 0 : i32
    %c0_i32_1 = arith.constant 0 : i32
    %c0_i32_2 = arith.constant 0 : i32
    return %c0_i32, %c0_i32_0, %c0_i32_1 : i32, i32, i32
  }
  func.func @transform_7(%arg0: i32) -> (i32, i32) {
    %c0_i32 = arith.constant 0 : i32
    %c0_i32_0 = arith.constant 0 : i32
    %c0_i32_1 = arith.constant 0 : i32
    return %c0_i32, %c0_i32_0 : i32, i32
  }
  func.func @transform_8(%arg0: i32) -> (i32, i32, i32, i32) {
    %c0_i32 = arith.constant 0 : i32
    %c0_i32_0 = arith.constant 0 : i32
    %c0_i32_1 = arith.constant 0 : i32
    %c0_i32_2 = arith.constant 0 : i32
    return %arg0, %c0_i32, %c0_i32_0, %c0_i32_1 : i32, i32, i32, i32
  }
}

</mosaic_0001>

<bundles_post_ra>
// kernel: tpu_custom_call.1
= control target key start
LH: loop header
LB: loop body
LE: loop exit
PB: predicated region body
PF: predicated region fallthrough
CT: control target
= control target key end

     0   :  { %13 = vsyncpa [#allocation5], 0  ;;  %s5429_s0 = inlined_call_operand.vmem [shape: f32[2,18,24,4], index: 0, kind: input, shape index: {}]   ;;  %s5430_s1 = inlined_call_operand.vmem [shape: f32[3,3,4], index: 1, kind: input, shape index: {}]   ;;  %s5431_s2 = inlined_call_operand.vmem [shape: f32[4,8], index: 2, kind: input, shape index: {}]   ;;  %s5432_s3 = inlined_call_operand.vmem [shape: f32[1,1,8], index: 3, kind: input, shape index: {}]   ;;  %s5433_s4 = inlined_call_operand.vmem [shape: f32[3,3,8], index: 4, kind: input, shape index: {}]   ;;  %s5434_s5 = inlined_call_operand.vmem [shape: f32[8,8], index: 5, kind: input, shape index: {}]   ;;  %s5435_s6 = inlined_call_operand.vmem [shape: f32[1,1,8], index: 6, kind: input, shape index: {}]   ;;  %s5436_s7 = inlined_call_operand.vmem [shape: f32[4,8], index: 7, kind: input, shape index: {}]   ;;  %s5437_s8 = inlined_call_operand.hbm [shape: f32[2,8,8,8], index: 8, kind: output, shape index: {}]  }
   0x1   :  { %15 = vsyncpa [#allocation5 + $0x1], 0  ;;  %s3554_s27 = smov 0   ;;  %s3556_s28 = smov 0  }
   0x2   :  { %s3558_s29 = smov 0   ;;  %s3560_s30 = smov 0  }
   0x3 LB: > { %s3575_s9 = sadd.s32 4294967295, %s3503_s30   ;;  %s3053_s10 = sadd.s32 4294967294, %s3503_s30   ;;  %s3503_s30 = sphi %s3560_s30, %s5448_s30   ;;  %s3499_s29 = sphi %s3558_s29, %s5447_s29   ;;  %s3495_s28 = sphi %s3556_s28, %s5446_s28   ;;  %s3491_s27 = sphi %s3554_s27, %s5445_s27  }
   0x4   : > { %s3579_s11 = sadd.s32 1, %s3503_s30   ;;  %s201_s12 = sadd.s32 1, %s3499_s29 }
   0x5   : > { %s198_s13 = ssub.s32 %s3503_s30, %s3579_s11  ;;  %p211_p0 = scmp.ne.s32.totalorder %s3499_s29, %s3495_s28 }
   0x6   : > { %p199_p1 = scmp.eq.s32.totalorder %s198_s13, 0  ;;  %p212_p2 = scmp.eq.s32.totalorder %s3575_s9, 1 }
   0x7   : > { %p217_p3 = scmp.ne.s32.totalorder %s3495_s28, %s3491_s27  ;;  %p218_p4 = scmp.eq.s32.totalorder %s3053_s10, 1 }
   0x8   : > { %s3590_s14 = scalar_select %p199_p1, %s3499_s29, %s201_s12  }
   0x9   : > { %p3592_p5 = por %p212_p2, %p211_p0  ;;  %p3596_p6 = por %p218_p4, %p217_p3 }
   0xa   : > { %p3056_p7 = scmp.ge.s32.totalorder %s3503_s30, 1  ;;  %p265_p8 = scmp.lt.s32.totalorder %s3503_s30, 3 }
   0xc   : > { %p266_p9 = pnand %p3056_p7, %p265_p8 }
   0xe   : > { %269 = sbr.rel (%p266_p9) target bundleno = 616 (0x268), region = 52 }
  0x13   : > { %vm346_vm0 = vcmask 1043456   ;;  %v3605_v0 = vld [vmem:[%s5431_s2] sm:$0xf]  ;;  %p299_p10 = scmp.lt.s32.totalorder %s3575_s9, 1  ;;  %v3634_v4 = vld [vmem:[%s5430_s1 + $0x4] ss:$0 sm:$0xff] }
  0x14   : > { %3274 = vmatpush.msk.msra.mxu1 %vm346_vm0, %v3605_v0  ;;  %v3614_v1 = vld [vmem:[%s5430_s1] ss:$0 sm:$0xff]  ;;  %v3619_v2 = vld [vmem:[%s5430_s1 + $0x1] ss:$0 sm:$0xff]  ;;  %v3624_v3 = vld [vmem:[%s5430_s1 + $0x2] ss:$0 sm:$0xff] }
  0x15   : > { %s300_s19 = scalar_select %p299_p10, %s3575_s9, 1  ;;  %v3646_v12 = vld [vmem:[%s5430_s1 + $0x5] ss:$0 sm:$0xff]  ;;  %v3652_v14 = vld [vmem:[%s5430_s1 + $0x6] ss:$0 sm:$0xff]  ;;  %vm321_vm1 = vcmask 31744  }
  0x16   : > { %v3657_v15 = vld [vmem:[%s5430_s1 + $0x8] ss:$0 sm:$0xff]  ;;  %v3675_v31 = vld [vmem:[%s5430_s1 + $0x9] ss:$0 sm:$0xff]  ;;  %v3685_v38 = vld [vmem:[%s5430_s1 + $0xa] ss:$0 sm:$0xff] }
  0x17   : > { %s3354_s24 = smul.u32 432, %s300_s19  ;;  %vm1526_vm2 = vcmask 64512   ;;  %s296_s19 = sand.u32 1, %s3495_s28  }
  0x18   : > { %s3057_s20 = sshll.u32 %s296_s19, 6  ;;  %s3350_s17 = sshll.u32 %s3575_s9, 6 }
  0x19   : > { %s3629_s13 = scalar_lea.vmem %s5429_s0, %s3354_s24  ;;  %s5238_s21 = scalar_lea.vmem [#allocation4], %s3057_s20 }
  0x1a   : > { %v391_v5 = vld [vmem:[%s3629_s13] sm:$0xff]  ;;  %v3076_v11 = vld [vmem:[%s3629_s13 + $0x18] sm:$0xff]  ;;  %v392_v19 = vld [vmem:[%s3629_s13 + $0x8] sm:$0xff]  ;;  %s2987_s22 = scalar_lea.hbm %s5437_s8, %s3350_s17  ;;  %s2976_s9 = scalar_lea.sflag [#allocation5], %s296_s19 }
  0x1b   : > { %v457_v6 = vld [vmem:[%s3629_s13 + $0x1] sm:$0xff]  ;;  %v425_v8 = vmul.f32 %v3614_v1, %v391_v5  ;;  %v3109_v13 = vld [vmem:[%s3629_s13 + $0x19] sm:$0xff]  ;;  %v689_v17 = vmul.f32 %v3634_v4, %v3076_v11  ;;  %v426_v20 = vmul.f32 %v3614_v1, %v392_v19  ;;  %v458_v21 = vld [vmem:[%s3629_s13 + $0x9] sm:$0xff]  ;;  %v427_v24 = vmul.f32 %v3614_v1, %v3076_v11  ;;  %s2990_s23 = sshll.u32 %s2987_s22, 4  ;;  %s3461_s12 = scalar_lea.hbm %s5437_s8, 128  ;;  %s2991_s23 = int_to_ptr.hbm [resolvable:$true] %s2990_s23 }
  0x1c   : > { %v555_v7 = vld [vmem:[%s3629_s13 + $0x2] sm:$0xff]  ;;  %v491_v9 = vmul.f32 %v3619_v2, %v457_v6  ;;  %v3142_v18 = vld [vmem:[%s3629_s13 + $0x1a] sm:$0xff]  ;;  %v556_v22 = vld [vmem:[%s3629_s13 + $0xa] sm:$0xff]  ;;  %v493_v25 = vmul.f32 %v3619_v2, %v3109_v13  ;;  %v787_v27 = vmul.f32 %v3646_v12, %v3109_v13  ;;  %v492_v29 = vmul.f32 %v3619_v2, %v458_v21  ;;  %s3455_s24 = sshra.s32 %s2991_s23, 4  ;;  %s3456_s24 = int_to_ptr.hbm [resolvable:$true] %s3455_s24 }
  0x1d   : > { %v589_v10 = vmul.f32 %v3624_v3, %v555_v7  ;;  %v3077_v23 = vld [vmem:[%s3629_s13 + $0x20] sm:$0xff]  ;;  %v3175_v28 = vld [vmem:[%s3629_s13 + $0x30] sm:$0xff]  ;;  %v590_v30 = vmul.f32 %v3624_v3, %v556_v22  ;;  %v591_v33 = vmul.f32 %v3624_v3, %v3142_v18  ;;  %v885_v35 = vmul.f32 %v3652_v14, %v3142_v18  ;;  %v3176_v43 = vld [vmem:[%s3629_s13 + $0x38] sm:$0xff]  ;;  %s3457_s25 = scalar_lea.hbm %s3456_s24, 64  ;;  %p3462_p0 = scmp.lt.s32.totalorder %s3456_s24, %s5437_s8 }
  0x1e   : > { %v523_v16 = vadd.f32 %v491_v9, %v425_v8  ;;  %v3110_v32 = vld [vmem:[%s3629_s13 + $0x21] sm:$0xff]  ;;  %v3208_v36 = vld [vmem:[%s3629_s13 + $0x31] sm:$0xff]  ;;  %v524_v39 = vadd.f32 %v492_v29, %v426_v20  ;;  %v690_v40 = vmul.f32 %v3634_v4, %v3077_v23  ;;  %v985_v41 = vmul.f32 %v3657_v15, %v3175_v28  ;;  %v3209_v51 = vld [vmem:[%s3629_s13 + $0x39] sm:$0xff]  ;;  %p3458_p11 = scmp.ne.s32.totalorder %s3456_s24, %s3457_s25  ;;  %p3463_p1 = scmp.lt.s32.totalorder %s3461_s12, %s3457_s25 }
  0x1f   : > { %v3241_v37 = vld [vmem:[%s3629_s13 + $0x32] sm:$0xff]  ;;  %v3143_v42 = vld [vmem:[%s3629_s13 + $0x22] sm:$0xff]  ;;  %v525_v44 = vadd.f32 %v493_v25, %v427_v24  ;;  %v691_v45 = vmul.f32 %v3634_v4, %v3175_v28  ;;  %v788_v48 = vmul.f32 %v3646_v12, %v3110_v32  ;;  %v428_v49 = vmul.f32 %v3614_v1, %v3077_v23  ;;  %v3242_v18 = vld [vmem:[%s3629_s13 + $0x3a] sm:$0xff] }
  0x20   : > { %v621_v26 = vadd.f32 %v589_v10, %v523_v16  ;;  %v622_v47 = vadd.f32 %v590_v30, %v524_v39  ;;  %v1083_v50 = vmul.f32 %v3675_v31, %v3208_v36  ;;  %v494_v53 = vmul.f32 %v3619_v2, %v3110_v32  ;;  %v3177_v19 = vld [vmem:[%s3629_s13 + $0x48] sm:$0xff]  ;;  %p3459_p12 = pnand %p3458_p11, %p3592_p5  ;;  %p3464_p2 = por %p3463_p1, %p3462_p0 }
  0x21   : > { %v623_v52 = vadd.f32 %v591_v33, %v525_v44  ;;  %v592_v54 = vmul.f32 %v3624_v3, %v3143_v42  ;;  %v886_v57 = vmul.f32 %v3652_v14, %v3143_v42  ;;  %v789_v58 = vmul.f32 %v3646_v12, %v3208_v36  ;;  %v3210_v22 = vld [vmem:[%s3629_s13 + $0x49] sm:$0xff] }
  0x22   : > { %v721_v34 = vadd.f32 %v689_v17, %v621_v26  ;;  %v722_v56 = vadd.f32 %v690_v40, %v622_v47  ;;  %v1181_v59 = vmul.f32 %v3685_v38, %v3241_v37  ;;  %v526_v61 = vadd.f32 %v494_v53, %v428_v49  ;;  %v3178_v40 = vld [vmem:[%s3629_s13 + $0x50] sm:$0xff]  ;;  %p3460_p13 = pneg %p3459_p12 }
  0x23   : > { %v723_v60 = vadd.f32 %v691_v45, %v623_v52  ;;  %v986_v5 = vmul.f32 %v3657_v15, %v3176_v43  ;;  %v1084_v6 = vmul.f32 %v3675_v31, %v3209_v51  ;;  %v692_v8 = vmul.f32 %v3634_v4, %v3176_v43  ;;  %v3243_v44 = vld [vmem:[%s3629_s13 + $0x4a] sm:$0xff] }
  0x24   : > { %v819_v46 = vadd.f32 %v787_v27, %v721_v34  ;;  %v820_v63 = vadd.f32 %v788_v48, %v722_v56  ;;  %v624_v7 = vadd.f32 %v592_v54, %v526_v61  ;;  %v429_v9 = vmul.f32 %v3614_v1, %v3175_v28  ;;  %v3211_v47 = vld [vmem:[%s3629_s13 + $0x51] sm:$0xff]  ;;  %p3465_p3 = pnand %p3464_p2, %p3460_p13 }
  0x25   : > { %v495_v10 = vmul.f32 %v3619_v2, %v3208_v36  ;;  %v821_v16 = vadd.f32 %v789_v58, %v723_v60  ;;  %v887_v17 = vmul.f32 %v3652_v14, %v3241_v37  ;;  %v790_v24 = vmul.f32 %v3646_v12, %v3209_v51  ;;  %v3179_v60 = vld [vmem:[%s3629_s13 + $0x60] sm:$0xff] }
  0x26   : > { %v917_v55 = vadd.f32 %v885_v35, %v819_v46  ;;  %v918_v13 = vadd.f32 %v886_v57, %v820_v63  ;;  %v724_v23 = vadd.f32 %v692_v8, %v624_v7  ;;  %v593_v26 = vmul.f32 %v3624_v3, %v3241_v37 }
  0x27   : > { %v527_v25 = vadd.f32 %v495_v10, %v429_v9  ;;  %v1182_v28 = vmul.f32 %v3685_v38, %v3242_v18  ;;  %v919_v29 = vadd.f32 %v887_v17, %v821_v16  ;;  %v987_v30 = vmul.f32 %v3657_v15, %v3177_v19  ;;  %v3212_v9 = vld [vmem:[%s3629_s13 + $0x61] sm:$0xff] }
  0x28   : > { %v1017_v62 = vadd.f32 %v985_v41, %v917_v55  ;;  %v1018_v21 = vadd.f32 %v986_v5, %v918_v13  ;;  %v1085_v32 = vmul.f32 %v3675_v31, %v3210_v22  ;;  %v822_v33 = vadd.f32 %v790_v24, %v724_v23  ;;  %v3180_v24 = vld [vmem:[%s3629_s13 + $0x68] sm:$0xff] }
  0x29   : > { %v888_v34 = vmul.f32 %v3652_v14, %v3242_v18  ;;  %v625_v35 = vadd.f32 %v593_v26, %v527_v25  ;;  %v693_v36 = vmul.f32 %v3634_v4, %v3177_v19  ;;  %v1019_v37 = vadd.f32 %v987_v30, %v919_v29  ;;  %v3213_v30 = vld [vmem:[%s3629_s13 + $0x69] sm:$0xff] }
  0x2a   : > { %v1115_v11 = vadd.f32 %v1083_v50, %v1017_v62  ;;  %v1116_v27 = vadd.f32 %v1084_v6, %v1018_v21  ;;  %v430_v41 = vmul.f32 %v3614_v1, %v3176_v43  ;;  %v496_v42 = vmul.f32 %v3619_v2, %v3209_v51 }
  0x2b   : > { %v920_v45 = vadd.f32 %v888_v34, %v822_v33  ;;  %v988_v46 = vmul.f32 %v3657_v15, %v3178_v40  ;;  %v725_v48 = vadd.f32 %v693_v36, %v625_v35  ;;  %v791_v49 = vmul.f32 %v3646_v12, %v3210_v22 }
  0x2c   : > { %v1213_v20 = vadd.f32 %v1181_v59, %v1115_v11  ;;  %v1214_v39 = vadd.f32 %v1182_v28, %v1116_v27  ;;  %v1117_v50 = vadd.f32 %v1085_v32, %v1019_v37  ;;  %v1183_v52 = vmul.f32 %v3685_v38, %v3243_v44  ;;  %v3244_v59 = vld [vmem:[%s3629_s13 + $0x52] sm:$0xff] }
  0x2d   : > { %v528_v53 = vadd.f32 %v496_v42, %v430_v41  ;;  %v594_v43 = vmul.f32 %v3624_v3, %v3242_v18  ;;  %v1086_v51 = vmul.f32 %v3675_v31, %v3211_v47  ;;  %v1020_v54 = vadd.f32 %v988_v46, %v920_v45 }
  0x2e   : > { %3275 = vmatmul.msk.f32.vlgmr.msra.gmra.mxu1 %vm321_vm1, %v1213_v20  ;;  %v823_v55 = vadd.f32 %v791_v49, %v725_v48  ;;  %v889_v56 = vmul.f32 %v3652_v14, %v3243_v44  ;;  %v694_v57 = vmul.f32 %v3634_v4, %v3178_v40  ;;  %v1215_v58 = vadd.f32 %v1183_v52, %v1117_v50  ;;  %v3181_v49 = vld [vmem:[%s3629_s13 + $0x78] sm:$0xff] }
  0x2f   : > { %v626_v61 = vadd.f32 %v594_v43, %v528_v53  ;;  %v431_v62 = vmul.f32 %v3614_v1, %v3177_v19  ;;  %v497_v63 = vmul.f32 %v3619_v2, %v3210_v22  ;;  %v1118_v5 = vadd.f32 %v1086_v51, %v1020_v54  ;;  %v3245_v22 = vld [vmem:[%s3629_s13 + $0x62] sm:$0xff] }
  0x30   : > { %v1184_v6 = vmul.f32 %v3685_v38, %v3244_v59  ;;  %v921_v7 = vadd.f32 %v889_v56, %v823_v55  ;;  %v989_v8 = vmul.f32 %v3657_v15, %v3179_v60  ;;  %v792_v11 = vmul.f32 %v3646_v12, %v3211_v47  ;;  %v3214_v56 = vld [vmem:[%s3629_s13 + $0x79] sm:$0xff] }
  0x31   : > { %v726_v10 = vadd.f32 %v694_v57, %v626_v61  ;;  %v529_v13 = vadd.f32 %v497_v63, %v431_v62  ;;  %v595_v16 = vmul.f32 %v3624_v3, %v3243_v44  ;;  %v1087_v17 = vmul.f32 %v3675_v31, %v3212_v9 }
  0x32   : > { %v1216_v18 = vadd.f32 %v1184_v6, %v1118_v5  ;;  %v1021_v19 = vadd.f32 %v989_v8, %v921_v7  ;;  %v890_v20 = vmul.f32 %v3652_v14, %v3244_v59  ;;  %v695_v21 = vmul.f32 %v3634_v4, %v3179_v60 }
  0x33   : > { %v824_v23 = vadd.f32 %v792_v11, %v726_v10  ;;  %v627_v25 = vadd.f32 %v595_v16, %v529_v13  ;;  %v432_v26 = vmul.f32 %v3614_v1, %v3178_v40  ;;  %v498_v27 = vmul.f32 %v3619_v2, %v3211_v47  ;;  %v3246_v47 = vld [vmem:[%s3629_s13 + $0x6a] sm:$0xff]  ;;  %v3182_v10 = vld [vmem:[%s3629_s13 + $0x80] sm:$0xff] }
  0x34   : > { %v1185_v28 = vmul.f32 %v3685_v38, %v3245_v22  ;;  %v990_v29 = vmul.f32 %v3657_v15, %v3180_v24  ;;  %v793_v32 = vmul.f32 %v3646_v12, %v3212_v9  ;;  %v596_v33 = vmul.f32 %v3624_v3, %v3244_v59 }
  0x35   : > { %v1119_v34 = vadd.f32 %v1087_v17, %v1021_v19  ;;  %v922_v35 = vadd.f32 %v890_v20, %v824_v23  ;;  %v727_v36 = vadd.f32 %v695_v21, %v627_v25  ;;  %v1088_v37 = vmul.f32 %v3675_v31, %v3213_v30  ;;  %v3063_v25 = vld [vmem:[%s3629_s13 + $0xd9] ss:$2 sm:$0xff] }
  0x36   : > { %3276 = vmatmul.msk.f32.gmra.mxu1 %vm321_vm1, %v1214_v39  ;;  %v530_v39 = vadd.f32 %v498_v27, %v432_v26  ;;  %v891_v40 = vmul.f32 %v3652_v14, %v3245_v22  ;;  %v696_v41 = vmul.f32 %v3634_v4, %v3180_v24  ;;  %v433_v42 = vmul.f32 %v3614_v1, %v3179_v60  ;;  %v3215_v26 = vld [vmem:[%s3629_s13 + $0x81] sm:$0xff] }
  0x37   : > { %v499_v44 = vmul.f32 %v3619_v2, %v3212_v9  ;;  %v1217_v45 = vadd.f32 %v1185_v28, %v1119_v34  ;;  %v1022_v46 = vadd.f32 %v990_v29, %v922_v35  ;;  %v825_v48 = vadd.f32 %v793_v32, %v727_v36  ;;  %v3247_v9 = vld [vmem:[%s3629_s13 + $0x7a] sm:$0xff] }
  0x38   : > { %v628_v50 = vadd.f32 %v596_v33, %v530_v39  ;;  %v1186_v52 = vmul.f32 %v3685_v38, %v3246_v47  ;;  %v991_v53 = vmul.f32 %v3657_v15, %v3181_v49  ;;  %v597_v51 = vmul.f32 %v3624_v3, %v3245_v22  ;;  %v3183_v39 = vld [vmem:[%s3629_s13 + $0x90] sm:$0xff] }
  0x39   : > { %v531_v43 = vadd.f32 %v499_v44, %v433_v42  ;;  %v1120_v54 = vadd.f32 %v1088_v37, %v1022_v46  ;;  %v923_v55 = vadd.f32 %v891_v40, %v825_v48  ;;  %v434_v59 = vmul.f32 %v3614_v1, %v3180_v24  ;;  %v320_v24 = vld [vmem:[%s5436_s7] sm:$0xf]  ;;  %v3216_v48 = vld [vmem:[%s3629_s13 + $0x91] sm:$0xff] }
  0x3a   : > { %v728_v57 = vadd.f32 %v696_v41, %v628_v50  ;;  %v500_v60 = vmul.f32 %v3619_v2, %v3213_v30  ;;  %v1089_v61 = vmul.f32 %v3675_v31, %v3214_v56  ;;  %v697_v63 = vmul.f32 %v3634_v4, %v3181_v49  ;;  %3351 = vmatpush.msk.msra.mxu3 %vm346_vm0, %v320_v24  ;;  %v3248_v37 = vld [vmem:[%s3629_s13 + $0x82] sm:$0xff] }
  0x3b   : > { %v629_v62 = vadd.f32 %v597_v51, %v531_v43  ;;  %v1218_v5 = vadd.f32 %v1186_v52, %v1120_v54  ;;  %v1023_v6 = vadd.f32 %v991_v53, %v923_v55  ;;  %v892_v8 = vmul.f32 %v3652_v14, %v3246_v47  ;;  %3067 = vmatpush.msk.msra.mxu0 %vm346_vm0, %v320_v24  ;;  %v3808_v51 = vld [vmem:[%s3629_s13 + $0x98] sm:$0xff] }
  0x3c   : > { %v532_v11 = vadd.f32 %v500_v60, %v434_v59  ;;  %v598_v13 = vmul.f32 %v3624_v3, %v3246_v47  ;;  %v795_v17 = vmul.f32 %v3646_v12, %v3214_v56  ;;  %v501_v19 = vmul.f32 %v3619_v2, %v3214_v56  ;;  %3072 = vmatmul.msk.f32.vlgmr.msra.gmra.mxu3 %vm321_vm1, %v3063_v25  ;;  %v3249_v59 = vld [vmem:[%s3629_s13 + $0x92] sm:$0xff] }
  0x3d   : > { %v729_v16 = vadd.f32 %v697_v63, %v629_v62  ;;  %v1121_v20 = vadd.f32 %v1089_v61, %v1023_v6  ;;  %v1187_v21 = vmul.f32 %v3685_v38, %v3247_v9  ;;  %v992_v23 = vmul.f32 %v3657_v15, %v3182_v10  ;;  %3352 = vmatpush.msk.msrb.mxu3 %vm346_vm0, %v3605_v0  ;;  %v3835_v24 = vld [vmem:[%s3629_s13 + $0xd8] sm:$0xff] }
  0x3e   : > { %3277 = vmatmul.msk.f32.gmra.mxu1 %vm321_vm1, %v1215_v58  ;;  %v794_v58 = vmul.f32 %v3646_v12, %v3213_v30  ;;  %v630_v27 = vadd.f32 %v598_v13, %v532_v11  ;;  %v698_v28 = vmul.f32 %v3634_v4, %v3182_v10  ;;  %v893_v30 = vmul.f32 %v3652_v14, %v3247_v9  ;;  %v3824_v13 = vld [vmem:[%s3629_s13 + $0xa8] sm:$0xff]  ;;  %v3838_v25 = vld [vmem:[%s3629_s13 + $0xd9] sm:$0xff] }
  0x3f   : > { %v827_v29 = vadd.f32 %v795_v17, %v729_v16  ;;  %v599_v33 = vmul.f32 %v3624_v3, %v3247_v9  ;;  %v1219_v34 = vadd.f32 %v1187_v21, %v1121_v20  ;;  %v1090_v36 = vmul.f32 %v3675_v31, %v3215_v26  ;;  %v3831_v21 = vld [vmem:[%s3629_s13 + $0x9a] sm:$0xff] }
  0x40   : > { %v826_v7 = vadd.f32 %v794_v58, %v728_v57  ;;  %v730_v40 = vadd.f32 %v698_v28, %v630_v27  ;;  %v796_v41 = vmul.f32 %v3646_v12, %v3215_v26  ;;  %v993_v44 = vmul.f32 %v3657_v15, %v3183_v39 }
  0x41   : > { %v925_v42 = vadd.f32 %v893_v30, %v827_v29  ;;  %v699_v46 = vmul.f32 %v3634_v4, %v3183_v39  ;;  %v1188_v47 = vmul.f32 %v3685_v38, %v3248_v37  ;;  %v436_v50 = vmul.f32 %v3614_v1, %v3182_v10 }
  0x42   : > { %v924_v22 = vadd.f32 %v892_v8, %v826_v7  ;;  %v502_v52 = vmul.f32 %v3619_v2, %v3215_v26  ;;  %v828_v53 = vadd.f32 %v796_v41, %v730_v40  ;;  %v894_v43 = vmul.f32 %v3652_v14, %v3248_v37  ;;  %v3217_v7 = vld [vmem:[%s3629_s13 + $0x99] sm:$0xff] }
  0x43   : > { %v1025_v54 = vadd.f32 %v993_v44, %v925_v42  ;;  %v1091_v55 = vmul.f32 %v3675_v31, %v3216_v48  ;;  %v797_v57 = vmul.f32 %v3646_v12, %v3216_v48  ;;  %v600_v61 = vmul.f32 %v3624_v3, %v3248_v37  ;;  %v3861_v44 = vld [vmem:[%s3629_s13 + $0xf0] sm:$0xff] }
  0x44   : > { %v1024_v35 = vadd.f32 %v992_v23, %v924_v22  ;;  %v534_v60 = vadd.f32 %v502_v52, %v436_v50  ;;  %v926_v62 = vadd.f32 %v894_v43, %v828_v53  ;;  %v994_v63 = vmul.f32 %v3657_v15, %v3808_v51  ;;  %v3877_v53 = vld [vmem:[%s3629_s13 + $0xb0] sm:$0xff] }
  0x45   : > { %v503_v6 = vmul.f32 %v3619_v2, %v3216_v48  ;;  %v1123_v8 = vadd.f32 %v1091_v55, %v1025_v54  ;;  %v1189_v9 = vmul.f32 %v3685_v38, %v3249_v59  ;;  %v895_v11 = vmul.f32 %v3652_v14, %v3249_v59  ;;  %v3868_v48 = vld [vmem:[%s3629_s13 + $0xf1] sm:$0xff] }
  0x46   : > { %3278 = vmatmul.msk.f32.gmra.mxu1 %vm321_vm1, %v1216_v18  ;;  %v435_v18 = vmul.f32 %v3614_v1, %v3181_v49  ;;  %v1122_v0 = vadd.f32 %v1090_v36, %v1024_v35  ;;  %v3064_v49 = vld [vmem:[%s3629_s13 + $0x109] ss:$2 sm:$0xff]  ;;  %v632_v16 = vadd.f32 %v600_v61, %v534_v60  ;;  %v700_v17 = vmul.f32 %v3634_v4, %v3808_v51  ;;  %v3888_v60 = vld [vmem:[%s3629_s13 + $0xe0] sm:$0xff] }
  0x47   : > { %3073 = vmatmul.msk.f32.gmra.mxu3 %vm321_vm1, %v3064_v49  ;;  %v1092_v20 = vmul.f32 %v3675_v31, %v3217_v7  ;;  %v601_v23 = vmul.f32 %v3624_v3, %v3249_v59  ;;  %v443_v26 = vmul.f32 %v3614_v1, %v3835_v24  ;;  %v1221_v27 = vadd.f32 %v1189_v9, %v1123_v8  ;;  %v3872_v49 = vld [vmem:[%s3629_s13 + $0xaa] sm:$0xff]  ;;  %v3885_v59 = vld [vmem:[%s3629_s13 + $0xf2] sm:$0xff]  ;;  %v3891_v61 = vld [vmem:[%s3629_s13 + $0xe1] sm:$0xff] }
  0x48   : > { %v533_v32 = vadd.f32 %v501_v19, %v435_v18  ;;  %v1220_v58 = vadd.f32 %v1188_v47, %v1122_v0  ;;  %v3065_v18 = vld [vmem:[%s3629_s13 + $0x139] ss:$2 sm:$0xff]  ;;  %v1026_v19 = vadd.f32 %v994_v63, %v926_v62  ;;  %v995_v29 = vmul.f32 %v3657_v15, %v3824_v13  ;;  %v3066_v43 = vld [vmem:[%s3629_s13 + $0x169] ss:$2 sm:$0xff] }
  0x49   : > { %v509_v30 = vmul.f32 %v3619_v2, %v3838_v25  ;;  %v732_v35 = vadd.f32 %v700_v17, %v632_v16  ;;  %v798_v36 = vmul.f32 %v3646_v12, %v3217_v7  ;;  %v701_v41 = vmul.f32 %v3634_v4, %v3824_v13  ;;  %v3909_v16 = vld [vmem:[%s3629_s13 + $0xe2] sm:$0xff] }
  0x4a   : > { %v1124_v37 = vadd.f32 %v1092_v20, %v1026_v19  ;;  %v896_v52 = vmul.f32 %v3652_v14, %v3831_v21  ;;  %v805_v54 = vmul.f32 %v3646_v12, %v3868_v48  ;;  %v438_v62 = vmul.f32 %v3614_v1, %v3808_v51  ;;  %v3918_v20 = vld [vmem:[%s3629_s13 + $0xb1] sm:$0xff] }
  0x4b   : > { %v541_v42 = vadd.f32 %v509_v30, %v443_v26  ;;  %v830_v50 = vadd.f32 %v798_v36, %v732_v35  ;;  %v504_v63 = vmul.f32 %v3619_v2, %v3217_v7  ;;  %v1191_v9 = vmul.f32 %v3685_v38, %v3872_v49 }
  0x4c   : > { %v510_v51 = vmul.f32 %v3619_v2, %v3891_v61  ;;  %v996_v17 = vmul.f32 %v3657_v15, %v3877_v53  ;;  %v608_v19 = vmul.f32 %v3624_v3, %v3909_v16 }
  0x4d   : > { %v928_v7 = vadd.f32 %v896_v52, %v830_v50  ;;  %v536_v30 = vadd.f32 %v504_v63, %v438_v62  ;;  %v3959_v62 = vld [vmem:[%s3629_s13 + $0xc1] sm:$0xff]  ;;  %v702_v63 = vmul.f32 %v3634_v4, %v3877_v53 }
  0x4e   : > { %3279 = vmatmul.msk.f32.gmra.mxu1 %vm321_vm1, %v1217_v45  ;;  %v631_v45 = vadd.f32 %v599_v33, %v533_v32  ;;  %v3848_v32 = vld [vmem:[%s3629_s13 + $0xda] sm:$0xff]  ;;  %v1190_v33 = vmul.f32 %v3685_v38, %v3831_v21 }
  0x4f   : > { %3074 = vmatmul.msk.f32.gmra.mxu3 %vm321_vm1, %v3065_v18 }
  0x50   : > { %v731_v56 = vadd.f32 %v699_v46, %v631_v45  ;;  %v707_v45 = vmul.f32 %v3634_v4, %v3861_v44  ;;  %v1222_v55 = vadd.f32 %v1190_v33, %v1124_v37  ;;  %v602_v33 = vmul.f32 %v3624_v3, %v3831_v21 }
  0x52   : > { %v829_v10 = vadd.f32 %v797_v57, %v731_v56 }
  0x54   : > { %v927_v28 = vadd.f32 %v895_v11, %v829_v10  ;;  %v3904_v11 = vld [vmem:[%s3629_s13 + $0x108] sm:$0xff] }
  0x55   : > { %v1003_v18 = vmul.f32 %v3657_v15, %v3904_v11 }
  0x56   : > { %3280 = vmatmul.msk.f32.gmra.mxu1 %vm321_vm1, %v1218_v5  ;;  %v437_v5 = vmul.f32 %v3614_v1, %v3183_v39  ;;  %v607_v39 = vmul.f32 %v3624_v3, %v3848_v32  ;;  %v1027_v46 = vadd.f32 %v995_v29, %v927_v28  ;;  %v3926_v29 = vld [vmem:[%s3629_s13 + $0xf8] sm:$0xff] }
  0x57   : > { %3075 = vmatmul.msk.f32.gmra.mxu3 %vm321_vm1, %v3066_v43  ;;  %v708_v36 = vmul.f32 %v3634_v4, %v3926_v29  ;;  %v3951_v43 = vld [vmem:[%s3629_s13 + $0xfa] sm:$0xff] }
  0x58   : > { %v535_v22 = vadd.f32 %v503_v6, %v437_v5  ;;  %v639_v47 = vadd.f32 %v607_v39, %v541_v42  ;;  %v903_v5 = vmul.f32 %v3652_v14, %v3885_v59  ;;  %v444_v6 = vmul.f32 %v3614_v1, %v3888_v60  ;;  %v3935_v39 = vld [vmem:[%s3629_s13 + $0xc0] sm:$0xff] }
  0x59   : > { %v3941_v42 = vld [vmem:[%s3629_s13 + $0xf9] sm:$0xff] }
  0x5a   : > { %v633_v40 = vadd.f32 %v601_v23, %v535_v22  ;;  %v897_v23 = vmul.f32 %v3652_v14, %v3872_v49  ;;  %v542_v28 = vadd.f32 %v510_v51, %v444_v6  ;;  %v806_v52 = vmul.f32 %v3646_v12, %v3941_v42 }
  0x5c   : > { %v733_v56 = vadd.f32 %v701_v41, %v633_v40  ;;  %v3938_v40 = vld [vmem:[%s3629_s13 + $0x10a] sm:$0xff]  ;;  %v640_v41 = vadd.f32 %v608_v19, %v542_v28 }
  0x5e   : > { %3281 = vmatmul.msk.f32.gmra.mxu1 %vm321_vm1, %v1219_v34  ;;  %v3853_v34 = vld [vmem:[%s3629_s13 + $0xa9] sm:$0xff]  ;;  %v740_v50 = vadd.f32 %v708_v36, %v640_v41  ;;  %v709_v41 = vmul.f32 %v3634_v4, %v3904_v11 }
  0x5f   : > { %v1093_v0 = vmul.f32 %v3675_v31, %v3853_v34  ;;  %v799_v57 = vmul.f32 %v3646_v12, %v3853_v34  ;;  %v505_v51 = vmul.f32 %v3619_v2, %v3853_v34  ;;  %v1095_v34 = vmul.f32 %v3675_v31, %v3959_v62 }
  0x60   : > { %v838_v6 = vadd.f32 %v806_v52, %v740_v50 }
  0x61   : > { %v1125_v8 = vadd.f32 %v1093_v0, %v1027_v46  ;;  %v831_v22 = vadd.f32 %v799_v57, %v733_v56  ;;  %v1199_v46 = vmul.f32 %v3685_v38, %v3938_v40  ;;  %v1028_v0 = vadd.f32 %v996_v17, %v928_v7 }
  0x62   : > { %v634_v57 = vadd.f32 %v602_v33, %v536_v30  ;;  %v511_v17 = vmul.f32 %v3619_v2, %v3868_v48  ;;  %v3988_v33 = vld [vmem:[%s3629_s13 + $0xc2] sm:$0xff] }
  0x63   : > { %v1223_v21 = vadd.f32 %v1191_v9, %v1125_v8  ;;  %v929_v56 = vadd.f32 %v897_v23, %v831_v22  ;;  %v3964_v8 = vld [vmem:[%s3629_s13 + $0x110] sm:$0xff]  ;;  %v445_v9 = vmul.f32 %v3614_v1, %v3861_v44 }
  0x64   : > { %v1004_v7 = vmul.f32 %v3657_v15, %v3964_v8  ;;  %v3979_v23 = vld [vmem:[%s3629_s13 + $0x111] sm:$0xff] }
  0x65   : > { %v1102_v28 = vmul.f32 %v3675_v31, %v3979_v23  ;;  %v543_v30 = vadd.f32 %v511_v17, %v445_v9  ;;  %v4013_v9 = vld [vmem:[%s3629_s13 + $0x120] sm:$0xff] }
  0x66   : > { %3282 = vmatmul.msk.f32.gmra.mxu1 %vm321_vm1, %v1220_v58  ;;  %v739_v58 = vadd.f32 %v707_v45, %v639_v47  ;;  %v1094_v45 = vmul.f32 %v3675_v31, %v3918_v20 }
  0x68   : > { %v837_v10 = vadd.f32 %v805_v54, %v739_v58  ;;  %v3252_v54 = vld [vmem:[%s3629_s13 + $0xb2] sm:$0xff]  ;;  %v904_v58 = vmul.f32 %v3652_v14, %v3951_v43 }
  0x69   : > { %v1192_v19 = vmul.f32 %v3685_v38, %v3252_v54 }
  0x6a   : > { %v935_v26 = vadd.f32 %v903_v5, %v837_v10  ;;  %v439_v10 = vmul.f32 %v3614_v1, %v3824_v13  ;;  %v936_v22 = vadd.f32 %v904_v58, %v838_v6  ;;  %v609_v13 = vmul.f32 %v3624_v3, %v3885_v59 }
  0x6b   : > { %v440_v58 = vmul.f32 %v3614_v1, %v3877_v53  ;;  %v905_v6 = vmul.f32 %v3652_v14, %v3938_v40  ;;  %v703_v53 = vmul.f32 %v3634_v4, %v3935_v39 }
  0x6c   : > { %v1035_v37 = vadd.f32 %v1003_v18, %v935_v26  ;;  %v1126_v18 = vadd.f32 %v1094_v45, %v1028_v0  ;;  %v1036_v36 = vadd.f32 %v1004_v7, %v936_v22  ;;  %v800_v45 = vmul.f32 %v3646_v12, %v3918_v20  ;;  %v4027_v22 = vld [vmem:[%s3629_s13 + $0x121] sm:$0xff] }
  0x6d   : > { %v603_v0 = vmul.f32 %v3624_v3, %v3872_v49  ;;  %v506_v49 = vmul.f32 %v3619_v2, %v3918_v20  ;;  %v898_v7 = vmul.f32 %v3652_v14, %v3252_v54 }
  0x6e   : > { %3283 = vmatmul.msk.f32.gmra.mxu1 %vm321_vm1, %v1221_v27  ;;  %v3923_v27 = vld [vmem:[%s3629_s13 + $0x109] sm:$0xff]  ;;  %v1224_v50 = vadd.f32 %v1192_v19, %v1126_v18  ;;  %v1134_v52 = vadd.f32 %v1102_v28, %v1036_v36  ;;  %v1005_v19 = vmul.f32 %v3657_v15, %v4013_v9  ;;  %v1103_v36 = vmul.f32 %v3675_v31, %v4027_v22 }
  0x6f   : > { %v1101_v35 = vmul.f32 %v3675_v31, %v3923_v27  ;;  %v4021_v18 = vld [vmem:[%s3629_s13 + $0xc8] sm:$0xff]  ;;  %v538_v28 = vadd.f32 %v506_v49, %v440_v58  ;;  %v808_v58 = vmul.f32 %v3646_v12, %v3979_v23 }
  0x70   : > { %v704_v49 = vmul.f32 %v3634_v4, %v4021_v18 }
  0x71   : > { %v1133_v47 = vadd.f32 %v1101_v35, %v1035_v37  ;;  %v734_v35 = vadd.f32 %v702_v63, %v634_v57  ;;  %v3991_v37 = vld [vmem:[%s3629_s13 + $0x112] sm:$0xff] }
  0x73   : > { %v1231_v5 = vadd.f32 %v1199_v46, %v1133_v47  ;;  %v537_v46 = vadd.f32 %v505_v51, %v439_v10  ;;  %v1200_v47 = vmul.f32 %v3685_v38, %v3991_v37  ;;  %v446_v10 = vmul.f32 %v3614_v1, %v3926_v29 }
  0x74   : > { %v832_v51 = vadd.f32 %v800_v45, %v734_v35 }
  0x75   : > { %3293 = vmatmul.msk.f32.vlgmr.msrb.gmra.mxu3 %vm321_vm1, %v1231_v5  ;;  %v1232_v63 = vadd.f32 %v1200_v47, %v1134_v52  ;;  %v635_v17 = vadd.f32 %v603_v0, %v537_v46  ;;  %v710_v46 = vmul.f32 %v3634_v4, %v3964_v8  ;;  %v998_v47 = vmul.f32 %v3657_v15, %v4021_v18  ;;  %v3221_v52 = vld [vmem:[%s3629_s13 + $0xc9] sm:$0xff] }
  0x76   : > { %3284 = vmatmul.msk.f32.gmra.mxu1 %vm321_vm1, %v1222_v55  ;;  %v997_v55 = vmul.f32 %v3657_v15, %v3935_v39  ;;  %v930_v0 = vadd.f32 %v898_v7, %v832_v51  ;;  %v906_v7 = vmul.f32 %v3652_v14, %v3991_v37 }
  0x78   : > { %v1029_v26 = vadd.f32 %v997_v55, %v929_v56  ;;  %v641_v56 = vadd.f32 %v609_v13, %v543_v30  ;;  %v807_v55 = vmul.f32 %v3646_v12, %v3923_v27  ;;  %v512_v13 = vmul.f32 %v3619_v2, %v3941_v42 }
  0x79   : > { %v604_v30 = vmul.f32 %v3624_v3, %v3252_v54  ;;  %v801_v54 = vmul.f32 %v3646_v12, %v3959_v62 }
  0x7a   : > { %v1127_v57 = vadd.f32 %v1095_v34, %v1029_v26  ;;  %v741_v5 = vadd.f32 %v709_v41, %v641_v56  ;;  %v610_v26 = vmul.f32 %v3624_v3, %v3951_v43  ;;  %v4037_v41 = vld [vmem:[%s3629_s13 + $0x122] sm:$0xff]  ;;  %v544_v45 = vadd.f32 %v512_v13, %v446_v10 }
  0x7b   : > { %v735_v56 = vadd.f32 %v703_v53, %v635_v17  ;;  %v4061_v17 = vld [vmem:[%s3629_s13 + $0x128] sm:$0xff]  ;;  %v1030_v53 = vadd.f32 %v998_v47, %v930_v0  ;;  %v899_v13 = vmul.f32 %v3652_v14, %v3988_v33 }
  0x7c   : > { %v839_v20 = vadd.f32 %v807_v55, %v741_v5  ;;  %v507_v5 = vmul.f32 %v3619_v2, %v3959_v62 }
  0x7d   : > { %3294 = vmatmul.msk.f32.gmra.mxu3 %vm321_vm1, %v1232_v63  ;;  %v441_v63 = vmul.f32 %v3614_v1, %v3935_v39  ;;  %v1006_v39 = vmul.f32 %v3657_v15, %v4061_v17 }
  0x7e   : > { %3285 = vmatmul.msk.f32.gmra.mxu1 %vm321_vm1, %v1223_v21  ;;  %v1193_v21 = vmul.f32 %v3685_v38, %v3988_v33  ;;  %v937_v35 = vadd.f32 %v905_v6, %v839_v20  ;;  %v1096_v6 = vmul.f32 %v3675_v31, %v3221_v52  ;;  %v3254_v20 = vld [vmem:[%s3629_s13 + $0xca] sm:$0xff] }
  0x7f   : > { %v1194_v0 = vmul.f32 %v3685_v38, %v3254_v20 }
  0x80   : > { %v1225_v34 = vadd.f32 %v1193_v21, %v1127_v57  ;;  %v1037_v55 = vadd.f32 %v1005_v19, %v937_v35  ;;  %v1201_v57 = vmul.f32 %v3685_v38, %v4037_v41  ;;  %v642_v21 = vadd.f32 %v610_v26, %v544_v45 }
  0x81   : > { %v833_v19 = vadd.f32 %v801_v54, %v735_v56  ;;  %v802_v35 = vmul.f32 %v3646_v12, %v3221_v52  ;;  %v539_v45 = vadd.f32 %v507_v5, %v441_v63  ;;  %v4083_v54 = vld [vmem:[%s3629_s13 + $0x12a] sm:$0xff]  ;;  %v900_v63 = vmul.f32 %v3652_v14, %v3254_v20 }
  0x82   : > { %v1135_v10 = vadd.f32 %v1103_v36, %v1037_v55  ;;  %v742_v51 = vadd.f32 %v710_v46, %v642_v21  ;;  %v3505_v36 = vmov 0.0   ;;  %v605_v46 = vmul.f32 %v3624_v3, %v3988_v33 }
  0x83   : > { %1530 = vst.msk [vmem:[#allocation2 + $0x18] sm:$0xff] %vm1526_vm2, %v3505_v36  ;;  %v1128_v55 = vadd.f32 %v1096_v6, %v1030_v53  ;;  %v999_v33 = vmul.f32 %v3657_v15, %v3835_v24  ;;  %v705_v6 = vmul.f32 %v3634_v4, %v3835_v24 }
  0x84   : > { %v1233_v62 = vadd.f32 %v1201_v57, %v1135_v10  ;;  %v840_v26 = vadd.f32 %v808_v58, %v742_v51  ;;  %1531 = vst.msk [vmem:[#allocation2 + $0x20] sm:$0xff] %vm1526_vm2, %v3505_v36  ;;  %v931_v57 = vadd.f32 %v899_v13, %v833_v19  ;;  %v1202_v58 = vmul.f32 %v3685_v38, %v4083_v54 }
  0x85   : > { %1527 = vst.msk [vmem:[#allocation2] sm:$0xff] %vm1526_vm2, %v3505_v36  ;;  %v637_v5 = vadd.f32 %v605_v46, %v539_v45  ;;  %v1000_v19 = vmul.f32 %v3657_v15, %v3888_v60  ;;  %v447_v13 = vmul.f32 %v3614_v1, %v3904_v11  ;;  %v611_v11 = vmul.f32 %v3624_v3, %v3938_v40 }
  0x86   : > { %3286 = vmatmul.msk.f32.gmra.mxu1 %vm321_vm1, %v1224_v50  ;;  %v636_v50 = vadd.f32 %v604_v30, %v538_v28  ;;  %v4069_v28 = vld [vmem:[%s3629_s13 + $0x129] sm:$0xff]  ;;  %3295 = vmatmul.msk.f32.gmra.mxu3 %vm321_vm1, %v1233_v62  ;;  %v938_v47 = vadd.f32 %v906_v7, %v840_v26  ;;  %1528 = vst.msk [vmem:[#allocation2 + $0x8] sm:$0xff] %vm1526_vm2, %v3505_v36 }
  0x87   : > { %v1104_v56 = vmul.f32 %v3675_v31, %v4069_v28  ;;  %1529 = vst.msk [vmem:[#allocation2 + $0x10] sm:$0xff] %vm1526_vm2, %v3505_v36  ;;  %v606_v7 = vmul.f32 %v3624_v3, %v3254_v20  ;;  %v1031_v53 = vadd.f32 %v999_v33, %v931_v57  ;;  %v737_v20 = vadd.f32 %v705_v6, %v637_v5  ;;  %v4196_v6 = vld [vmem:[%s5430_s1 + $0x6] ss:$0 sm:$0xff] }
  0x88   : > { %v736_v30 = vadd.f32 %v704_v49, %v636_v50  ;;  %v1038_v21 = vadd.f32 %v1006_v39, %v938_v47  ;;  %v442_v50 = vmul.f32 %v3614_v1, %v4021_v18  ;;  %1532 = vst.msk [vmem:[#allocation2 + $0x28] sm:$0xff] %vm1526_vm2, %v3505_v36  ;;  %v1226_v18 = vadd.f32 %v1194_v0, %v1128_v55 }
  0x89   : > { %1533 = vst.msk [vmem:[#allocation2 + $0x30] sm:$0xff] %vm1526_vm2, %v3505_v36  ;;  %v803_v62 = vmul.f32 %v3646_v12, %v3838_v25  ;;  %v513_v26 = vmul.f32 %v3619_v2, %v3923_v27  ;;  %v706_v1 = vmul.f32 %v3634_v4, %v3888_v60  ;;  %v711_v27 = vmul.f32 %v3634_v4, %v4013_v9 }
  0x8a   : > { %v834_v49 = vadd.f32 %v802_v35, %v736_v30  ;;  %v1136_v10 = vadd.f32 %v1104_v56, %v1038_v21  ;;  %1534 = vst.msk [vmem:[#allocation2 + $0x38] sm:$0xff] %vm1526_vm2, %v3505_v36  ;;  %v1098_v3 = vmul.f32 %v3675_v31, %v3891_v61  ;;  %v901_v40 = vmul.f32 %v3652_v14, %v3848_v32 }
  0x8b   : > { %1535 = vst.msk [vmem:[#allocation2 + $0x40] sm:$0xff] %vm1526_vm2, %v3505_v36  ;;  %v835_v46 = vadd.f32 %v803_v62, %v737_v20  ;;  %v804_v4 = vmul.f32 %v3646_v12, %v3891_v61  ;;  %v809_v47 = vmul.f32 %v3646_v12, %v4027_v22  ;;  %v907_v57 = vmul.f32 %v3652_v14, %v4037_v41  ;;  %v4160_v61 = vld [vmem:[%s5430_s1] ss:$0 sm:$0xff]  ;;  %v4174_v14 = vld [vmem:[%s5430_s1 + $0x1] ss:$0 sm:$0xff] }
  0x8c   : > { %v1234_v24 = vadd.f32 %v1202_v58, %v1136_v10  ;;  %v932_v39 = vadd.f32 %v900_v63, %v834_v49  ;;  %1536 = vst.msk [vmem:[#allocation2 + $0x48] sm:$0xff] %vm1526_vm2, %v3505_v36  ;;  %v448_v12 = vmul.f32 %v4160_v61, %v3964_v8  ;;  %v1001_v21 = vmul.f32 %v3657_v15, %v3861_v44  ;;  %v4185_v63 = vld [vmem:[%s5430_s1 + $0x2] ss:$0 sm:$0xff]  ;;  %v4229_v20 = vld [vmem:[%s5430_s1 + $0x5] ss:$0 sm:$0xff] }
  0x8d   : > { %1537 = vst.msk [vmem:[#allocation2 + $0x50] sm:$0xff] %vm1526_vm2, %v3505_v36  ;;  %v514_v8 = vmul.f32 %v4174_v14, %v3979_v23  ;;  %v612_v5 = vmul.f32 %v4185_v63, %v3991_v37  ;;  %v3059_v23 = vld [vmem:[%s3629_s13 + $0x19] ss:$2 sm:$0xff]  ;;  %v810_v62 = vmul.f32 %v4229_v20, %v4069_v28 }
  0x8e   : > { %3287 = vmatmul.msk.f32.gmra.mxu1 %vm321_vm1, %v1225_v34  ;;  %v508_v34 = vmul.f32 %v3619_v2, %v3221_v52  ;;  %v1097_v52 = vmul.f32 %v3675_v31, %v3838_v25  ;;  %3296 = vmatmul.msk.f32.gmra.mxu3 %vm321_vm1, %v1234_v24  ;;  %v1195_v25 = vmul.f32 %v3685_v38, %v3848_v32 }
  0x8f   : > { %v545_v2 = vadd.f32 %v513_v26, %v447_v13  ;;  %1538 = vst.msk [vmem:[#allocation2 + $0x58] sm:$0xff] %vm1526_vm2, %v3505_v36  ;;  %v1032_v60 = vadd.f32 %v1000_v19, %v932_v39  ;;  %v1196_v32 = vmul.f32 %v3685_v38, %v3909_v16  ;;  %3068 = vmatmul.msk.f32.vlgmr.msra.gmra.mxu0 %vm321_vm1, %v3059_v23 }
  0x90   : > { %v540_v51 = vadd.f32 %v508_v34, %v442_v50  ;;  %v1129_v35 = vadd.f32 %v1097_v52, %v1031_v53  ;;  %1539 = vst.msk [vmem:[#allocation2 + $0x60] sm:$0xff] %vm1526_vm2, %v3505_v36  ;;  %v4169_v50 = vld [vmem:[%s3629_s13 + $0x138] sm:$0xff]  ;;  %v933_v34 = vadd.f32 %v901_v40, %v835_v46  ;;  %v1099_v13 = vmul.f32 %v3675_v31, %v3868_v48  ;;  %v4257_v40 = vld [vmem:[%s3629_s13 + $0x141] sm:$0xff] }
  0x91   : > { %v643_v45 = vadd.f32 %v611_v11, %v545_v2  ;;  %1540 = vst.msk [vmem:[#allocation2 + $0x68] sm:$0xff] %vm1526_vm2, %v3505_v36  ;;  %v1130_v33 = vadd.f32 %v1098_v3, %v1032_v60  ;;  %v1007_v44 = vmul.f32 %v3657_v15, %v4169_v50  ;;  %v902_v15 = vmul.f32 %v4196_v6, %v3909_v16  ;;  %v4218_v52 = vld [vmem:[%s3629_s13 + $0x13a] sm:$0xff] }
  0x92   : > { %v638_v30 = vadd.f32 %v606_v7, %v540_v51  ;;  %v1227_v56 = vadd.f32 %v1195_v25, %v1129_v35  ;;  %1541 = vst.msk [vmem:[#allocation2 + $0x70] sm:$0xff] %vm1526_vm2, %v3505_v36  ;;  %v4201_v51 = vld [vmem:[%s3629_s13 + $0x139] sm:$0xff]  ;;  %v546_v7 = vadd.f32 %v514_v8, %v448_v12  ;;  %v1203_v39 = vmul.f32 %v3685_v38, %v4218_v52  ;;  %v4240_v38 = vld [vmem:[%s5430_s1 + $0x8] ss:$0 sm:$0xff]  ;;  %v4305_v8 = vld [vmem:[%s3629_s13 + $0x150] sm:$0xff] }
  0x93   : > { %v743_v55 = vadd.f32 %v711_v27, %v643_v45  ;;  %1542 = vst.msk [vmem:[#allocation2 + $0x78] sm:$0xff] %vm1526_vm2, %v3505_v36  ;;  %v1105_v37 = vmul.f32 %v3675_v31, %v4201_v51  ;;  %v1228_v24 = vadd.f32 %v1196_v32, %v1130_v33  ;;  %v1033_v26 = vadd.f32 %v1001_v21, %v933_v34  ;;  %v3060_v27 = vld [vmem:[%s3629_s13 + $0x49] ss:$2 sm:$0xff]  ;;  %v4254_v3 = vld [vmem:[%s3629_s13 + $0x140] sm:$0xff] }
  0x94   : > { %v738_v0 = vadd.f32 %v706_v1, %v638_v30  ;;  %1543 = vst.msk [vmem:[#allocation2 + $0x80] sm:$0xff] %vm1526_vm2, %v3505_v36  ;;  %v644_v19 = vadd.f32 %v612_v5, %v546_v7  ;;  %v1002_v1 = vmul.f32 %v4240_v38, %v3926_v29  ;;  %v908_v11 = vmul.f32 %v4196_v6, %v4083_v54  ;;  %v4264_v29 = vld [vmem:[%s5430_s1 + $0xa] ss:$0 sm:$0xff]  ;;  %v4271_v45 = vld [vmem:[%s3629_s13 + $0x142] sm:$0xff]  ;;  %v4314_v5 = vld [vmem:[%s3629_s13 + $0x151] sm:$0xff] }
  0x95   : > { %v841_v58 = vadd.f32 %v809_v47, %v743_v55  ;;  %1544 = vst.msk [vmem:[#allocation2 + $0x88] sm:$0xff] %vm1526_vm2, %v3505_v36  ;;  %v449_v35 = vmul.f32 %v4160_v61, %v4013_v9  ;;  %v515_v25 = vmul.f32 %v4174_v14, %v4027_v22  ;;  %v1197_v9 = vmul.f32 %v4264_v29, %v3885_v59  ;;  %v4282_v59 = vld [vmem:[%s5430_s1 + $0x9] ss:$0 sm:$0xff]  ;;  %v4321_v7 = vld [vmem:[%s3629_s13 + $0x152] sm:$0xff] }
  0x96   : > { %3288 = vmatmul.msk.f32.gmra.mxu1 %vm321_vm1, %v1226_v18  ;;  %v836_v49 = vadd.f32 %v804_v4, %v738_v0  ;;  %1545 = vst.msk [vmem:[#allocation2 + $0x90] sm:$0xff] %vm1526_vm2, %v3505_v36  ;;  %v4211_v18 = vld [vmem:[%s5430_s1 + $0x4] ss:$0 sm:$0xff]  ;;  %v1008_v22 = vmul.f32 %v4240_v38, %v4254_v3  ;;  %v613_v0 = vmul.f32 %v4185_v63, %v4037_v41 }
  0x97   : > { %v939_v10 = vadd.f32 %v907_v57, %v841_v58  ;;  %1546 = vst.msk [vmem:[#allocation2 + $0x98] sm:$0xff] %vm1526_vm2, %v3505_v36  ;;  %v712_v16 = vmul.f32 %v4211_v18, %v4061_v17  ;;  %v547_v46 = vadd.f32 %v515_v25, %v449_v35  ;;  %v1131_v4 = vadd.f32 %v1099_v13, %v1033_v26  ;;  %v4294_v57 = vld [vmem:[%s5432_s3] ss:$0 sm:$0xff]  ;;  %v3061_v13 = vld [vmem:[%s3629_s13 + $0x79] ss:$2 sm:$0xff] }
  0x98   : > { %1547 = vst.msk [vmem:[#allocation2 + $0xa0] sm:$0xff] %vm1526_vm2, %v3505_v36  ;;  %v934_v30 = vadd.f32 %v902_v15, %v836_v49  ;;  %3069 = vmatmul.msk.f32.gmra.mxu0 %vm321_vm1, %v3060_v27  ;;  %v713_v32 = vmul.f32 %v4211_v18, %v4169_v50  ;;  %v1100_v12 = vmul.f32 %v4282_v59, %v3941_v42 }
  0x99   : > { %v1039_v53 = vadd.f32 %v1007_v44, %v939_v10  ;;  %1548 = vst.msk [vmem:[#allocation2 + $0xa8] sm:$0xff] %vm1526_vm2, %v3505_v36  ;;  %v744_v48 = vadd.f32 %v712_v16, %v644_v19  ;;  %v645_v55 = vadd.f32 %v613_v0, %v547_v46  ;;  %v1204_v21 = vmul.f32 %v4264_v29, %v4271_v45 }
  0x9a   : > { %1549 = vst.msk [vmem:[#allocation2 + $0xb0] sm:$0xff] %vm1526_vm2, %v3505_v36  ;;  %v1034_v41 = vadd.f32 %v1002_v1, %v934_v30  ;;  %v811_v58 = vmul.f32 %v4229_v20, %v4201_v51  ;;  %v909_v49 = vmul.f32 %v4196_v6, %v4218_v52  ;;  %v1229_v42 = vadd.f32 %v1197_v9, %v1131_v4  ;;  %v4365_v9 = vld [vmem:[%s3629_s13 + $0x159] sm:$0xff] }
  0x9b   : > { %v1137_v31 = vadd.f32 %v1105_v37, %v1039_v53  ;;  %1550 = vst.msk [vmem:[#allocation2 + $0xb8] sm:$0xff] %vm1526_vm2, %v3505_v36  ;;  %v842_v60 = vadd.f32 %v810_v62, %v744_v48  ;;  %v745_v34 = vadd.f32 %v713_v32, %v645_v55  ;;  %v1009_v10 = vmul.f32 %v4240_v38, %v4305_v8  ;;  %v4370_v4 = vld [vmem:[%s3629_s13 + $0x15a] sm:$0xff]  ;;  %v3062_v55 = vld [vmem:[%s3629_s13 + $0xa9] ss:$2 sm:$0xff] }
  0x9c   : > { %1551 = vst.msk [vmem:[#allocation2 + $0xc0] sm:$0xff] %vm1526_vm2, %v3505_v36  ;;  %v450_v37 = vmul.f32 %v4160_v61, %v4061_v17  ;;  %v516_v16 = vmul.f32 %v4174_v14, %v4069_v28  ;;  %v1132_v19 = vadd.f32 %v1100_v12, %v1034_v41  ;;  %v1107_v62 = vmul.f32 %v4282_v59, %v4314_v5  ;;  %v4387_v32 = vld [vmem:[%s5433_s4 + $0x1] ss:$0 sm:$0xff] }
  0x9d   : > { %v1235_v2 = vadd.f32 %v1203_v39, %v1137_v31  ;;  %1552 = vst.msk [vmem:[#allocation2 + $0xc8] sm:$0xff] %vm1526_vm2, %v3505_v36  ;;  %v940_v47 = vadd.f32 %v908_v11, %v842_v60  ;;  %v843_v15 = vadd.f32 %v811_v58, %v745_v34  ;;  %v614_v28 = vmul.f32 %v4185_v63, %v4083_v54  ;;  %v4354_v11 = vld [vmem:[%s3629_s13 + $0x158] sm:$0xff] }
  0x9e   : > { %3289 = vmatmul.msk.f32.gmra.mxu1 %vm321_vm1, %v1227_v56  ;;  %1553 = vst.msk [vmem:[#allocation2 + $0xd0] sm:$0xff] %vm1526_vm2, %v3505_v36  ;;  %v1106_v56 = vmul.f32 %v4282_v59, %v4257_v40  ;;  %v548_v17 = vadd.f32 %v516_v16, %v450_v37  ;;  %v1198_v30 = vmul.f32 %v4264_v29, %v3951_v43  ;;  %v4416_v37 = vld [vmem:[%s3629_s13 + $0x168] sm:$0xff] }
  0x9f   : > { %3297 = vmatmul.msk.f32.gmra.mxu3 %vm321_vm1, %v1235_v2  ;;  %1554 = vst.msk [vmem:[#allocation2 + $0xd8] sm:$0xff] %vm1526_vm2, %v3505_v36  ;;  %v1040_v33 = vadd.f32 %v1008_v22, %v940_v47  ;;  %v941_v39 = vadd.f32 %v909_v49, %v843_v15  ;;  %v1205_v31 = vmul.f32 %v4264_v29, %v4321_v7  ;;  %v4375_v47 = vld [vmem:[%s5433_s4] ss:$0 sm:$0xff] }
  0xa0   : > { %1555 = vst.msk [vmem:[#allocation2 + $0xe0] sm:$0xff] %vm1526_vm2, %v3505_v36  ;;  %3070 = vmatmul.msk.f32.gmra.mxu0 %vm321_vm1, %v3061_v13  ;;  %v646_v48 = vadd.f32 %v614_v28, %v548_v17  ;;  %v714_v1 = vmul.f32 %v4211_v18, %v4254_v3  ;;  %v812_v43 = vmul.f32 %v4229_v20, %v4257_v40  ;;  %v1778_v13 = vld [vmem:[#allocation2 + $0x2] sm:$0xff] }
  0xa1   : > { %1556 = vst.msk [vmem:[#allocation2 + $0xe8] sm:$0xff] %vm1526_vm2, %v3505_v36  ;;  %v1138_v44 = vadd.f32 %v1106_v56, %v1040_v33  ;;  %v1041_v54 = vadd.f32 %v1009_v10, %v941_v39  ;;  %v910_v2 = vmul.f32 %v4196_v6, %v4271_v45  ;;  %v1230_v27 = vadd.f32 %v1198_v30, %v1132_v19  ;;  %v4430_v39 = vld [vmem:[%s3629_s13 + $0x169] sm:$0xff] }
  0xa2   : > { %1557 = vst.msk [vmem:[#allocation2 + $0xf0] sm:$0xff] %vm1526_vm2, %v3505_v36  ;;  %v746_v25 = vadd.f32 %v714_v1, %v646_v48  ;;  %v1010_v60 = vmul.f32 %v4240_v38, %v4354_v11  ;;  %v451_v56 = vmul.f32 %v4160_v61, %v4169_v50  ;;  %v517_v41 = vmul.f32 %v4174_v14, %v4201_v51  ;;  %v1614_v50 = vld [vmem:[#allocation2] sm:$0xff]  ;;  %v4441_v48 = vld [vmem:[%s3629_s13 + $0x16a] sm:$0xff] }
  0xa3   : > { %1558 = vst.msk [vmem:[#allocation2 + $0xf8] sm:$0xff] %vm1526_vm2, %v3505_v36  ;;  %v1139_v35 = vadd.f32 %v1107_v62, %v1041_v54  ;;  %v1108_v33 = vmul.f32 %v4282_v59, %v4365_v9  ;;  %v615_v51 = vmul.f32 %v4185_v63, %v4218_v52  ;;  %v1206_v34 = vmul.f32 %v4264_v29, %v4370_v4  ;;  %v1681_v1 = vld [vmem:[#allocation2 + $0x9] sm:$0xff] }
  0xa4   : > { %1559 = vst.msk [vmem:[#allocation2 + $0x100] sm:$0xff] %vm1526_vm2, %v3505_v36  ;;  %v844_v0 = vadd.f32 %v812_v43, %v746_v25  ;;  %v549_v58 = vadd.f32 %v517_v41, %v451_v56  ;;  %v715_v52 = vmul.f32 %v4211_v18, %v4305_v8  ;;  %v813_v10 = vmul.f32 %v4229_v20, %v4314_v5 }
  0xa5   : > { %1560 = vst.msk [vmem:[#allocation2 + $0x108] sm:$0xff] %vm1526_vm2, %v3505_v36  ;;  %v1237_v46 = vadd.f32 %v1205_v31, %v1139_v35  ;;  %v1011_v30 = vmul.f32 %v4240_v38, %v4416_v37  ;;  %v1615_v31 = vld [vmem:[#allocation2 + $0x8] sm:$0xff]  ;;  %v452_v43 = vmul.f32 %v4160_v61, %v4254_v3  ;;  %v518_v35 = vmul.f32 %v4174_v14, %v4257_v40 }
  0xa6   : > { %3290 = vmatmul.msk.f32.gmra.mxu1 %vm321_vm1, %v1228_v24  ;;  %v1236_v24 = vadd.f32 %v1204_v21, %v1138_v44  ;;  %1561 = vst.msk [vmem:[#allocation2 + $0x110] sm:$0xff] %vm1526_vm2, %v3505_v36  ;;  %v942_v12 = vadd.f32 %v910_v2, %v844_v0  ;;  %v1680_v21 = vld [vmem:[#allocation2 + $0x1] sm:$0xff]  ;;  %v1649_v40 = vmul.f32 %v4375_v47, %v1615_v31 }
  0xa7   : > { %1562 = vst.msk [vmem:[#allocation2 + $0x118] sm:$0xff] %vm1526_vm2, %v3505_v36  ;;  %v2467_v44 = vld [vmem:[%s5434_s5] sm:$0xff]  ;;  %v1714_v15 = vmul.f32 %v4387_v32, %v1680_v21  ;;  %v616_v0 = vmul.f32 %v4185_v63, %v4271_v45  ;;  %v716_v45 = vmul.f32 %v4211_v18, %v4354_v11 }
  0xa8   : > { %3298 = vmatmul.msk.f32.gmra.mxu3 %vm321_vm1, %v1236_v24  ;;  %1563 = vst.msk [vmem:[#allocation2 + $0x120] sm:$0xff] %vm1526_vm2, %v3505_v36  ;;  %3071 = vmatmul.msk.f32.gmra.mxu0 %vm321_vm1, %v3062_v55  ;;  %v1042_v49 = vadd.f32 %v1010_v60, %v942_v12  ;;  %v911_v24 = vmul.f32 %v4196_v6, %v4321_v7 }
  0xa9   : > { %1564 = vst.msk [vmem:[#allocation2 + $0x128] sm:$0xff] %vm1526_vm2, %v3505_v36  ;;  %2579 = vmatpush.msrb.mxu0 %v2467_v44  ;;  %3353 = vmatpush.msra.mxu2 %v2467_v44  ;;  %v1207_v55 = vmul.f32 %v4264_v29, %v4441_v48  ;;  %v1715_v12 = vmul.f32 %v4387_v32, %v1681_v1 }
  0xaa   : > { %1565 = vst.msk [vmem:[#allocation2 + $0x130] sm:$0xff] %vm1526_vm2, %v3505_v36  ;;  %v1140_v16 = vadd.f32 %v1108_v33, %v1042_v49 }
  0xab   : > { %v1362_v23 = vpop.f32.mrf.mxu1  ;;  %1566 = vst.msk [vmem:[#allocation2 + $0x138] sm:$0xff] %vm1526_vm2, %v3505_v36 }
  0xac   : > { %v1462_v53 = vadd.f32 %v4294_v57, %v1362_v23  ;;  %1567 = vst.msk [vmem:[#allocation2 + $0x140] sm:$0xff] %vm1526_vm2, %v3505_v36  ;;  %v1648_v23 = vmul.f32 %v4375_v47, %v1614_v50  ;;  %v1238_v28 = vadd.f32 %v1206_v34, %v1140_v16  ;;  %v1779_v50 = vld [vmem:[#allocation2 + $0xa] sm:$0xff]  ;;  %v4491_v16 = vld [vmem:[%s5433_s4 + $0x5] ss:$0 sm:$0xff] }
  0xad   : > { %1568 = vst.msk [vmem:[#allocation2 + $0x148] sm:$0xff] %vm1526_vm2, %v3505_v36 }
  0xae   : > { %v1494_v26 = vmax.f32 %v1462_v53, 0.0  ;;  %3291 = vmatmul.msk.f32.gmra.mxu1 %vm321_vm1, %v1229_v42  ;;  %1569 = vst.msk [vmem:[#allocation2 + $0x150] sm:$0xff] %vm1526_vm2, %v3505_v36  ;;  %v647_v42 = vadd.f32 %v615_v51, %v549_v58  ;;  %v4423_v53 = vld [vmem:[%s5433_s4 + $0x2] ss:$0 sm:$0xff]  ;;  %v1746_v25 = vadd.f32 %v1714_v15, %v1648_v23  ;;  %v814_v58 = vmul.f32 %v4229_v20, %v4365_v9  ;;  %v4475_v51 = vld [vmem:[%s3629_s13 + $0x170] sm:$0xff] }
  0xaf   : > { %1570 = vst.msk [vmem:[#allocation2 + $0x158] sm:$0xff] %vm1526_vm2, %v3505_v36  ;;  %v1812_v2 = vmul.f32 %v4423_v53, %v1778_v13  ;;  %v912_v23 = vmul.f32 %v4196_v6, %v4370_v4  ;;  %v4485_v15 = vld [vmem:[%s3629_s13 + $0x171] sm:$0xff]  ;;  %v1012_v13 = vmul.f32 %v4240_v38, %v4475_v51 }
  0xb0   : > { %1582 = vst.msk [vmem:[#allocation2 + $0x19] sm:$0xff] %vm1526_vm2, %v1494_v26  ;;  %3299 = vmatmul.msk.f32.gmra.mxu3 %vm321_vm1, %v1237_v46  ;;  %v747_v19 = vadd.f32 %v715_v52, %v647_v42  ;;  %v550_v46 = vadd.f32 %v518_v35, %v452_v43  ;;  %v1110_v31 = vmul.f32 %v4282_v59, %v4485_v15 }
  0xb1   : > { %1571 = vst.msk [vmem:[#allocation2 + $0x160] sm:$0xff] %vm1526_vm2, %v3505_v36  ;;  %v1844_v34 = vadd.f32 %v1812_v2, %v1746_v25  ;;  %v4508_v25 = vld [vmem:[%s3629_s13 + $0x172] sm:$0xff] }
  0xb2   : > { %1572 = vst.msk [vmem:[#allocation2 + $0x168] sm:$0xff] %vm1526_vm2, %v3505_v36  ;;  %v845_v26 = vadd.f32 %v813_v10, %v747_v19  ;;  %v648_v21 = vadd.f32 %v616_v0, %v550_v46  ;;  %v717_v46 = vmul.f32 %v4211_v18, %v4416_v37  ;;  %v4532_v0 = vld [vmem:[%s3629_s13 + $0x180] sm:$0xff] }
  0xb3   : > { %v1365_v22 = vpop.f32.mrf.mxu1  ;;  %1573 = vst.msk [vmem:[#allocation2 + $0x170] sm:$0xff] %vm1526_vm2, %v3505_v36 }
  0xb4   : > { %v1463_v62 = vadd.f32 %v4294_v57, %v1365_v22  ;;  %1574 = vst.msk [vmem:[#allocation2 + $0x178] sm:$0xff] %vm1526_vm2, %v3505_v36  ;;  %v943_v60 = vadd.f32 %v911_v24, %v845_v26  ;;  %v1109_v22 = vmul.f32 %v4282_v59, %v4430_v39  ;;  %v748_v44 = vadd.f32 %v716_v45, %v648_v21 }
  0xb5   : > { %1575 = vst.msk [vmem:[#allocation2 + $0x180] sm:$0xff] %vm1526_vm2, %v3505_v36  ;;  %v1747_v24 = vadd.f32 %v1715_v12, %v1649_v40  ;;  %v519_v26 = vmul.f32 %v4174_v14, %v4314_v5 }
  0xb6   : > { %3292 = vmatmul.msk.f32.gmra.mxu1 %vm321_vm1, %v1230_v27  ;;  %v4453_v27 = vld [vmem:[%s5433_s4 + $0x4] ss:$0 sm:$0xff]  ;;  %1576 = vst.msk [vmem:[#allocation2 + $0x188] sm:$0xff] %vm1526_vm2, %v3505_v36  ;;  %v1495_v56 = vmax.f32 %v1463_v62, 0.0  ;;  %v1043_v41 = vadd.f32 %v1011_v30, %v943_v60  ;;  %v4516_v60 = vld [vmem:[%s5433_s4 + $0x6] ss:$0 sm:$0xff] }
  0xb7   : > { %v1876_v3 = vld [vmem:[#allocation2 + $0x18] sm:$0xff]  ;;  %1577 = vst.msk [vmem:[#allocation2 + $0x190] sm:$0xff] %vm1526_vm2, %v3505_v36 }
  0xb8   : > { %3300 = vmatmul.msk.f32.gmra.mxu3 %vm321_vm1, %v1238_v28  ;;  %1578 = vst.msk [vmem:[#allocation2 + $0x198] sm:$0xff] %vm1526_vm2, %v3505_v36  ;;  %v1911_v49 = vmul.f32 %v4453_v27, %v1876_v3  ;;  %v1141_v42 = vadd.f32 %v1109_v22, %v1043_v41  ;;  %v1975_v52 = vld [vmem:[#allocation2 + $0x19] sm:$0xff]  ;;  %v453_v28 = vmul.f32 %v4160_v61, %v4305_v8  ;;  %v4522_v22 = vld [vmem:[%s5433_s4 + $0x8] ss:$0 sm:$0xff] }
  0xb9   : > { %1579 = vst.msk [vmem:[#allocation2 + $0x1a0] sm:$0xff] %vm1526_vm2, %v3505_v36  ;;  %v1716_v1 = vmul.f32 %v4387_v32, %v1975_v52  ;;  %v617_v8 = vmul.f32 %v4185_v63, %v4321_v7  ;;  %v2009_v5 = vmul.f32 %v4491_v16, %v1975_v52 }
  0xba   : > { %1580 = vst.msk [vmem:[#allocation2 + $0x1a8] sm:$0xff] %vm1526_vm2, %v3505_v36  ;;  %v1239_v19 = vadd.f32 %v1207_v55, %v1141_v42  ;;  %v1813_v36 = vmul.f32 %v4423_v53, %v1779_v50  ;;  %v1943_v30 = vadd.f32 %v1911_v49, %v1844_v34  ;;  %v551_v2 = vadd.f32 %v519_v26, %v453_v28  ;;  %v4557_v28 = vld [vmem:[%s5433_s4 + $0xa] ss:$0 sm:$0xff] }
  0xbb   : > { %v1368_v17 = vpop.f32.mrf.mxu1  ;;  %1583 = vst.msk [vmem:[#allocation2 + $0x21] sm:$0xff] %vm1526_vm2, %v1495_v56  ;;  %v1208_v55 = vmul.f32 %v4264_v29, %v4508_v25  ;;  %v815_v34 = vmul.f32 %v4229_v20, %v4430_v39  ;;  %v913_v49 = vmul.f32 %v4196_v6, %v4441_v48 }
  0xbc   : > { %v1464_v54 = vadd.f32 %v4294_v57, %v1368_v17  ;;  %v846_v17 = vadd.f32 %v814_v58, %v748_v44  ;;  %v649_v40 = vadd.f32 %v617_v8, %v551_v2  ;;  %v2041_v56 = vadd.f32 %v2009_v5, %v1943_v30 }
  0xbd   : > { %v1845_v41 = vadd.f32 %v1813_v36, %v1747_v24  ;;  %v1013_v36 = vmul.f32 %v4240_v38, %v4532_v0 }
  0xbe   : > { %v1496_v33 = vmax.f32 %v1464_v54, 0.0  ;;  %v1650_v54 = vmul.f32 %v4375_v47, %v1876_v3  ;;  %v944_v35 = vadd.f32 %v912_v23, %v846_v17  ;;  %v4527_v3 = vld [vmem:[%s5433_s4 + $0x9] ss:$0 sm:$0xff]  ;;  %v749_v58 = vadd.f32 %v717_v46, %v649_v40 }
  0xc0   : > { %1584 = vst.msk [vmem:[#allocation2 + $0x31] sm:$0xff] %vm1526_vm2, %v1496_v33  ;;  %3301 = vmatmul.msk.f32.gmra.mxu3 %vm321_vm1, %v1239_v19  ;;  %v1044_v7 = vadd.f32 %v1012_v13, %v944_v35  ;;  %v1748_v12 = vadd.f32 %v1716_v1, %v1650_v54  ;;  %v847_v5 = vadd.f32 %v815_v34, %v749_v58 }
  0xc2   : > { %v2073_v33 = vld [vmem:[#allocation2 + $0x1a] sm:$0xff]  ;;  %v1142_v45 = vadd.f32 %v1110_v31, %v1044_v7  ;;  %v2074_v19 = vld [vmem:[#allocation2 + $0x22] sm:$0xff] }
  0xc3   : > { %v1371_v10 = vpop.f32.mrf.mxu1  ;;  %v1877_v50 = vld [vmem:[#allocation2 + $0x20] sm:$0xff]  ;;  %v2107_v52 = vmul.f32 %v4516_v60, %v2073_v33  ;;  %v1814_v24 = vmul.f32 %v4423_v53, %v2073_v33  ;;  %v2108_v54 = vmul.f32 %v4516_v60, %v2074_v19 }
  0xc4   : > { %v1465_v62 = vadd.f32 %v4294_v57, %v1371_v10  ;;  %v1976_v21 = vld [vmem:[#allocation2 + $0x21] sm:$0xff]  ;;  %v1912_v10 = vmul.f32 %v4453_v27, %v1877_v50  ;;  %v1240_v1 = vadd.f32 %v1208_v55, %v1142_v45 }
  0xc5   : > { %v2010_v26 = vmul.f32 %v4491_v16, %v1976_v21  ;;  %v2139_v30 = vadd.f32 %v2107_v52, %v2041_v56  ;;  %v1846_v2 = vadd.f32 %v1814_v24, %v1748_v12  ;;  %v4567_v7 = vld [vmem:[%s3629_s13 + $0x182] sm:$0xff]  ;;  %v1717_v55 = vmul.f32 %v4387_v32, %v1976_v21 }
  0xc6   : > { %v1497_v43 = vmax.f32 %v1465_v62, 0.0  ;;  %v1944_v31 = vadd.f32 %v1912_v10, %v1845_v41  ;;  %v1651_v41 = vmul.f32 %v4375_v47, %v1877_v50  ;;  %v1209_v50 = vmul.f32 %v4264_v29, %v4567_v7 }
  0xc7   : > { %v4541_v44 = vld [vmem:[#allocation2 + $0x30] sm:$0xff] }
  0xc8   : > { %1585 = vst.msk [vmem:[#allocation2 + $0x39] sm:$0xff] %vm1526_vm2, %v1497_v43  ;;  %v4543_v23 = vld [vmem:[#allocation2 + $0x31] sm:$0xff]  ;;  %v2207_v62 = vmul.f32 %v4522_v22, %v4541_v44  ;;  %v4562_v43 = vld [vmem:[%s3629_s13 + $0x181] sm:$0xff]  ;;  %v1913_v8 = vmul.f32 %v4453_v27, %v4541_v44  ;;  %v2042_v33 = vadd.f32 %v2010_v26, %v1944_v31  ;;  %3302 = vmatmul.msk.f32.gmra.mxu3 %vm321_vm1, %v1240_v1 }
  0xc9   : > { %v2305_v17 = vmul.f32 %v4527_v3, %v4543_v23  ;;  %v1111_v34 = vmul.f32 %v4282_v59, %v4562_v43  ;;  %v2011_v24 = vmul.f32 %v4491_v16, %v4543_v23  ;;  %v1815_v26 = vmul.f32 %v4423_v53, %v2074_v19 }
  0xca   : > { %v2239_v40 = vadd.f32 %v2207_v62, %v2139_v30  ;;  %v1945_v58 = vadd.f32 %v1913_v8, %v1846_v2  ;;  %v2140_v10 = vadd.f32 %v2108_v54, %v2042_v33  ;;  %v1749_v62 = vadd.f32 %v1717_v55, %v1651_v41 }
  0xcb   : > { %v1374_v42 = vpop.f32.mrf.mxu1  ;;  %v520_v41 = vmul.f32 %v4174_v14, %v4365_v9 }
  0xcc   : > { %v1466_v13 = vadd.f32 %v4294_v57, %v1374_v42  ;;  %v2337_v52 = vadd.f32 %v2305_v17, %v2239_v40  ;;  %v2043_v8 = vadd.f32 %v2011_v24, %v1945_v58  ;;  %v1847_v33 = vadd.f32 %v1815_v26, %v1749_v62 }
  0xce   : > { %v1498_v35 = vmax.f32 %v1466_v13, 0.0  ;;  %v945_v13 = vadd.f32 %v913_v49, %v847_v5  ;;  %v454_v5 = vmul.f32 %v4160_v61, %v4354_v11  ;;  %v718_v11 = vmul.f32 %v4211_v18, %v4475_v51 }
  0xcf   : > { %v4569_v46 = vld [vmem:[#allocation2 + $0x32] sm:$0xff]  ;;  %v4597_v2 = vld [vmem:[#allocation2 + $0x3a] sm:$0xff] }
  0xd0   : > { %v4571_v42 = vld [vmem:[#allocation2 + $0x38] sm:$0xff]  ;;  %1586 = vst.msk [vmem:[#allocation2 + $0x49] sm:$0xff] %vm1526_vm2, %v1498_v35  ;;  %v2403_v12 = vmul.f32 %v4557_v28, %v4569_v46  ;;  %v2109_v17 = vmul.f32 %v4516_v60, %v4569_v46  ;;  %v1045_v40 = vadd.f32 %v1013_v36, %v945_v13  ;;  %v618_v36 = vmul.f32 %v4185_v63, %v4370_v4  ;;  %v4620_v13 = vld [vmem:[%s3629_s13 + $0x188] sm:$0xff] }
  0xd1   : > { %v4573_v56 = vld [vmem:[#allocation2 + $0x39] sm:$0xff]  ;;  %v2208_v45 = vmul.f32 %v4522_v22, %v4571_v42  ;;  %v1914_v54 = vmul.f32 %v4453_v27, %v4571_v42  ;;  %v2404_v58 = vmul.f32 %v4557_v28, %v4597_v2  ;;  %v552_v24 = vadd.f32 %v520_v41, %v454_v5 }
  0xd2   : > { %v2306_v21 = vmul.f32 %v4527_v3, %v4573_v56  ;;  %v2435_v31 = vadd.f32 %v2403_v12, %v2337_v52  ;;  %v2012_v19 = vmul.f32 %v4491_v16, %v4573_v56  ;;  %v1143_v12 = vadd.f32 %v1111_v34, %v1045_v40 }
  0xd3   : > { %v1377_v30 = vpop.f32.mrf.mxu1  ;;  %v2240_v1 = vadd.f32 %v2208_v45, %v2140_v10  ;;  %v1946_v45 = vadd.f32 %v1914_v54, %v1847_v33  ;;  %v2141_v9 = vadd.f32 %v2109_v17, %v2043_v8  ;;  %v2110_v62 = vmul.f32 %v4516_v60, %v4597_v2  ;;  %v4637_v33 = vld [vmem:[%s3629_s13 + $0x18a] sm:$0xff] }
  0xd4   : > { %v1467_v35 = vadd.f32 %v4294_v57, %v1377_v30  ;;  %3313 = vmatmul.msk.f32.vlgmr.msrb.gmra.mxu0 %vm1526_vm2, %v2435_v31  ;;  %v650_v26 = vadd.f32 %v618_v36, %v552_v24  ;;  %v816_v30 = vmul.f32 %v4229_v20, %v4485_v15  ;;  %v4627_v31 = vld [vmem:[%s3629_s13 + $0x189] sm:$0xff]  ;;  %v1014_v40 = vmul.f32 %v4240_v38, %v4620_v13 }
  0xd5   : > { %v2338_v49 = vadd.f32 %v2306_v21, %v2240_v1  ;;  %v1241_v21 = vadd.f32 %v1209_v50, %v1143_v12  ;;  %v2044_v4 = vadd.f32 %v2012_v19, %v1946_v45  ;;  %v914_v50 = vmul.f32 %v4196_v6, %v4508_v25 }
  0xd6   : > { %v1499_v55 = vmax.f32 %v1467_v35, 0.0  ;;  %v750_v8 = vadd.f32 %v718_v11, %v650_v26  ;;  %v1718_v19 = vmul.f32 %v4387_v32, %v4543_v23  ;;  %v455_v12 = vmul.f32 %v4160_v61, %v4416_v37 }
  0xd7   : > { %v4610_v52 = vld [vmem:[#allocation2 + $0x48] sm:$0xff]  ;;  %v2436_v1 = vadd.f32 %v2404_v58, %v2338_v49  ;;  %3303 = vmatmul.msk.f32.gmra.mxu3 %vm321_vm1, %v1241_v21  ;;  %v1652_v49 = vmul.f32 %v4375_v47, %v4541_v44  ;;  %v2142_v41 = vadd.f32 %v2110_v62, %v2044_v4  ;;  %v1816_v36 = vmul.f32 %v4423_v53, %v4569_v46 }
  0xd8   : > { %v4612_v10 = vld [vmem:[#allocation2 + $0x49] sm:$0xff]  ;;  %1587 = vst.msk [vmem:[#allocation2 + $0x51] sm:$0xff] %vm1526_vm2, %v1499_v55  ;;  %v2209_v34 = vmul.f32 %v4522_v22, %v4610_v52  ;;  %v1112_v55 = vmul.f32 %v4282_v59, %v4627_v31  ;;  %v848_v45 = vadd.f32 %v816_v30, %v750_v8  ;;  %v521_v44 = vmul.f32 %v4174_v14, %v4430_v39 }
  0xd9   : > { %5441 = vst [vmem:[#allocation7_spill] sm:$0xff] %v4612_v10  ;;  %v2307_v17 = vmul.f32 %v4527_v3, %v4612_v10  ;;  %v619_v23 = vmul.f32 %v4185_v63, %v4441_v48  ;;  %v1210_v11 = vmul.f32 %v4264_v29, %v4637_v33  ;;  %v1915_v37 = vmul.f32 %v4453_v27, %v4610_v52 }
  0xda   : > { %v2241_v54 = vadd.f32 %v2209_v34, %v2141_v9  ;;  %v3205_v9 = vld [vmem:[%s3629_s13 + $0x198] sm:$0xff]  ;;  %v946_v4 = vadd.f32 %v914_v50, %v848_v45  ;;  %v1750_v39 = vadd.f32 %v1718_v19, %v1652_v49  ;;  %v553_v62 = vadd.f32 %v521_v44, %v455_v12 }
  0xdb   : > { %v1380_v35 = vpop.f32.mrf.mxu1  ;;  %v719_v48 = vmul.f32 %v4211_v18, %v4532_v0  ;;  %v915_v49 = vmul.f32 %v4196_v6, %v4567_v7  ;;  %v1015_v45 = vmul.f32 %v4240_v38, %v3205_v9  ;;  %v3238_v44 = vld [vmem:[%s3629_s13 + $0x199] sm:$0xff] }
  0xdc   : > { %v1468_v5 = vadd.f32 %v4294_v57, %v1380_v35  ;;  %3314 = vmatmul.msk.f32.gmra.mxu0 %vm1526_vm2, %v2436_v1  ;;  %v2339_v24 = vadd.f32 %v2307_v17, %v2241_v54  ;;  %v2013_v1 = vmul.f32 %v4491_v16, %v4612_v10  ;;  %v817_v54 = vmul.f32 %v4229_v20, %v4562_v43  ;;  %v4677_v17 = vpop.f32.mrf.mxu3 }
  0xdd   : > { %5442 = vst [vmem:[#allocation8_spill] sm:$0xff] %v4677_v17  ;;  %v1046_v0 = vadd.f32 %v1014_v40, %v946_v4  ;;  %v1848_v35 = vadd.f32 %v1816_v36, %v1750_v39  ;;  %v651_v8 = vadd.f32 %v619_v23, %v553_v62  ;;  %v1653_v40 = vmul.f32 %v4375_v47, %v4571_v42  ;;  %v3271_v4 = vld [vmem:[%s3629_s13 + $0x19a] sm:$0xff] }
  0xde   : > { %v1500_v58 = vmax.f32 %v1468_v5, 0.0  ;;  %v1719_v23 = vmul.f32 %v4387_v32, %v4573_v56  ;;  %v1113_v9 = vmul.f32 %v4282_v59, %v3238_v44  ;;  %v1817_v62 = vmul.f32 %v4423_v53, %v4597_v2 }
  0xdf   : > { %v4660_v34 = vld [vmem:[#allocation2 + $0x4a] sm:$0xff]  ;;  %v4679_v50 = vld [vmem:[#allocation2 + $0x52] sm:$0xff]  ;;  %v1947_v17 = vadd.f32 %v1915_v37, %v1848_v35  ;;  %v751_v10 = vadd.f32 %v719_v48, %v651_v8 }
  0xe0   : > { %v4662_v21 = vld [vmem:[#allocation2 + $0x50] sm:$0xff]  ;;  %1588 = vst.msk [vmem:[#allocation2 + $0x61] sm:$0xff] %vm1526_vm2, %v1500_v58  ;;  %v2405_v26 = vmul.f32 %v4557_v28, %v4660_v34  ;;  %v1144_v58 = vadd.f32 %v1112_v55, %v1046_v0  ;;  %v2406_v7 = vmul.f32 %v4557_v28, %v4679_v50  ;;  %v1751_v39 = vadd.f32 %v1719_v23, %v1653_v40 }
  0xe1   : > { %v4664_v46 = vld [vmem:[#allocation2 + $0x51] sm:$0xff]  ;;  %v2210_v30 = vmul.f32 %v4522_v22, %v4662_v21  ;;  %v849_v37 = vadd.f32 %v817_v54, %v751_v10  ;;  %v1916_v48 = vmul.f32 %v4453_v27, %v4662_v21  ;;  %v456_v10 = vmul.f32 %v4160_v61, %v4475_v51 }
  0xe2   : > { %v2437_v19 = vadd.f32 %v2405_v26, %v2339_v24  ;;  %v2308_v12 = vmul.f32 %v4527_v3, %v4664_v46  ;;  %v1242_v55 = vadd.f32 %v1210_v11, %v1144_v58  ;;  %v2045_v26 = vadd.f32 %v2013_v1, %v1947_v17 }
  0xe3   : > { %v2242_v5 = vadd.f32 %v2210_v30, %v2142_v41  ;;  %v1383_v43 = vpop.f32.mrf.mxu1  ;;  %v2111_v41 = vmul.f32 %v4516_v60, %v4660_v34  ;;  %v947_v30 = vadd.f32 %v915_v49, %v849_v37  ;;  %v522_v11 = vmul.f32 %v4174_v14, %v4485_v15 }
  0xe4   : > { %v1469_v36 = vadd.f32 %v4294_v57, %v1383_v43  ;;  %3315 = vmatmul.msk.f32.gmra.mxu0 %vm1526_vm2, %v2437_v19  ;;  %3304 = vmatmul.msk.f32.gmra.mxu3 %vm321_vm1, %v1242_v55  ;;  %v1211_v54 = vmul.f32 %v4264_v29, %v3271_v4  ;;  %v1849_v0 = vadd.f32 %v1817_v62, %v1751_v39  ;;  %v4716_v17 = vpop.f32.mrf.mxu3  ;;  %v3206_v43 = vld [vmem:[%s3629_s13 + $0x1a0] sm:$0xff] }
  0xe5   : > { %v2340_v24 = vadd.f32 %v2308_v12, %v2242_v5  ;;  %v620_v1 = vmul.f32 %v4185_v63, %v4508_v25  ;;  %v2143_v35 = vadd.f32 %v2111_v41, %v2045_v26  ;;  %v1047_v61 = vadd.f32 %v1015_v45, %v947_v30  ;;  %v5443_v41 = vld [vmem:[#allocation7_spill] sm:$0xff] }
  0xe6   : > { %v1501_v42 = vmax.f32 %v1469_v36, 0.0  ;;  %v554_v51 = vadd.f32 %v522_v11, %v456_v10  ;;  %v720_v14 = vmul.f32 %v4211_v18, %v4620_v13  ;;  %v1948_v49 = vadd.f32 %v1916_v48, %v1849_v0  ;;  %v3239_v55 = vld [vmem:[%s3629_s13 + $0x1a1] sm:$0xff] }
  0xe7   : > { %v4704_v56 = vld [vmem:[#allocation2 + $0x60] sm:$0xff]  ;;  %v2438_v15 = vadd.f32 %v2406_v7, %v2340_v24  ;;  %v2014_v19 = vmul.f32 %v4491_v16, %v4664_v46  ;;  %v1145_v44 = vadd.f32 %v1113_v9, %v1047_v61  ;;  %v818_v25 = vmul.f32 %v4229_v20, %v4627_v31 }
  0xe8   : > { %1589 = vst.msk [vmem:[#allocation2 + $0x69] sm:$0xff] %vm1526_vm2, %v1501_v42  ;;  %v2211_v2 = vmul.f32 %v4522_v22, %v4704_v56  ;;  %v4718_v8 = vld [vmem:[#allocation2 + $0x61] sm:$0xff]  ;;  %v652_v63 = vadd.f32 %v620_v1, %v554_v51  ;;  %v916_v18 = vmul.f32 %v4196_v6, %v4637_v33  ;;  %v1654_v13 = vmul.f32 %v4375_v47, %v4610_v52 }
  0xe9   : > { %v2309_v58 = vmul.f32 %v4527_v3, %v4718_v8  ;;  %v1243_v40 = vadd.f32 %v1211_v54, %v1145_v44  ;;  %v2046_v36 = vadd.f32 %v2014_v19, %v1948_v49  ;;  %v1720_v20 = vmul.f32 %v4387_v32, %v5443_v41  ;;  %v3272_v62 = vld [vmem:[%s3629_s13 + $0x1a2] sm:$0xff]  ;;  %s2988_s13 = sshll.u32 %s5238_s21, 4  ;;  %s2989_s13 = int_to_ptr.vmem [resolvable:$true] %s2988_s13 }
  0xea   : > { %v2243_v12 = vadd.f32 %v2211_v2, %v2143_v35  ;;  %v752_v7 = vadd.f32 %v720_v14, %v652_v63  ;;  %v2112_v23 = vmul.f32 %v4516_v60, %v4679_v50  ;;  %v1016_v24 = vmul.f32 %v4240_v38, %v3206_v43 }
  0xeb   : > { %v1386_v5 = vpop.f32.mrf.mxu1  ;;  %v1818_v6 = vmul.f32 %v4423_v53, %v4660_v34  ;;  %v1655_v4 = vmul.f32 %v4375_v47, %v4662_v21  ;;  %v1721_v42 = vmul.f32 %v4387_v32, %v4664_v46  ;;  %v1752_v34 = vadd.f32 %v1720_v20, %v1654_v13 }
  0xec   : > { %v1470_v45 = vadd.f32 %v4294_v57, %v1386_v5  ;;  %3316 = vmatmul.msk.f32.gmra.mxu0 %vm1526_vm2, %v2438_v15  ;;  %v2341_v52 = vadd.f32 %v2309_v58, %v2243_v12  ;;  %3305 = vmatmul.msk.f32.gmra.mxu3 %vm321_vm1, %v1243_v40  ;;  %v850_v9 = vadd.f32 %v818_v25, %v752_v7  ;;  %v4754_v26 = vpop.f32.mrf.mxu3 }
  0xed   : > { %v1917_v48 = vmul.f32 %v4453_v27, %v4704_v56  ;;  %v2144_v30 = vadd.f32 %v2112_v23, %v2046_v36  ;;  %v1114_v21 = vmul.f32 %v4282_v59, %v3239_v55  ;;  %v1850_v46 = vadd.f32 %v1818_v6, %v1752_v34 }
  0xee   : > { %v1502_v31 = vmax.f32 %v1470_v45, 0.0  ;;  %v948_v10 = vadd.f32 %v916_v18, %v850_v9  ;;  %v1212_v35 = vmul.f32 %v4264_v29, %v3272_v62  ;;  %v1753_v61 = vadd.f32 %v1721_v42, %v1655_v4 }
  0xef   : > { %v2373_v33 = vld [vmem:[#allocation2 + $0x62] sm:$0xff]  ;;  %v1949_v14 = vadd.f32 %v1917_v48, %v1850_v46  ;;  %v1819_v59 = vmul.f32 %v4423_v53, %v4679_v50  ;;  %v2374_v12 = vld [vmem:[#allocation2 + $0x6a] sm:$0xff]  ;;  %v2015_v44 = vmul.f32 %v4491_v16, %v4718_v8  ;;  %v1656_v23 = vmul.f32 %v4375_v47, %v4704_v56 }
  0xf0   : > { %v2177_v37 = vld [vmem:[#allocation2 + $0x68] sm:$0xff]  ;;  %1590 = vst.msk [vmem:[#allocation2 + $0x79] sm:$0xff] %vm1526_vm2, %v1502_v31  ;;  %v2407_v38 = vmul.f32 %v4557_v28, %v2373_v33  ;;  %v1048_v1 = vadd.f32 %v1016_v24, %v948_v10  ;;  %v2113_v29 = vmul.f32 %v4516_v60, %v2373_v33  ;;  %v2408_v13 = vmul.f32 %v4557_v28, %v2374_v12 }
  0xf1   : > { %v2212_v39 = vmul.f32 %v4522_v22, %v2177_v37  ;;  %v2276_v2 = vld [vmem:[#allocation2 + $0x69] sm:$0xff]  ;;  %v1918_v19 = vmul.f32 %v4453_v27, %v2177_v37  ;;  %v1851_v45 = vadd.f32 %v1819_v59, %v1753_v61  ;;  %v2047_v58 = vadd.f32 %v2015_v44, %v1949_v14 }
  0xf2   : > { %v2439_v11 = vadd.f32 %v2407_v38, %v2341_v52  ;;  %v2310_v15 = vmul.f32 %v4527_v3, %v2276_v2  ;;  %v1146_v49 = vadd.f32 %v1114_v21, %v1048_v1  ;;  %v2016_v31 = vmul.f32 %v4491_v16, %v2276_v2 }
  0xf3   : > { %v1389_v54 = vpop.f32.mrf.mxu1  ;;  %v2244_v0 = vadd.f32 %v2212_v39, %v2144_v30  ;;  %v1950_v40 = vadd.f32 %v1918_v19, %v1851_v45  ;;  %v2145_v36 = vadd.f32 %v2113_v29, %v2047_v58  ;;  %v1722_v24 = vmul.f32 %v4387_v32, %v4718_v8 }
  0xf4   : > { %v1471_v51 = vadd.f32 %v4294_v57, %v1389_v54  ;;  %3317 = vmatmul.msk.f32.gmra.mxu0 %vm1526_vm2, %v2439_v11  ;;  %v1244_v25 = vadd.f32 %v1212_v35, %v1146_v49  ;;  %v4772_v18 = vpop.f32.mrf.mxu3  ;;  %v1820_v42 = vmul.f32 %v4423_v53, %v2373_v33  ;;  %v2114_v39 = vmul.f32 %v4516_v60, %v2374_v12 }
  0xf5   : > { %v2342_v63 = vadd.f32 %v2310_v15, %v2244_v0  ;;  %v2048_v52 = vadd.f32 %v2016_v31, %v1950_v40  ;;  %v1754_v34 = vadd.f32 %v1722_v24, %v1656_v23  ;;  %v1657_v56 = vmul.f32 %v4375_v47, %v2177_v37 }
  0xf6   : > { %v1503_v5 = vmax.f32 %v1471_v51, 0.0  ;;  %3306 = vmatmul.msk.f32.gmra.mxu3 %vm321_vm1, %v1244_v25  ;;  %v1723_v8 = vmul.f32 %v4387_v32, %v2276_v2  ;;  %v1821_v49 = vmul.f32 %v4423_v53, %v2374_v12 }
  0xf7   : > { %v4767_v43 = vld [vmem:[#allocation2 + $0x78] sm:$0xff]  ;;  %v2440_v41 = vadd.f32 %v2408_v13, %v2342_v63  ;;  %v2146_v11 = vadd.f32 %v2114_v39, %v2048_v52  ;;  %v1852_v0 = vadd.f32 %v1820_v42, %v1754_v34 }
  0xf8   : > { %1591 = vst.msk [vmem:[#allocation2 + $0x81] sm:$0xff] %vm1526_vm2, %v1503_v5  ;;  %v2213_v50 = vmul.f32 %v4522_v22, %v4767_v43  ;;  %v2277_v20 = vld [vmem:[#allocation2 + $0x79] sm:$0xff]  ;;  %v1919_v21 = vmul.f32 %v4453_v27, %v4767_v43  ;;  %v1755_v2 = vadd.f32 %v1723_v8, %v1657_v56 }
  0xf9   : > { %v2311_v4 = vmul.f32 %v4527_v3, %v2277_v20  ;;  %v2017_v44 = vmul.f32 %v4491_v16, %v2277_v20 }
  0xfa   : > { %v2245_v6 = vadd.f32 %v2213_v50, %v2145_v36  ;;  %v1951_v51 = vadd.f32 %v1919_v21, %v1852_v0  ;;  %v1853_v45 = vadd.f32 %v1821_v49, %v1755_v2 }
  0xfb   : > { %v1392_v7 = vpop.f32.mrf.mxu1 }
  0xfc   : > { %v1472_v55 = vadd.f32 %v4294_v57, %v1392_v7  ;;  %3318 = vmatmul.msk.f32.gmra.mxu0 %vm1526_vm2, %v2440_v41  ;;  %v2343_v48 = vadd.f32 %v2311_v4, %v2245_v6  ;;  %v1416_v33 = vpop.f32.mrf.mxu3  ;;  %v2049_v58 = vadd.f32 %v2017_v44, %v1951_v51  ;;  %v1658_v41 = vmul.f32 %v4375_v47, %v4767_v43 }
  0xfd   : > { %v1480_v1 = vadd.f32 %v4294_v57, %v1416_v33  ;;  %v1724_v6 = vmul.f32 %v4387_v32, %v2277_v20 }
  0xfe   : > { %v1504_v9 = vmax.f32 %v1472_v55, 0.0 }
  0xff   : > { %v2375_v38 = vld [vmem:[#allocation2 + $0x7a] sm:$0xff]  ;;  %v1512_v14 = vmax.f32 %v1480_v1, 0.0  ;;  %v2376_v5 = vld [vmem:[#allocation2 + $0x82] sm:$0xff] }
 0x100   : > { %v2179_v62 = vld [vmem:[#allocation2 + $0x80] sm:$0xff]  ;;  %1592 = vst.msk [vmem:[#allocation2 + $0x91] sm:$0xff] %vm1526_vm2, %v1504_v9  ;;  %v2409_v30 = vmul.f32 %v4557_v28, %v2375_v38  ;;  %v2115_v29 = vmul.f32 %v4516_v60, %v2375_v38  ;;  %v2410_v13 = vmul.f32 %v4557_v28, %v2376_v5  ;;  %v1822_v43 = vmul.f32 %v4423_v53, %v2375_v38 }
 0x101   : > { %v2214_v10 = vmul.f32 %v4522_v22, %v2179_v62  ;;  %v2278_v54 = vld [vmem:[#allocation2 + $0x81] sm:$0xff]  ;;  %v1920_v59 = vmul.f32 %v4453_v27, %v2179_v62  ;;  %1600 = vst.msk [vmem:[#allocation2 + $0xf1] sm:$0xff] %vm1526_vm2, %v1512_v14  ;;  %v2116_v8 = vmul.f32 %v4516_v60, %v2376_v5  ;;  %v1659_v20 = vmul.f32 %v4375_v47, %v2179_v62 }
 0x102   : > { %v2441_v46 = vadd.f32 %v2409_v30, %v2343_v48  ;;  %v2312_v15 = vmul.f32 %v4527_v3, %v2278_v54  ;;  %v2147_v7 = vadd.f32 %v2115_v29, %v2049_v58  ;;  %v2018_v55 = vmul.f32 %v4491_v16, %v2278_v54 }
 0x103   : > { %v1395_v37 = vpop.f32.mrf.mxu1  ;;  %v2246_v35 = vadd.f32 %v2214_v10, %v2146_v11  ;;  %v1952_v40 = vadd.f32 %v1920_v59, %v1853_v45  ;;  %v1756_v30 = vadd.f32 %v1724_v6, %v1658_v41  ;;  %v1725_v10 = vmul.f32 %v4387_v32, %v2278_v54 }
 0x104   : > { %v1473_v61 = vadd.f32 %v4294_v57, %v1395_v37  ;;  %3319 = vmatmul.msk.f32.gmra.mxu0 %vm1526_vm2, %v2441_v46  ;;  %v1419_v50 = vpop.f32.mrf.mxu3  ;;  %v1823_v59 = vmul.f32 %v4423_v53, %v2376_v5 }
 0x105   : > { %v2344_v63 = vadd.f32 %v2312_v15, %v2246_v35  ;;  %v1481_v36 = vadd.f32 %v4294_v57, %v1419_v50  ;;  %v2050_v42 = vadd.f32 %v2018_v55, %v1952_v40  ;;  %v1854_v35 = vadd.f32 %v1822_v43, %v1756_v30 }
 0x106   : > { %v1505_v19 = vmax.f32 %v1473_v61, 0.0  ;;  %v1757_v54 = vadd.f32 %v1725_v10, %v1659_v20 }
 0x107   : > { %v4802_v25 = vld [vmem:[#allocation2 + $0x90] sm:$0xff]  ;;  %v2442_v23 = vadd.f32 %v2410_v13, %v2344_v63  ;;  %v1513_v52 = vmax.f32 %v1481_v36, 0.0  ;;  %v2148_v0 = vadd.f32 %v2116_v8, %v2050_v42 }
 0x108   : > { %1593 = vst.msk [vmem:[#allocation2 + $0x99] sm:$0xff] %vm1526_vm2, %v1505_v19  ;;  %v2215_v12 = vmul.f32 %v4522_v22, %v4802_v25  ;;  %v2279_v24 = vld [vmem:[#allocation2 + $0x91] sm:$0xff]  ;;  %v1921_v46 = vmul.f32 %v4453_v27, %v4802_v25 }
 0x109   : > { %1601 = vst.msk [vmem:[#allocation2 + $0xf9] sm:$0xff] %vm1526_vm2, %v1513_v52  ;;  %v2313_v34 = vmul.f32 %v4527_v3, %v2279_v24  ;;  %v2019_v63 = vmul.f32 %v4491_v16, %v2279_v24 }
 0x10a   : > { %v2247_v4 = vadd.f32 %v2215_v12, %v2147_v7  ;;  %v1953_v14 = vadd.f32 %v1921_v46, %v1854_v35  ;;  %v1855_v12 = vadd.f32 %v1823_v59, %v1757_v54  ;;  %v4844_v7 = vld [vmem:[%s5432_s3] ss:$0 sm:$0xff] }
 0x10b   : > { %v1398_v31 = vpop.f32.mrf.mxu1 }
 0x10c   : > { %v1474_v9 = vadd.f32 %v4294_v57, %v1398_v31  ;;  %3320 = vmatmul.msk.f32.gmra.mxu0 %vm1526_vm2, %v2442_v23  ;;  %v2345_v21 = vadd.f32 %v2313_v34, %v2247_v4  ;;  %v1422_v38 = vpop.f32.mrf.mxu3  ;;  %v2051_v50 = vadd.f32 %v2019_v63, %v1953_v14  ;;  %v1660_v23 = vmul.f32 %v4375_v47, %v4802_v25 }
 0x10d   : > { %v1482_v2 = vadd.f32 %v4294_v57, %v1422_v38  ;;  %v1726_v4 = vmul.f32 %v4387_v32, %v2279_v24 }
 0x10e   : > { %v1506_v39 = vmax.f32 %v1474_v9, 0.0 }
 0x10f   : > { %v2377_v56 = vld [vmem:[#allocation2 + $0x92] sm:$0xff]  ;;  %v1514_v15 = vmax.f32 %v1482_v2, 0.0  ;;  %v2378_v29 = vld [vmem:[#allocation2 + $0x9a] sm:$0xff] }
 0x110   : > { %v2181_v48 = vld [vmem:[#allocation2 + $0x98] sm:$0xff]  ;;  %1594 = vst.msk [vmem:[#allocation2 + $0xa9] sm:$0xff] %vm1526_vm2, %v1506_v39  ;;  %v2411_v33 = vmul.f32 %v4557_v28, %v2377_v56  ;;  %v2117_v45 = vmul.f32 %v4516_v60, %v2377_v56  ;;  %v2412_v40 = vmul.f32 %v4557_v28, %v2378_v29  ;;  %v1824_v25 = vmul.f32 %v4423_v53, %v2377_v56 }
 0x111   : > { %v2216_v11 = vmul.f32 %v4522_v22, %v2181_v48  ;;  %v2280_v37 = vld [vmem:[#allocation2 + $0x99] sm:$0xff]  ;;  %v1922_v19 = vmul.f32 %v4453_v27, %v2181_v48  ;;  %1602 = vst.msk [vmem:[#allocation2 + $0x109] sm:$0xff] %vm1526_vm2, %v1514_v15  ;;  %v2118_v10 = vmul.f32 %v4516_v60, %v2378_v29  ;;  %v1661_v24 = vmul.f32 %v4375_v47, %v2181_v48 }
 0x112   : > { %v2443_v1 = vadd.f32 %v2411_v33, %v2345_v21  ;;  %v2314_v49 = vmul.f32 %v4527_v3, %v2280_v37  ;;  %v2149_v31 = vadd.f32 %v2117_v45, %v2051_v50  ;;  %v2020_v9 = vmul.f32 %v4491_v16, %v2280_v37 }
 0x113   : > { %v1401_v62 = vpop.f32.mrf.mxu1  ;;  %v2248_v61 = vadd.f32 %v2216_v11, %v2148_v0  ;;  %v1954_v36 = vadd.f32 %v1922_v19, %v1855_v12  ;;  %v1758_v33 = vadd.f32 %v1726_v4, %v1660_v23  ;;  %v1727_v11 = vmul.f32 %v4387_v32, %v2280_v37 }
 0x114   : > { %v1475_v51 = vadd.f32 %v4294_v57, %v1401_v62  ;;  %3321 = vmatmul.msk.f32.gmra.mxu0 %vm1526_vm2, %v2443_v1  ;;  %v1425_v13 = vpop.f32.mrf.mxu3  ;;  %v1825_v37 = vmul.f32 %v4423_v53, %v2378_v29 }
 0x115   : > { %v2346_v58 = vadd.f32 %v2314_v49, %v2248_v61  ;;  %v1483_v41 = vadd.f32 %v4844_v7, %v1425_v13  ;;  %v2052_v43 = vadd.f32 %v2020_v9, %v1954_v36  ;;  %v1856_v62 = vadd.f32 %v1824_v25, %v1758_v33  ;;  %v4891_v9 = vld [vmem:[%s5433_s4 + $0x1] ss:$0 sm:$0xff] }
 0x116   : > { %v1507_v44 = vmax.f32 %v1475_v51, 0.0  ;;  %v1759_v51 = vadd.f32 %v1727_v11, %v1661_v24 }
 0x117   : > { %v4835_v57 = vld [vmem:[#allocation2 + $0xa8] sm:$0xff]  ;;  %v2444_v6 = vadd.f32 %v2412_v40, %v2346_v58  ;;  %v1515_v42 = vmax.f32 %v1483_v41, 0.0  ;;  %v2150_v56 = vadd.f32 %v2118_v10, %v2052_v43 }
 0x118   : > { %1595 = vst.msk [vmem:[#allocation2 + $0xb1] sm:$0xff] %vm1526_vm2, %v1507_v44  ;;  %v2217_v5 = vmul.f32 %v4522_v22, %v4835_v57  ;;  %v2281_v52 = vld [vmem:[#allocation2 + $0xa9] sm:$0xff]  ;;  %v1923_v1 = vmul.f32 %v4453_v27, %v4835_v57  ;;  %v1857_v45 = vadd.f32 %v1825_v37, %v1759_v51 }
 0x119   : > { %1603 = vst.msk [vmem:[#allocation2 + $0x111] sm:$0xff] %vm1526_vm2, %v1515_v42  ;;  %v2315_v30 = vmul.f32 %v4527_v3, %v2281_v52  ;;  %v2021_v59 = vmul.f32 %v4491_v16, %v2281_v52  ;;  %v1728_v4 = vmul.f32 %v4891_v9, %v2281_v52  ;;  %v4903_v52 = vld [vmem:[%s5433_s4 + $0x2] ss:$0 sm:$0xff] }
 0x11a   : > { %v2249_v34 = vadd.f32 %v2217_v5, %v2149_v31  ;;  %v1955_v32 = vadd.f32 %v1923_v1, %v1856_v62  ;;  %v4877_v5 = vpop.f32.mrf.mxu0 }
 0x11b   : > { %v1404_v55 = vpop.f32.mrf.mxu1 }
 0x11c   : > { %v1476_v39 = vadd.f32 %v4844_v7, %v1404_v55  ;;  %3322 = vmatmul.msk.f32.gmra.mxu0 %vm1526_vm2, %v2444_v6  ;;  %v2347_v46 = vadd.f32 %v2315_v30, %v2249_v34  ;;  %v2053_v58 = vadd.f32 %v2021_v59, %v1955_v32  ;;  %v4884_v55 = vld [vmem:[%s5433_s4] ss:$0 sm:$0xff] }
 0x11d   : > { %v1662_v6 = vmul.f32 %v4884_v55, %v4835_v57 }
 0x11e   : > { %v1508_v8 = vmax.f32 %v1476_v39, 0.0 }
 0x11f   : > { %v2379_v20 = vld [vmem:[#allocation2 + $0xaa] sm:$0xff]  ;;  %v2380_v49 = vld [vmem:[#allocation2 + $0xb2] sm:$0xff] }
 0x120   : > { %v2183_v21 = vld [vmem:[#allocation2 + $0xb0] sm:$0xff]  ;;  %1596 = vst.msk [vmem:[#allocation2 + $0xc1] sm:$0xff] %vm1526_vm2, %v1508_v8  ;;  %v2413_v38 = vmul.f32 %v4557_v28, %v2379_v20  ;;  %v2119_v19 = vmul.f32 %v4516_v60, %v2379_v20  ;;  %v2414_v53 = vmul.f32 %v4557_v28, %v2380_v49  ;;  %v1826_v10 = vmul.f32 %v4903_v52, %v2379_v20 }
 0x121   : > { %v2218_v0 = vmul.f32 %v4522_v22, %v2183_v21  ;;  %v2282_v2 = vld [vmem:[#allocation2 + $0xb1] sm:$0xff]  ;;  %v1924_v14 = vmul.f32 %v4453_v27, %v2183_v21  ;;  %v1663_v8 = vmul.f32 %v4884_v55, %v2183_v21  ;;  %v2120_v24 = vmul.f32 %v4516_v60, %v2380_v49 }
 0x122   : > { %v2445_v35 = vadd.f32 %v2413_v38, %v2347_v46  ;;  %v2316_v48 = vmul.f32 %v4527_v3, %v2282_v2  ;;  %v1428_v50 = vpop.f32.mrf.mxu3  ;;  %v2151_v13 = vadd.f32 %v2119_v19, %v2053_v58  ;;  %v2022_v23 = vmul.f32 %v4491_v16, %v2282_v2 }
 0x123   : > { %v1407_v61 = vpop.f32.mrf.mxu1  ;;  %v2250_v54 = vadd.f32 %v2218_v0, %v2150_v56  ;;  %v1956_v29 = vadd.f32 %v1924_v14, %v1857_v45  ;;  %v1484_v40 = vadd.f32 %v4844_v7, %v1428_v50  ;;  %v1729_v30 = vmul.f32 %v4891_v9, %v2282_v2  ;;  %v4916_v14 = vpop.f32.mrf.mxu0 }
 0x124   : > { %v1477_v47 = vadd.f32 %v4844_v7, %v1407_v61  ;;  %3323 = vmatmul.msk.f32.gmra.mxu0 %vm1526_vm2, %v2445_v35  ;;  %v1760_v46 = vadd.f32 %v1728_v4, %v1662_v6  ;;  %v1827_v32 = vmul.f32 %v4903_v52, %v2380_v49  ;;  %v3506_v19 = vmov -3.4028235e+38  }
 0x125   : > { %v2348_v44 = vadd.f32 %v2316_v48, %v2250_v54  ;;  %v1516_v34 = vmax.f32 %v1484_v40, 0.0  ;;  %v2054_v43 = vadd.f32 %v2022_v23, %v1956_v29  ;;  %v1761_v2 = vadd.f32 %v1729_v30, %v1663_v8  ;;  %2716 = vst.msk [vmem:[#allocation3 + $0x18] sm:$0xff] %vm1526_vm2, %v3506_v19 }
 0x126   : > { %v1509_v15 = vmax.f32 %v1477_v47, 0.0  ;;  %v1858_v61 = vadd.f32 %v1826_v10, %v1760_v46  ;;  %2717 = vst.msk [vmem:[#allocation3 + $0x20] sm:$0xff] %vm1526_vm2, %v3506_v19 }
 0x127   : > { %v4871_v63 = vld [vmem:[#allocation2 + $0xc0] sm:$0xff]  ;;  %v2446_v41 = vadd.f32 %v2414_v53, %v2348_v44  ;;  %1604 = vst.msk [vmem:[#allocation2 + $0x121] sm:$0xff] %vm1526_vm2, %v1516_v34  ;;  %v2152_v56 = vadd.f32 %v2120_v24, %v2054_v43  ;;  %v1859_v45 = vadd.f32 %v1827_v32, %v1761_v2 }
 0x128   : > { %1597 = vst.msk [vmem:[#allocation2 + $0xc9] sm:$0xff] %vm1526_vm2, %v1509_v15  ;;  %v2219_v12 = vmul.f32 %v4522_v22, %v4871_v63  ;;  %v2283_v31 = vld [vmem:[#allocation2 + $0xc1] sm:$0xff]  ;;  %v1925_v1 = vmul.f32 %v4453_v27, %v4871_v63 }
 0x129   : > { %v2317_v57 = vmul.f32 %v4527_v3, %v2283_v31  ;;  %v2023_v58 = vmul.f32 %v4491_v16, %v2283_v31  ;;  %2713 = vst.msk [vmem:[#allocation3] sm:$0xff] %vm1526_vm2, %v3506_v19 }
 0x12a   : > { %v2251_v39 = vadd.f32 %v2219_v12, %v2151_v13  ;;  %v1957_v15 = vadd.f32 %v1925_v1, %v1858_v61  ;;  %2714 = vst.msk [vmem:[#allocation3 + $0x8] sm:$0xff] %vm1526_vm2, %v3506_v19 }
 0x12b   : > { %v1410_v36 = vpop.f32.mrf.mxu1  ;;  %v1431_v35 = vpop.f32.mrf.mxu3  ;;  %2715 = vst.msk [vmem:[#allocation3 + $0x10] sm:$0xff] %vm1526_vm2, %v3506_v19 }
 0x12c   : > { %v1478_v42 = vadd.f32 %v4844_v7, %v1410_v36  ;;  %3324 = vmatmul.msk.f32.gmra.mxu0 %vm1526_vm2, %v2446_v41  ;;  %v2349_v21 = vadd.f32 %v2317_v57, %v2251_v39  ;;  %v1485_v54 = vadd.f32 %v4844_v7, %v1431_v35  ;;  %v2055_v13 = vadd.f32 %v2023_v58, %v1957_v15  ;;  %v4951_v57 = vld [vmem:[%s5433_s4 + $0x4] ss:$0 sm:$0xff]  ;;  %v4958_v24 = vpop.f32.mrf.mxu0  ;;  %v4968_v35 = vld [vmem:[%s5433_s4 + $0x8] ss:$0 sm:$0xff] }
 0x12d   : > { %v1664_v36 = vmul.f32 %v4884_v55, %v4871_v63  ;;  %v1730_v41 = vmul.f32 %v4891_v9, %v2283_v31  ;;  %2718 = vst.msk [vmem:[#allocation3 + $0x28] sm:$0xff] %vm1526_vm2, %v3506_v19 }
 0x12e   : > { %v1510_v25 = vmax.f32 %v1478_v42, 0.0  ;;  %v1517_v59 = vmax.f32 %v1485_v54, 0.0  ;;  %2719 = vst.msk [vmem:[#allocation3 + $0x30] sm:$0xff] %vm1526_vm2, %v3506_v19 }
 0x12f   : > { %v2381_v33 = vld [vmem:[#allocation2 + $0xc2] sm:$0xff]  ;;  %2720 = vst.msk [vmem:[#allocation3 + $0x38] sm:$0xff] %vm1526_vm2, %v3506_v19 }
 0x130   : > { %v2185_v11 = vld [vmem:[#allocation2 + $0xc8] sm:$0xff]  ;;  %1598 = vst.msk [vmem:[#allocation2 + $0xd9] sm:$0xff] %vm1526_vm2, %v1510_v25  ;;  %v2415_v38 = vmul.f32 %v4557_v28, %v2381_v33  ;;  %v2121_v12 = vmul.f32 %v4516_v60, %v2381_v33  ;;  %v1762_v25 = vadd.f32 %v1730_v41, %v1664_v36 }
 0x131   : > { %v2220_v0 = vmul.f32 %v4522_v22, %v2185_v11  ;;  %v2284_v20 = vld [vmem:[#allocation2 + $0xc9] sm:$0xff]  ;;  %v1926_v48 = vmul.f32 %v4453_v27, %v2185_v11  ;;  %1605 = vst.msk [vmem:[#allocation2 + $0x129] sm:$0xff] %vm1526_vm2, %v1517_v59 }
 0x132   : > { %v2447_v62 = vadd.f32 %v2415_v38, %v2349_v21  ;;  %v2318_v44 = vmul.f32 %v4527_v3, %v2284_v20  ;;  %v2382_v27 = vld [vmem:[#allocation2 + $0xca] sm:$0xff]  ;;  %v2024_v6 = vmul.f32 %v4491_v16, %v2284_v20  ;;  %v2153_v42 = vadd.f32 %v2121_v12, %v2055_v13  ;;  %2721 = vst.msk [vmem:[#allocation3 + $0x40] sm:$0xff] %vm1526_vm2, %v3506_v19 }
 0x133   : > { %v1413_v51 = vpop.f32.mrf.mxu1  ;;  %v2252_v47 = vadd.f32 %v2220_v0, %v2152_v56  ;;  %v1958_v50 = vadd.f32 %v1926_v48, %v1859_v45  ;;  %v2416_v23 = vmul.f32 %v4557_v28, %v2382_v27  ;;  %v1434_v4 = vpop.f32.mrf.mxu3  ;;  %v1665_v16 = vmul.f32 %v4884_v55, %v2185_v11  ;;  %2722 = vst.msk [vmem:[#allocation3 + $0x48] sm:$0xff] %vm1526_vm2, %v3506_v19  ;;  %v2188_v48 = vld [vmem:[#allocation2 + $0xf0] sm:$0xff]  ;;  %v5017_v41 = vld [vmem:[%s5433_s4 + $0xa] ss:$0 sm:$0xff] }
 0x134   : > { %v1479_v37 = vadd.f32 %v4844_v7, %v1413_v51  ;;  %3325 = vmatmul.msk.f32.gmra.mxu0 %vm1526_vm2, %v2447_v62  ;;  %v1486_v39 = vadd.f32 %v4844_v7, %v1434_v4  ;;  %v1731_v31 = vmul.f32 %v4891_v9, %v2284_v20  ;;  %2723 = vst.msk [vmem:[#allocation3 + $0x50] sm:$0xff] %vm1526_vm2, %v3506_v19  ;;  %v4978_v20 = vld [vmem:[%s5433_s4 + $0x5] ss:$0 sm:$0xff]  ;;  %v5012_v36 = vpop.f32.mrf.mxu0 }
 0x135   : > { %v2350_v53 = vadd.f32 %v2318_v44, %v2252_v47  ;;  %v2056_v43 = vadd.f32 %v2024_v6, %v1958_v50  ;;  %v1829_v61 = vmul.f32 %v4903_v52, %v2382_v27  ;;  %2724 = vst.msk [vmem:[#allocation3 + $0x58] sm:$0xff] %vm1526_vm2, %v3506_v19  ;;  %v4987_v47 = vld [vmem:[%s5433_s4 + $0x6] ss:$0 sm:$0xff]  ;;  %v4998_v44 = vld [vmem:[%s5433_s4 + $0x9] ss:$0 sm:$0xff]  ;;  %v2223_v12 = vmul.f32 %v4968_v35, %v2188_v48  ;;  %v2287_v50 = vld [vmem:[#allocation2 + $0xf1] sm:$0xff] }
 0x136   : > { %v1511_v49 = vmax.f32 %v1479_v37, 0.0  ;;  %v1518_v30 = vmax.f32 %v1486_v39, 0.0  ;;  %v1763_v1 = vadd.f32 %v1731_v31, %v1665_v16  ;;  %2725 = vst.msk [vmem:[#allocation3 + $0x60] sm:$0xff] %vm1526_vm2, %v3506_v19  ;;  %v1929_v39 = vmul.f32 %v4951_v57, %v2188_v48  ;;  %v2385_v16 = vld [vmem:[#allocation2 + $0xf2] sm:$0xff] }
 0x137   : > { %v2186_v29 = vld [vmem:[#allocation2 + $0xd8] sm:$0xff]  ;;  %v2448_v34 = vadd.f32 %v2416_v23, %v2350_v53  ;;  %2726 = vst.msk [vmem:[#allocation3 + $0x68] sm:$0xff] %vm1526_vm2, %v3506_v19 }
 0x138   : > { %1599 = vst.msk [vmem:[#allocation2 + $0xe1] sm:$0xff] %vm1526_vm2, %v1511_v49  ;;  %v2221_v40 = vmul.f32 %v4522_v22, %v2186_v29  ;;  %v1828_v22 = vmul.f32 %v4903_v52, %v2381_v33  ;;  %v2285_v63 = vld [vmem:[#allocation2 + $0xd9] sm:$0xff]  ;;  %v1927_v10 = vmul.f32 %v4951_v57, %v2186_v29  ;;  %v2122_v33 = vmul.f32 %v4516_v60, %v2382_v27 }
 0x139   : > { %v2319_v11 = vmul.f32 %v4527_v3, %v2285_v63  ;;  %1606 = vst.msk [vmem:[#allocation2 + $0x139] sm:$0xff] %vm1526_vm2, %v1518_v30  ;;  %v1861_v15 = vadd.f32 %v1829_v61, %v1763_v1  ;;  %v1666_v59 = vmul.f32 %v4884_v55, %v2186_v29  ;;  %v1732_v27 = vmul.f32 %v4891_v9, %v2285_v63 }
 0x13a   : > { %v2253_v8 = vadd.f32 %v2221_v40, %v2153_v42  ;;  %v1860_v46 = vadd.f32 %v1828_v22, %v1762_v25  ;;  %v2154_v38 = vadd.f32 %v2122_v33, %v2056_v43  ;;  %2727 = vst.msk [vmem:[#allocation3 + $0x70] sm:$0xff] %vm1526_vm2, %v3506_v19  ;;  %v2321_v42 = vmul.f32 %v4998_v44, %v2287_v50  ;;  %v2189_v33 = vld [vmem:[#allocation2 + $0xf8] sm:$0xff] }
 0x13b   : > { %2728 = vst.msk [vmem:[#allocation3 + $0x78] sm:$0xff] %vm1526_vm2, %v3506_v19  ;;  %v1764_v4 = vadd.f32 %v1732_v27, %v1666_v59  ;;  %v5031_v31 = vpop.f32.mrf.mxu3  ;;  %v1668_v61 = vmul.f32 %v4884_v55, %v2188_v48  ;;  %v2190_v27 = vld [vmem:[#allocation2 + $0x108] sm:$0xff]  ;;  %v2386_v48 = vld [vmem:[#allocation2 + $0xfa] sm:$0xff] }
 0x13c   : > { %3326 = vmatmul.msk.f32.gmra.mxu0 %vm1526_vm2, %v2448_v34  ;;  %v2351_v56 = vadd.f32 %v2319_v11, %v2253_v8  ;;  %v1959_v2 = vadd.f32 %v1927_v10, %v1860_v46  ;;  %2729 = vst.msk [vmem:[#allocation3 + $0x80] sm:$0xff] %vm1526_vm2, %v3506_v19  ;;  %v2419_v10 = vmul.f32 %v5017_v41, %v2385_v16 }
 0x13d   : > { %2730 = vst.msk [vmem:[#allocation3 + $0x88] sm:$0xff] %vm1526_vm2, %v3506_v19  ;;  %v2027_v11 = vmul.f32 %v4978_v20, %v2287_v50 }
 0x13e   : > { %2731 = vst.msk [vmem:[#allocation3 + $0x90] sm:$0xff] %vm1526_vm2, %v3506_v19 }
 0x13f   : > { %v2383_v21 = vld [vmem:[#allocation2 + $0xda] sm:$0xff]  ;;  %v2384_v58 = vld [vmem:[#allocation2 + $0xe2] sm:$0xff]  ;;  %2732 = vst.msk [vmem:[#allocation3 + $0x98] sm:$0xff] %vm1526_vm2, %v3506_v19 }
 0x140   : > { %v2187_v0 = vld [vmem:[#allocation2 + $0xe0] sm:$0xff]  ;;  %v2417_v60 = vmul.f32 %v4557_v28, %v2383_v21  ;;  %v2025_v28 = vmul.f32 %v4978_v20, %v2285_v63  ;;  %v2123_v32 = vmul.f32 %v4987_v47, %v2383_v21  ;;  %v1830_v40 = vmul.f32 %v4903_v52, %v2383_v21  ;;  %2733 = vst.msk [vmem:[#allocation3 + $0xa0] sm:$0xff] %vm1526_vm2, %v3506_v19 }
 0x141   : > { %v2222_v3 = vmul.f32 %v4968_v35, %v2187_v0  ;;  %v2286_v62 = vld [vmem:[#allocation2 + $0xe1] sm:$0xff]  ;;  %v1928_v37 = vmul.f32 %v4951_v57, %v2187_v0  ;;  %v2418_v23 = vmul.f32 %v5017_v41, %v2384_v58  ;;  %v1667_v22 = vmul.f32 %v4884_v55, %v2187_v0  ;;  %2734 = vst.msk [vmem:[#allocation3 + $0xa8] sm:$0xff] %vm1526_vm2, %v3506_v19 }
 0x142   : > { %v2449_v54 = vadd.f32 %v2417_v60, %v2351_v56  ;;  %v2320_v45 = vmul.f32 %v4998_v44, %v2286_v62  ;;  %v2057_v49 = vadd.f32 %v2025_v28, %v1959_v2  ;;  %v2026_v6 = vmul.f32 %v4978_v20, %v2286_v62  ;;  %2735 = vst.msk [vmem:[#allocation3 + $0xb0] sm:$0xff] %vm1526_vm2, %v3506_v19  ;;  %v5049_v56 = vld [vmem:[%s5435_s6] ss:$0 sm:$0xff] }
 0x143   : > { %v2254_v51 = vadd.f32 %v2222_v3, %v2154_v38  ;;  %v1960_v13 = vadd.f32 %v1928_v37, %v1861_v15  ;;  %v1733_v34 = vmul.f32 %v4891_v9, %v2286_v62  ;;  %v1862_v30 = vadd.f32 %v1830_v40, %v1764_v4  ;;  %2736 = vst.msk [vmem:[#allocation3 + $0xb8] sm:$0xff] %vm1526_vm2, %v3506_v19  ;;  %v2288_v2 = vld [vmem:[#allocation2 + $0xf9] sm:$0xff]  ;;  %v5065_v59 = vpop.f32.mrf.mxu3 }
 0x144   : > { %3327 = vmatmul.msk.f32.vlgmr.msra.gmra.mxu2 %vm1526_vm2, %v2449_v54  ;;  %v2155_v29 = vadd.f32 %v2123_v32, %v2057_v49  ;;  %v2124_v25 = vmul.f32 %v4987_v47, %v2384_v58  ;;  %v2224_v0 = vmul.f32 %v4968_v35, %v2189_v33  ;;  %2737 = vst.msk [vmem:[#allocation3 + $0xc0] sm:$0xff] %vm1526_vm2, %v3506_v19 }
 0x145   : > { %v2352_v53 = vadd.f32 %v2320_v45, %v2254_v51  ;;  %v2058_v8 = vadd.f32 %v2026_v6, %v1960_v13  ;;  %v1765_v46 = vadd.f32 %v1733_v34, %v1667_v22  ;;  %v1961_v1 = vadd.f32 %v1929_v39, %v1862_v30  ;;  %2738 = vst.msk [vmem:[#allocation3 + $0xc8] sm:$0xff] %vm1526_vm2, %v3506_v19  ;;  %v2289_v6 = vld [vmem:[#allocation2 + $0x109] sm:$0xff] }
 0x146   : > { %v2255_v43 = vadd.f32 %v2223_v12, %v2155_v29  ;;  %v1831_v60 = vmul.f32 %v4903_v52, %v2384_v58  ;;  %v2125_v3 = vmul.f32 %v4987_v47, %v2385_v16  ;;  %2739 = vst.msk [vmem:[#allocation3 + $0xd0] sm:$0xff] %vm1526_vm2, %v3506_v19  ;;  %v1930_v28 = vmul.f32 %v4951_v57, %v2189_v33  ;;  %v5088_v22 = vld [vmem:[#allocation2 + $0x110] sm:$0xff] }
 0x147   : > { %v2450_v63 = vadd.f32 %v2418_v23, %v2352_v53  ;;  %v2156_v38 = vadd.f32 %v2124_v25, %v2058_v8  ;;  %v1734_v54 = vmul.f32 %v4891_v9, %v2287_v50  ;;  %2740 = vst.msk [vmem:[#allocation3 + $0xd8] sm:$0xff] %vm1526_vm2, %v3506_v19  ;;  %v2322_v15 = vmul.f32 %v4998_v44, %v2288_v2 }
 0x148   : > { %v2353_v21 = vadd.f32 %v2321_v42, %v2255_v43  ;;  %v1863_v62 = vadd.f32 %v1831_v60, %v1765_v46  ;;  %v2059_v45 = vadd.f32 %v2027_v11, %v1961_v1  ;;  %2741 = vst.msk [vmem:[#allocation3 + $0xe0] sm:$0xff] %vm1526_vm2, %v3506_v19  ;;  %v2028_v12 = vmul.f32 %v4978_v20, %v2288_v2  ;;  %v2387_v11 = vld [vmem:[#allocation2 + $0x10a] sm:$0xff] }
 0x149   : > { %v2256_v37 = vadd.f32 %v2224_v0, %v2156_v38  ;;  %2742 = vst.msk [vmem:[#allocation3 + $0xe8] sm:$0xff] %vm1526_vm2, %v3506_v19  ;;  %v1766_v53 = vadd.f32 %v1734_v54, %v1668_v61  ;;  %v1832_v29 = vmul.f32 %v4903_v52, %v2385_v16  ;;  %v2420_v13 = vmul.f32 %v5017_v41, %v2386_v48  ;;  %v2290_v38 = vld [vmem:[#allocation2 + $0x111] sm:$0xff] }
 0x14a   : > { %v2451_v32 = vadd.f32 %v2419_v10, %v2353_v21  ;;  %v1962_v58 = vadd.f32 %v1930_v28, %v1863_v62  ;;  %2743 = vst.msk [vmem:[#allocation3 + $0xf0] sm:$0xff] %vm1526_vm2, %v3506_v19  ;;  %v2157_v40 = vadd.f32 %v2125_v3, %v2059_v45  ;;  %v2225_v23 = vmul.f32 %v4968_v35, %v2190_v27  ;;  %v2388_v54 = vld [vmem:[#allocation2 + $0x112] sm:$0xff] }
 0x14b   : > { %v2354_v50 = vadd.f32 %v2322_v15, %v2256_v37  ;;  %2744 = vst.msk [vmem:[#allocation3 + $0xf8] sm:$0xff] %vm1526_vm2, %v3506_v19  ;;  %v2126_v4 = vmul.f32 %v4987_v47, %v2386_v48  ;;  %v1931_v42 = vmul.f32 %v4951_v57, %v2190_v27  ;;  %v1864_v34 = vadd.f32 %v1832_v29, %v1766_v53  ;;  %v1443_v10 = vpop.f32.mrf.mxu3 }
 0x14c   : > { %3328 = vmatmul.msk.f32.gmra.mxu2 %vm1526_vm2, %v2450_v63  ;;  %2745 = vst.msk [vmem:[#allocation3 + $0x100] sm:$0xff] %vm1526_vm2, %v3506_v19  ;;  %v2060_v39 = vadd.f32 %v2028_v12, %v1962_v58  ;;  %v1669_v63 = vmul.f32 %v4884_v55, %v2189_v33  ;;  %v1735_v43 = vmul.f32 %v4891_v9, %v2288_v2 }
 0x14d   : > { %2746 = vst.msk [vmem:[#allocation3 + $0x108] sm:$0xff] %vm1526_vm2, %v3506_v19  ;;  %v2452_v8 = vadd.f32 %v2420_v13, %v2354_v50  ;;  %v2257_v30 = vadd.f32 %v2225_v23, %v2157_v40  ;;  %v2323_v25 = vmul.f32 %v4998_v44, %v2289_v6  ;;  %v2226_v33 = vmul.f32 %v4968_v35, %v5088_v22  ;;  %v2291_v40 = vld [vmem:[#allocation2 + $0x121] sm:$0xff] }
 0x14e   : > { %2747 = vst.msk [vmem:[#allocation3 + $0x110] sm:$0xff] %vm1526_vm2, %v3506_v19  ;;  %v2029_v46 = vmul.f32 %v4978_v20, %v2289_v6  ;;  %v2158_v21 = vadd.f32 %v2126_v4, %v2060_v39  ;;  %v1963_v0 = vadd.f32 %v1931_v42, %v1864_v34  ;;  %v1767_v1 = vadd.f32 %v1735_v43, %v1669_v63 }
 0x14f   : > { %2748 = vst.msk [vmem:[#allocation3 + $0x118] sm:$0xff] %vm1526_vm2, %v3506_v19  ;;  %v1833_v60 = vmul.f32 %v4903_v52, %v2386_v48  ;;  %v2355_v3 = vadd.f32 %v2323_v25, %v2257_v30  ;;  %v2421_v2 = vmul.f32 %v5017_v41, %v2387_v11  ;;  %v2324_v62 = vmul.f32 %v4998_v44, %v2290_v38  ;;  %v2389_v30 = vld [vmem:[#allocation2 + $0x122] sm:$0xff] }
 0x150   : > { %2749 = vst.msk [vmem:[#allocation3 + $0x120] sm:$0xff] %vm1526_vm2, %v3506_v19  ;;  %v2127_v28 = vmul.f32 %v4987_v47, %v2387_v11  ;;  %v2258_v61 = vadd.f32 %v2226_v33, %v2158_v21  ;;  %v1932_v15 = vmul.f32 %v4951_v57, %v5088_v22  ;;  %v1670_v58 = vmul.f32 %v4884_v55, %v2190_v27 }
 0x151   : > { %v2581_v51 = vpop.f32.mrf.mxu0  ;;  %2750 = vst.msk [vmem:[#allocation3 + $0x128] sm:$0xff] %vm1526_vm2, %v3506_v19  ;;  %v1865_v37 = vadd.f32 %v1833_v60, %v1767_v1  ;;  %v1736_v12 = vmul.f32 %v4891_v9, %v2289_v6  ;;  %v1487_v53 = vadd.f32 %v4844_v7, %v5031_v31  ;;  %v2422_v29 = vmul.f32 %v5017_v41, %v2388_v54 }
 0x152   : > { %v2681_v49 = vadd.f32 %v5049_v56, %v2581_v51  ;;  %2751 = vst.msk [vmem:[#allocation3 + $0x130] sm:$0xff] %vm1526_vm2, %v3506_v19  ;;  %v2061_v51 = vadd.f32 %v2029_v46, %v1963_v0  ;;  %v2356_v27 = vadd.f32 %v2324_v62, %v2258_v61  ;;  %v2030_v6 = vmul.f32 %v4978_v20, %v2290_v38 }
 0x153   : > { %2752 = vst.msk [vmem:[#allocation3 + $0x138] sm:$0xff] %vm1526_vm2, %v3506_v19  ;;  %v1964_v23 = vadd.f32 %v1932_v15, %v1865_v37  ;;  %v1768_v31 = vadd.f32 %v1736_v12, %v1670_v58  ;;  %v1834_v4 = vmul.f32 %v4903_v52, %v2387_v11  ;;  %v1519_v42 = vmax.f32 %v1487_v53, 0.0  ;;  %v5153_v11 = vld [vmem:[#allocation2 + $0x128] sm:$0xff] }
 0x154   : > { %3329 = vmatmul.msk.f32.gmra.mxu2 %vm1526_vm2, %v2451_v32  ;;  %2768 = vst.msk [vmem:[#allocation3 + $0x19] sm:$0xff] %vm1526_vm2, %v2681_v49  ;;  %v5119_v32 = vld [vmem:[#allocation2 + $0x120] sm:$0xff]  ;;  %v2453_v49 = vadd.f32 %v2421_v2, %v2355_v3  ;;  %v2159_v13 = vadd.f32 %v2127_v28, %v2061_v51  ;;  %v1488_v39 = vadd.f32 %v4844_v7, %v5065_v59 }
 0x155   : > { %2753 = vst.msk [vmem:[#allocation3 + $0x140] sm:$0xff] %vm1526_vm2, %v3506_v19  ;;  %v2227_v50 = vmul.f32 %v4968_v35, %v5119_v32  ;;  %v2325_v34 = vmul.f32 %v4998_v44, %v2291_v40  ;;  %v2128_v63 = vmul.f32 %v4987_v47, %v2388_v54  ;;  %v2454_v43 = vadd.f32 %v2422_v29, %v2356_v27  ;;  %v2390_v29 = vld [vmem:[#allocation2 + $0x12a] sm:$0xff]  ;;  %v5181_v27 = vld [vmem:[#allocation2 + $0x138] sm:$0xff] }
 0x156   : > { %2754 = vst.msk [vmem:[#allocation3 + $0x148] sm:$0xff] %vm1526_vm2, %v3506_v19  ;;  %v2062_v25 = vadd.f32 %v2030_v6, %v1964_v23  ;;  %v1933_v33 = vmul.f32 %v4951_v57, %v5119_v32  ;;  %v1489_v59 = vadd.f32 %v4844_v7, %v1443_v10  ;;  %v1866_v0 = vadd.f32 %v1834_v4, %v1768_v31  ;;  %v2800_v23 = vld [vmem:[#allocation3] ss:$2 sm:$0xff]  ;;  %v2834_v6 = vld [vmem:[#allocation3 + $0x1] ss:$2 sm:$0xff] }
 0x157   : > { %2755 = vst.msk [vmem:[#allocation3 + $0x150] sm:$0xff] %vm1526_vm2, %v3506_v19  ;;  %v1671_v1 = vmul.f32 %v4884_v55, %v5088_v22  ;;  %v1737_v60 = vmul.f32 %v4891_v9, %v2290_v38  ;;  %v1520_v2 = vmax.f32 %v1488_v39, 0.0  ;;  %v2228_v10 = vmul.f32 %v4968_v35, %v5153_v11  ;;  %v2292_v22 = vld [vmem:[#allocation2 + $0x129] sm:$0xff] }
 0x158   : > { %2756 = vst.msk [vmem:[#allocation3 + $0x158] sm:$0xff] %vm1526_vm2, %v3506_v19  ;;  %v2160_v51 = vadd.f32 %v2128_v63, %v2062_v25  ;;  %v2031_v38 = vmul.f32 %v4978_v20, %v2291_v40  ;;  %v1965_v37 = vadd.f32 %v1933_v33, %v1866_v0  ;;  %v2326_v12 = vmul.f32 %v4998_v44, %v2292_v22 }
 0x159   : > { %v5094_v16 = vpop.f32.mrf.mxu0  ;;  %2757 = vst.msk [vmem:[#allocation3 + $0x160] sm:$0xff] %vm1526_vm2, %v3506_v19  ;;  %v1769_v15 = vadd.f32 %v1737_v60, %v1671_v1  ;;  %v1934_v63 = vmul.f32 %v4951_v57, %v5153_v11  ;;  %v2229_v25 = vmul.f32 %v4968_v35, %v5181_v27  ;;  %v2901_v33 = vmax.f32 %v2800_v23, %v2834_v6 }
 0x15a   : > { %v1446_v48 = vpop.f32.mrf.mxu3  ;;  %2758 = vst.msk [vmem:[#allocation3 + $0x168] sm:$0xff] %vm1526_vm2, %v3506_v19  ;;  %v2682_v3 = vadd.f32 %v5049_v56, %v5094_v16  ;;  %v1521_v16 = vmax.f32 %v1489_v59, 0.0  ;;  %v2260_v4 = vadd.f32 %v2228_v10, %v2160_v51  ;;  %v2063_v39 = vadd.f32 %v2031_v38, %v1965_v37 }
 0x15b   : > { %2759 = vst.msk [vmem:[#allocation3 + $0x170] sm:$0xff] %vm1526_vm2, %v3506_v19  ;;  %v1490_v62 = vadd.f32 %v4844_v7, %v1446_v48  ;;  %v1836_v0 = vmul.f32 %v4903_v52, %v2389_v30  ;;  %v2032_v10 = vmul.f32 %v4978_v20, %v2292_v22  ;;  %v1673_v38 = vmul.f32 %v4884_v55, %v5153_v11 }
 0x15c   : > { %3330 = vmatmul.msk.f32.gmra.mxu2 %vm1526_vm2, %v2452_v8  ;;  %2760 = vst.msk [vmem:[#allocation3 + $0x178] sm:$0xff] %vm1526_vm2, %v3506_v19  ;;  %v2259_v8 = vadd.f32 %v2227_v50, %v2159_v13  ;;  %v2129_v50 = vmul.f32 %v4987_v47, %v2389_v30  ;;  %v1738_v13 = vmul.f32 %v4891_v9, %v2291_v40 }
 0x15d   : > { %2761 = vst.msk [vmem:[#allocation3 + $0x180] sm:$0xff] %vm1526_vm2, %v3506_v19  ;;  %v2424_v40 = vmul.f32 %v5017_v41, %v2390_v29 }
 0x15e   : > { %2762 = vst.msk [vmem:[#allocation3 + $0x188] sm:$0xff] %vm1526_vm2, %v3506_v19  ;;  %v2357_v61 = vadd.f32 %v2325_v34, %v2259_v8 }
 0x15f   : > { %2763 = vst.msk [vmem:[#allocation3 + $0x190] sm:$0xff] %vm1526_vm2, %v3506_v19  ;;  %v2423_v19 = vmul.f32 %v5017_v41, %v2389_v30  ;;  %v1739_v30 = vmul.f32 %v4891_v9, %v2292_v22 }
 0x160   : > { %1607 = vst.msk [vmem:[#allocation2 + $0x141] sm:$0xff] %vm1526_vm2, %v1519_v42 }
 0x161   : > { %v2587_v45 = vpop.f32.mrf.mxu0  ;;  %2769 = vst.msk [vmem:[#allocation3 + $0x21] sm:$0xff] %vm1526_vm2, %v2682_v3  ;;  %v2455_v53 = vadd.f32 %v2423_v19, %v2357_v61  ;;  %v2868_v3 = vld [vmem:[#allocation3 + $0x2] ss:$2 sm:$0xff] }
 0x162   : > { %v2683_v28 = vadd.f32 %v5049_v56, %v2587_v45  ;;  %1608 = vst.msk [vmem:[#allocation2 + $0x151] sm:$0xff] %vm1526_vm2, %v1520_v2  ;;  %v1522_v45 = vmax.f32 %v1490_v62, 0.0  ;;  %v2358_v2 = vadd.f32 %v2326_v12, %v2260_v4  ;;  %v2161_v62 = vadd.f32 %v2129_v50, %v2063_v39 }
 0x163   : > { %1609 = vst.msk [vmem:[#allocation2 + $0x159] sm:$0xff] %vm1526_vm2, %v1521_v16  ;;  %v2918_v16 = vmax.f32 %v2901_v33, %v2868_v3  ;;  %v1837_v39 = vmul.f32 %v4903_v52, %v2390_v29  ;;  %v1674_v3 = vmul.f32 %v4884_v55, %v5181_v27 }
 0x164   : > { %3331 = vmatmul.msk.f32.gmra.mxu2 %vm1526_vm2, %v2453_v49  ;;  %v1835_v49 = vmul.f32 %v4903_v52, %v2388_v54  ;;  %2770 = vst.msk [vmem:[#allocation3 + $0x31] sm:$0xff] %vm1526_vm2, %v2683_v28  ;;  %v1672_v54 = vmul.f32 %v4884_v55, %v5119_v32  ;;  %v2456_v12 = vadd.f32 %v2424_v40, %v2358_v2 }
 0x165   : > { %1610 = vst.msk [vmem:[#allocation2 + $0x169] sm:$0xff] %vm1526_vm2, %v1522_v45 }
 0x166   : > { %v1867_v34 = vadd.f32 %v1835_v49, %v1769_v15  ;;  %v1935_v49 = vmul.f32 %v4951_v57, %v5181_v27 }
 0x167   : > { %v1449_v21 = vpop.f32.mrf.mxu3  ;;  %v2391_v23 = vld [vmem:[#allocation2 + $0x13a] sm:$0xff] }
 0x168   : > { %v1491_v58 = vadd.f32 %v4844_v7, %v1449_v21  ;;  %v1770_v21 = vadd.f32 %v1738_v13, %v1672_v54  ;;  %v2802_v1 = vld [vmem:[#allocation3 + $0x18] ss:$2 sm:$0xff]  ;;  %v2836_v60 = vld [vmem:[#allocation3 + $0x19] ss:$2 sm:$0xff]  ;;  %v1966_v19 = vadd.f32 %v1934_v63, %v1867_v34  ;;  %v2130_v54 = vmul.f32 %v4987_v47, %v2390_v29  ;;  %v2195_v22 = vld [vmem:[#allocation2 + $0x140] sm:$0xff] }
 0x169   : > { %v2590_v46 = vpop.f32.mrf.mxu0  ;;  %v2902_v28 = vmax.f32 %v2802_v1, %v2836_v60  ;;  %v2870_v61 = vld [vmem:[#allocation3 + $0x1a] ss:$2 sm:$0xff]  ;;  %v2425_v40 = vmul.f32 %v5017_v41, %v2391_v23  ;;  %v2230_v33 = vmul.f32 %v4968_v35, %v2195_v22  ;;  %v2294_v29 = vld [vmem:[#allocation2 + $0x141] sm:$0xff]  ;;  %v1936_v1 = vmul.f32 %v4951_v57, %v2195_v22 }
 0x16a   : > { %v2684_v48 = vadd.f32 %v5049_v56, %v2590_v46  ;;  %v1523_v8 = vmax.f32 %v1491_v58, 0.0  ;;  %v2293_v46 = vld [vmem:[#allocation2 + $0x139] sm:$0xff]  ;;  %v1868_v15 = vadd.f32 %v1836_v0, %v1770_v21  ;;  %v2064_v50 = vadd.f32 %v2032_v10, %v1966_v19 }
 0x16b   : > { %v2327_v51 = vmul.f32 %v4998_v44, %v2293_v46  ;;  %v2919_v37 = vmax.f32 %v2902_v28, %v2870_v61  ;;  %v2033_v4 = vmul.f32 %v4978_v20, %v2293_v46  ;;  %v1740_v2 = vmul.f32 %v4891_v9, %v2293_v46 }
 0x16c   : > { %3332 = vmatmul.msk.f32.gmra.mxu2 %vm1526_vm2, %v2454_v43  ;;  %2771 = vst.msk [vmem:[#allocation3 + $0x39] sm:$0xff] %vm1526_vm2, %v2684_v48  ;;  %v2328_v28 = vmul.f32 %v4998_v44, %v2294_v29  ;;  %v2131_v61 = vmul.f32 %v4987_v47, %v2391_v23  ;;  %v1838_v46 = vmul.f32 %v4903_v52, %v2391_v23 }
 0x16d   : > { %1611 = vst.msk [vmem:[#allocation2 + $0x171] sm:$0xff] %vm1526_vm2, %v1523_v8  ;;  %v2935_v34 = vmax.f32 %v2918_v16, %v2919_v37  ;;  %v1967_v8 = vadd.f32 %v1935_v49, %v1868_v15  ;;  %v2034_v37 = vmul.f32 %v4978_v20, %v2294_v29  ;;  %v1772_v27 = vadd.f32 %v1740_v2, %v1674_v3  ;;  %v2394_v3 = vld [vmem:[#allocation2 + $0x15a] sm:$0xff] }
 0x16e   : > { %v1741_v23 = vmul.f32 %v4891_v9, %v2294_v29 }
 0x16f   : > { %v1452_v42 = vpop.f32.mrf.mxu3 }
 0x170   : > { %v1492_v32 = vadd.f32 %v4844_v7, %v1452_v42  ;;  %v1771_v42 = vadd.f32 %v1739_v30, %v1673_v38  ;;  %v2392_v30 = vld [vmem:[#allocation2 + $0x142] sm:$0xff] }
 0x171   : > { %v2593_v31 = vpop.f32.mrf.mxu0  ;;  %v2426_v49 = vmul.f32 %v5017_v41, %v2392_v30 }
 0x172   : > { %v2685_v43 = vadd.f32 %v5049_v56, %v2593_v31  ;;  %v1524_v59 = vmax.f32 %v1492_v32, 0.0  ;;  %v1869_v0 = vadd.f32 %v1837_v39, %v1771_v42 }
 0x173   : > { %v2804_v48 = vld [vmem:[#allocation3 + $0x30] ss:$2 sm:$0xff]  ;;  %v2838_v58 = vld [vmem:[#allocation3 + $0x31] ss:$2 sm:$0xff] }
 0x174   : > { %3333 = vmatmul.msk.f32.gmra.mxu2 %vm1526_vm2, %v2455_v53  ;;  %2772 = vst.msk [vmem:[#allocation3 + $0x49] sm:$0xff] %vm1526_vm2, %v2685_v43  ;;  %v2261_v53 = vadd.f32 %v2229_v25, %v2161_v62  ;;  %v2903_v13 = vmax.f32 %v2804_v48, %v2838_v58  ;;  %v2872_v6 = vld [vmem:[#allocation3 + $0x32] ss:$2 sm:$0xff]  ;;  %v2162_v25 = vadd.f32 %v2130_v54, %v2064_v50  ;;  %v5243_v50 = vld [vmem:[#allocation2 + $0x158] sm:$0xff] }
 0x175   : > { %1612 = vst.msk [vmem:[#allocation2 + $0x181] sm:$0xff] %vm1526_vm2, %v1524_v59  ;;  %v1968_v16 = vadd.f32 %v1936_v1, %v1869_v0  ;;  %v1870_v54 = vadd.f32 %v1838_v46, %v1772_v27 }
 0x176   : > { %v5213_v63 = vmax.f32 %v2903_v13, %v2872_v6  ;;  %v2359_v32 = vadd.f32 %v2327_v51, %v2261_v53  ;;  %v2262_v10 = vadd.f32 %v2230_v33, %v2162_v25  ;;  %v2132_v53 = vmul.f32 %v4987_v47, %v2392_v30 }
 0x178   : > { %v2943_v59 = vmax.f32 %v2935_v34, %v5213_v63  ;;  %v2457_v19 = vadd.f32 %v2425_v40, %v2359_v32  ;;  %v2360_v15 = vadd.f32 %v2328_v28, %v2262_v10  ;;  %v2393_v34 = vld [vmem:[#allocation2 + $0x152] sm:$0xff]  ;;  %v2232_v40 = vmul.f32 %v4968_v35, %v5243_v50 }
 0x179   : > { %v2596_v45 = vpop.f32.mrf.mxu0  ;;  %v1455_v31 = vpop.f32.mrf.mxu3  ;;  %v2427_v0 = vmul.f32 %v5017_v41, %v2393_v34  ;;  %v1938_v28 = vmul.f32 %v4951_v57, %v5243_v50 }
 0x17a   : > { %v2686_v11 = vadd.f32 %v5049_v56, %v2596_v45  ;;  %v1493_v43 = vadd.f32 %v4844_v7, %v1455_v31  ;;  %v2951_v60 = vadd.f32 %v2943_v59, %v4877_v5  ;;  %v2065_v7 = vadd.f32 %v2033_v4, %v1967_v8  ;;  %v2196_v5 = vld [vmem:[#allocation2 + $0x150] sm:$0xff] }
 0x17b   : > { %v2231_v58 = vmul.f32 %v4968_v35, %v2196_v5  ;;  %v2295_v45 = vld [vmem:[#allocation2 + $0x151] sm:$0xff]  ;;  %v1937_v13 = vmul.f32 %v4951_v57, %v2196_v5  ;;  %v2458_v31 = vadd.f32 %v2426_v49, %v2360_v15 }
 0x17c   : > { %3334 = vmatmul.msk.f32.gmra.mxu2 %vm1526_vm2, %v2456_v12  ;;  %2773 = vst.msk [vmem:[#allocation3 + $0x51] sm:$0xff] %vm1526_vm2, %v2686_v11  ;;  %v1525_v21 = vmax.f32 %v1493_v43, 0.0  ;;  %v2959_v51 = vmax.f32 %v2951_v60, 0.0  ;;  %v2163_v48 = vadd.f32 %v2131_v61, %v2065_v7  ;;  %v2066_v12 = vadd.f32 %v2034_v37, %v1968_v16 }
 0x17d   : > { %v1675_v11 = vmul.f32 %v4884_v55, %v2195_v22  ;;  %v2329_v42 = vmul.f32 %v4998_v44, %v2295_v45  ;;  %v2296_v22 = vld [vmem:[#allocation2 + $0x159] sm:$0xff]  ;;  %v1969_v25 = vadd.f32 %v1937_v13, %v1870_v54  ;;  %v2035_v33 = vmul.f32 %v4978_v20, %v2295_v45 }
 0x17e   : > { %1613 = vst.msk [vmem:[#allocation2 + $0x189] sm:$0xff] %vm1526_vm2, %v1525_v21  ;;  %v2263_v4 = vadd.f32 %v2231_v58, %v2163_v48  ;;  %v2164_v32 = vadd.f32 %v2132_v53, %v2066_v12  ;;  %v1839_v21 = vmul.f32 %v4903_v52, %v2392_v30  ;;  %v2330_v7 = vmul.f32 %v4998_v44, %v2296_v22 }
 0x17f   : > { %2967 = vst.msk [vmem:[%s5238_s21] sm:$0xff] %vm1526_vm2, %v2959_v51  ;;  %v1773_v59 = vadd.f32 %v1741_v23, %v1675_v11  ;;  %v2067_v2 = vadd.f32 %v2035_v33, %v1969_v25  ;;  %v1676_v30 = vmul.f32 %v4884_v55, %v2196_v5  ;;  %v1742_v16 = vmul.f32 %v4891_v9, %v2295_v45  ;;  %v2297_v5 = vld [vmem:[#allocation2 + $0x169] sm:$0xff] }
 0x180   : > { %v2361_v29 = vadd.f32 %v2329_v42, %v2263_v4  ;;  %v2264_v60 = vadd.f32 %v2232_v40, %v2164_v32  ;;  %v2428_v48 = vmul.f32 %v5017_v41, %v2394_v3  ;;  %v2036_v45 = vmul.f32 %v4978_v20, %v2296_v22  ;;  %v2395_v32 = vld [vmem:[#allocation2 + $0x16a] sm:$0xff] }
 0x181   : > { %v2599_v62 = vpop.f32.mrf.mxu0  ;;  %v1871_v10 = vadd.f32 %v1839_v21, %v1773_v59  ;;  %v1774_v11 = vadd.f32 %v1742_v16, %v1676_v30  ;;  %v1840_v23 = vmul.f32 %v4903_v52, %v2393_v34  ;;  %v2331_v4 = vmul.f32 %v4998_v44, %v2297_v5  ;;  %v2199_v33 = vld [vmem:[#allocation2 + $0x170] sm:$0xff] }
 0x182   : > { %v2687_v38 = vadd.f32 %v5049_v56, %v2599_v62  ;;  %v2133_v62 = vmul.f32 %v4987_v47, %v2393_v34  ;;  %v2362_v49 = vadd.f32 %v2330_v7, %v2264_v60  ;;  %v2134_v42 = vmul.f32 %v4987_v47, %v2394_v3 }
 0x183   : > { %v2806_v43 = vld [vmem:[#allocation3 + $0x48] ss:$2 sm:$0xff]  ;;  %v2840_v8 = vld [vmem:[#allocation3 + $0x49] ss:$2 sm:$0xff]  ;;  %v1970_v54 = vadd.f32 %v1938_v28, %v1871_v10  ;;  %v1872_v59 = vadd.f32 %v1840_v23, %v1774_v11  ;;  %v1743_v21 = vmul.f32 %v4891_v9, %v2296_v22  ;;  %v2037_v28 = vmul.f32 %v4978_v20, %v2297_v5 }
 0x184   : > { %3335 = vmatmul.msk.f32.gmra.mxu2 %vm1526_vm2, %v2457_v19  ;;  %2774 = vst.msk [vmem:[#allocation3 + $0x61] sm:$0xff] %vm1526_vm2, %v2687_v38  ;;  %v2904_v1 = vmax.f32 %v2806_v43, %v2840_v8  ;;  %v5259_v19 = vld [vmem:[#allocation2 + $0x168] sm:$0xff]  ;;  %v2459_v38 = vadd.f32 %v2427_v0, %v2361_v29  ;;  %v2165_v53 = vadd.f32 %v2133_v62, %v2067_v2  ;;  %v2298_v10 = vld [vmem:[#allocation2 + $0x171] sm:$0xff] }
 0x185   : > { %v2874_v61 = vld [vmem:[#allocation3 + $0x4a] ss:$2 sm:$0xff]  ;;  %v2233_v58 = vmul.f32 %v4968_v35, %v5259_v19  ;;  %v2460_v43 = vadd.f32 %v2428_v48, %v2362_v49  ;;  %v2068_v40 = vadd.f32 %v2036_v45, %v1970_v54  ;;  %v1939_v34 = vmul.f32 %v4951_v57, %v5259_v19 }
 0x186   : > { %v2921_v37 = vmax.f32 %v2904_v1, %v2874_v61  ;;  %v2429_v1 = vmul.f32 %v5017_v41, %v2395_v32  ;;  %v2234_v62 = vmul.f32 %v4968_v35, %v2199_v33  ;;  %v2332_v61 = vmul.f32 %v4998_v44, %v2298_v10  ;;  %v2299_v54 = vld [vmem:[#allocation2 + $0x181] sm:$0xff] }
 0x187   : > { %v2265_v8 = vadd.f32 %v2233_v58, %v2165_v53  ;;  %v2166_v2 = vadd.f32 %v2134_v42, %v2068_v40  ;;  %v2135_v30 = vmul.f32 %v4987_v47, %v2395_v32  ;;  %v1940_v16 = vmul.f32 %v4951_v57, %v2199_v33  ;;  %v2397_v40 = vld [vmem:[#allocation2 + $0x182] sm:$0xff] }
 0x188   : > { %v1678_v48 = vmul.f32 %v4884_v55, %v5259_v19  ;;  %v2038_v45 = vmul.f32 %v4978_v20, %v2298_v10 }
 0x189   : > { %v2602_v6 = vpop.f32.mrf.mxu0  ;;  %v2363_v7 = vadd.f32 %v2331_v4, %v2265_v8  ;;  %v3437_v4 = vld [vmem:[%s5433_s4] ss:$0 sm:$0xff] }
 0x18a   : > { %v2688_v39 = vadd.f32 %v5049_v56, %v2602_v6  ;;  %v2936_v6 = vmax.f32 %v5213_v63, %v2921_v37  ;;  %v1677_v63 = vmul.f32 %v4884_v55, %v5243_v50  ;;  %v1971_v50 = vadd.f32 %v1939_v34, %v1872_v59  ;;  %v2201_v59 = vld [vmem:[#allocation2 + $0x188] sm:$0xff] }
 0x18b   : > { %v1679_v42 = vmul.f32 %v3437_v4, %v2199_v33  ;;  %v2431_v33 = vmul.f32 %v5017_v41, %v2397_v40 }
 0x18c   : > { %3336 = vmatmul.msk.f32.gmra.mxu2 %vm1526_vm2, %v2458_v31  ;;  %2775 = vst.msk [vmem:[#allocation3 + $0x69] sm:$0xff] %vm1526_vm2, %v2688_v39  ;;  %v1775_v22 = vadd.f32 %v1743_v21, %v1677_v63 }
 0x191   : > { %v2605_v51 = vpop.f32.mrf.mxu0 }
 0x192   : > { %v2689_v27 = vadd.f32 %v5049_v56, %v2605_v51  ;;  %v2461_v51 = vadd.f32 %v2429_v1, %v2363_v7  ;;  %v2039_v1 = vmul.f32 %v4978_v20, %v2299_v54 }
 0x193   : > { %v2808_v46 = vld [vmem:[#allocation3 + $0x60] ss:$2 sm:$0xff]  ;;  %v2842_v15 = vld [vmem:[#allocation3 + $0x61] ss:$2 sm:$0xff] }
 0x194   : > { %3337 = vmatmul.msk.f32.gmra.mxu2 %vm1526_vm2, %v2459_v38  ;;  %v2905_v12 = vmax.f32 %v2808_v46, %v2842_v15  ;;  %2776 = vst.msk [vmem:[#allocation3 + $0x79] sm:$0xff] %vm1526_vm2, %v2689_v27  ;;  %v2876_v13 = vld [vmem:[#allocation3 + $0x62] ss:$2 sm:$0xff]  ;;  %v2266_v38 = vadd.f32 %v2234_v62, %v2166_v2  ;;  %v2069_v46 = vadd.f32 %v2037_v28, %v1971_v50 }
 0x195   : > { %v2396_v27 = vld [vmem:[#allocation2 + $0x172] sm:$0xff]  ;;  %v2200_v15 = vld [vmem:[#allocation2 + $0x180] sm:$0xff] }
 0x196   : > { %v5274_v31 = vmax.f32 %v2905_v12, %v2876_v13  ;;  %v2430_v12 = vmul.f32 %v5017_v41, %v2396_v27  ;;  %v2235_v53 = vmul.f32 %v4968_v35, %v2200_v15  ;;  %v1842_v13 = vmul.f32 %v4903_v52, %v2395_v32 }
 0x197   : > { %v2364_v11 = vadd.f32 %v2332_v61, %v2266_v38  ;;  %v2167_v23 = vadd.f32 %v2135_v30, %v2069_v46  ;;  %v2137_v61 = vmul.f32 %v4987_v47, %v2397_v40  ;;  %v2398_v46 = vld [vmem:[#allocation2 + $0x18a] sm:$0xff]  ;;  %v2399_v40 = vld [vmem:[#allocation2 + $0x19a] sm:$0xff] }
 0x198   : > { %v2944_v39 = vmax.f32 %v2936_v6, %v5274_v31  ;;  %v1941_v6 = vmul.f32 %v4951_v57, %v2200_v15  ;;  %v2138_v4 = vmul.f32 %v4987_v47, %v2398_v46 }
 0x199   : > { %v2608_v25 = vpop.f32.mrf.mxu0  ;;  %v2462_v8 = vadd.f32 %v2430_v12, %v2364_v11  ;;  %v2267_v32 = vadd.f32 %v2235_v53, %v2167_v23 }
 0x19a   : > { %v2952_v29 = vadd.f32 %v2944_v39, %v4916_v14  ;;  %v2690_v0 = vadd.f32 %v5049_v56, %v2608_v25  ;;  %v1841_v14 = vmul.f32 %v4903_v52, %v2394_v3  ;;  %v1744_v3 = vmul.f32 %v4891_v9, %v2297_v5  ;;  %v3438_v39 = vld [vmem:[%s5433_s4 + $0x1] ss:$0 sm:$0xff] }
 0x19b   : > { %v2333_v9 = vmul.f32 %v4998_v44, %v2299_v54  ;;  %v2136_v5 = vmul.f32 %v4987_v47, %v2396_v27  ;;  %v1745_v52 = vmul.f32 %v3438_v39, %v2298_v10  ;;  %v2300_v10 = vld [vmem:[#allocation2 + $0x189] sm:$0xff]  ;;  %v2433_v47 = vmul.f32 %v5017_v41, %v2399_v40 }
 0x19c   : > { %3338 = vmatmul.msk.f32.gmra.mxu2 %vm1526_vm2, %v2460_v43  ;;  %v2960_v60 = vmax.f32 %v2952_v29, 0.0  ;;  %2777 = vst.msk [vmem:[#allocation3 + $0x81] sm:$0xff] %vm1526_vm2, %v2690_v0  ;;  %v1873_v49 = vadd.f32 %v1841_v14, %v1775_v22  ;;  %v1776_v19 = vadd.f32 %v1744_v3, %v1678_v48  ;;  %v2236_v0 = vmul.f32 %v4968_v35, %v2201_v59  ;;  %v2202_v3 = vld [vmem:[#allocation2 + $0x198] sm:$0xff] }
 0x19d   : > { %v2365_v2 = vadd.f32 %v2333_v9, %v2267_v32  ;;  %v1777_v28 = vadd.f32 %v1745_v52, %v1679_v42  ;;  %v2334_v14 = vmul.f32 %v4998_v44, %v2300_v10  ;;  %v2040_v54 = vmul.f32 %v4978_v20, %v2300_v10 }
 0x19e   : > { %2968 = vst.msk [vmem:[%s5238_s21 + $0x8] sm:$0xff] %vm1526_vm2, %v2960_v60  ;;  %v1972_v55 = vadd.f32 %v1940_v16, %v1873_v49  ;;  %v1874_v34 = vadd.f32 %v1842_v13, %v1776_v19  ;;  %v3439_v60 = vld [vmem:[%s5433_s4 + $0x2] ss:$0 sm:$0xff]  ;;  %v2237_v23 = vmul.f32 %v4968_v35, %v2202_v3 }
 0x19f   : > { %v1843_v7 = vmul.f32 %v3439_v60, %v2396_v27  ;;  %v2463_v16 = vadd.f32 %v2431_v33, %v2365_v2 }
 0x1a0   : > { %v2070_v25 = vadd.f32 %v2038_v45, %v1972_v55  ;;  %v1973_v50 = vadd.f32 %v1941_v6, %v1874_v34 }
 0x1a1   : > { %v2611_v37 = vpop.f32.mrf.mxu0  ;;  %v1875_v49 = vadd.f32 %v1843_v7, %v1777_v28 }
 0x1a2   : > { %v2691_v58 = vadd.f32 %v5049_v56, %v2611_v37  ;;  %v2168_v62 = vadd.f32 %v2136_v5, %v2070_v25  ;;  %v2071_v15 = vadd.f32 %v2039_v1, %v1973_v50  ;;  %v2301_v5 = vld [vmem:[#allocation2 + $0x199] sm:$0xff] }
 0x1a3   : > { %v2810_v21 = vld [vmem:[#allocation3 + $0x78] ss:$2 sm:$0xff]  ;;  %v2844_v29 = vld [vmem:[#allocation3 + $0x79] ss:$2 sm:$0xff]  ;;  %v2203_v25 = vld [vmem:[#allocation2 + $0x1a0] sm:$0xff] }
 0x1a4   : > { %3339 = vmatmul.msk.f32.gmra.mxu2 %vm1526_vm2, %v2461_v51  ;;  %2778 = vst.msk [vmem:[#allocation3 + $0x91] sm:$0xff] %vm1526_vm2, %v2691_v58  ;;  %v2906_v22 = vmax.f32 %v2810_v21, %v2844_v29  ;;  %v1942_v51 = vmul.f32 %v4951_v57, %v2201_v59  ;;  %v2878_v38 = vld [vmem:[#allocation3 + $0x7a] ss:$2 sm:$0xff]  ;;  %v2268_v37 = vadd.f32 %v2236_v0, %v2168_v62  ;;  %v2302_v21 = vld [vmem:[#allocation2 + $0x1a1] sm:$0xff] }
 0x1a5   : > { %v2432_v57 = vmul.f32 %v5017_v41, %v2398_v46  ;;  %v2169_v11 = vadd.f32 %v2137_v61, %v2071_v15  ;;  %v2336_v33 = vmul.f32 %v4998_v44, %v2302_v21  ;;  %v2400_v0 = vld [vmem:[#allocation2 + $0x1a2] sm:$0xff] }
 0x1a6   : > { %v2923_v27 = vmax.f32 %v2906_v22, %v2878_v38  ;;  %v2366_v13 = vadd.f32 %v2334_v14, %v2268_v37  ;;  %v1974_v55 = vadd.f32 %v1942_v51, %v1875_v49  ;;  %v2434_v60 = vmul.f32 %v5017_v41, %v2400_v0 }
 0x1a7   : > { %v2269_v52 = vadd.f32 %v2237_v23, %v2169_v11 }
 0x1a8   : > { %v2937_v19 = vmax.f32 %v5274_v31, %v2923_v27  ;;  %v2464_v39 = vadd.f32 %v2432_v57, %v2366_v13  ;;  %v2072_v20 = vadd.f32 %v2040_v54, %v1974_v55 }
 0x1a9   : > { %v2614_v43 = vpop.f32.mrf.mxu0 }
 0x1aa   : > { %v2692_v63 = vadd.f32 %v5049_v56, %v2614_v43  ;;  %v2335_v43 = vmul.f32 %v4998_v44, %v2301_v5  ;;  %v2170_v34 = vadd.f32 %v2138_v4, %v2072_v20 }
 0x1ac   : > { %3340 = vmatmul.msk.f32.gmra.mxu2 %vm1526_vm2, %v2462_v8  ;;  %2779 = vst.msk [vmem:[#allocation3 + $0x99] sm:$0xff] %vm1526_vm2, %v2692_v63  ;;  %v2367_v59 = vadd.f32 %v2335_v43, %v2269_v52  ;;  %v2238_v63 = vmul.f32 %v4968_v35, %v2203_v25  ;;  %v5444_v43 = vld [vmem:[#allocation8_spill] sm:$0xff] }
 0x1ae   : > { %v2465_v29 = vadd.f32 %v2433_v47, %v2367_v59 }
 0x1b1   : > { %v2617_v30 = vpop.f32.mrf.mxu0 }
 0x1b2   : > { %v2693_v48 = vadd.f32 %v5049_v56, %v2617_v30 }
 0x1b3   : > { %v2812_v58 = vld [vmem:[#allocation3 + $0x90] ss:$2 sm:$0xff]  ;;  %v2846_v12 = vld [vmem:[#allocation3 + $0x91] ss:$2 sm:$0xff] }
 0x1b4   : > { %3341 = vmatmul.msk.f32.gmra.mxu2 %vm1526_vm2, %v2463_v16  ;;  %v2907_v53 = vmax.f32 %v2812_v58, %v2846_v12  ;;  %2780 = vst.msk [vmem:[#allocation3 + $0xa9] sm:$0xff] %vm1526_vm2, %v2693_v48  ;;  %v2880_v45 = vld [vmem:[#allocation3 + $0x92] ss:$2 sm:$0xff] }
 0x1b6   : > { %v2924_v9 = vmax.f32 %v2907_v53, %v2880_v45 }
 0x1b8   : > { %v2945_v6 = vmax.f32 %v2937_v19, %v2924_v9 }
 0x1b9   : > { %v2620_v42 = vpop.f32.mrf.mxu0 }
 0x1ba   : > { %v2953_v8 = vadd.f32 %v2945_v6, %v4958_v24  ;;  %v2694_v32 = vadd.f32 %v5049_v56, %v2620_v42  ;;  %v2270_v24 = vadd.f32 %v2238_v63, %v2170_v34 }
 0x1bc   : > { %3342 = vmatmul.msk.f32.gmra.mxu2 %vm1526_vm2, %v2464_v39  ;;  %v2961_v31 = vmax.f32 %v2953_v8, 0.0  ;;  %2781 = vst.msk [vmem:[#allocation3 + $0xb1] sm:$0xff] %vm1526_vm2, %v2694_v32  ;;  %v2368_v1 = vadd.f32 %v2336_v33, %v2270_v24  ;;  %v3440_v33 = vld [vmem:[%s5435_s6] ss:$0 sm:$0xff] }
 0x1be   : > { %2969 = vst.msk [vmem:[%s5238_s21 + $0x10] sm:$0xff] %vm1526_vm2, %v2961_v31  ;;  %v2466_v62 = vadd.f32 %v2434_v60, %v2368_v1 }
 0x1c3   : > { %v2814_v50 = vld [vmem:[#allocation3 + $0xa8] ss:$2 sm:$0xff]  ;;  %v2848_v28 = vld [vmem:[#allocation3 + $0xa9] ss:$2 sm:$0xff] }
 0x1c4   : > { %3343 = vmatmul.msk.f32.gmra.mxu2 %vm1526_vm2, %v2465_v29  ;;  %v2908_v44 = vmax.f32 %v2814_v50, %v2848_v28  ;;  %v2882_v22 = vld [vmem:[#allocation3 + $0xaa] ss:$2 sm:$0xff] }
 0x1c6   : > { %v2925_v41 = vmax.f32 %v2908_v44, %v2882_v22 }
 0x1c7   : > { %v2623_v7 = vpop.f32.mrf.mxu2 }
 0x1c8   : > { %v2695_v2 = vadd.f32 %v5049_v56, %v2623_v7  ;;  %v2938_v37 = vmax.f32 %v2924_v9, %v2925_v41 }
 0x1ca   : > { %2782 = vst.msk [vmem:[#allocation3 + $0xc1] sm:$0xff] %vm1526_vm2, %v2695_v2 }
 0x1cc   : > { %3344 = vmatmul.msk.f32.gmra.mxu2 %vm1526_vm2, %v2466_v62 }
 0x1cf   : > { %v2626_v35 = vpop.f32.mrf.mxu2 }
 0x1d0   : > { %v2696_v10 = vadd.f32 %v5049_v56, %v2626_v35 }
 0x1d2   : > { %2783 = vst.msk [vmem:[#allocation3 + $0xc9] sm:$0xff] %vm1526_vm2, %v2696_v10 }
 0x1d7   : > { %v2629_v14 = vpop.f32.mrf.mxu2 }
 0x1d8   : > { %v2697_v61 = vadd.f32 %v5049_v56, %v2629_v14 }
 0x1d9   : > { %v2816_v51 = vld [vmem:[#allocation3 + $0xc0] ss:$2 sm:$0xff]  ;;  %v2850_v38 = vld [vmem:[#allocation3 + $0xc1] ss:$2 sm:$0xff] }
 0x1da   : > { %v2909_v30 = vmax.f32 %v2816_v51, %v2850_v38  ;;  %2784 = vst.msk [vmem:[#allocation3 + $0xd9] sm:$0xff] %vm1526_vm2, %v2697_v61  ;;  %v2884_v16 = vld [vmem:[#allocation3 + $0xc2] ss:$2 sm:$0xff] }
 0x1dc   : > { %v2926_v46 = vmax.f32 %v2909_v30, %v2884_v16 }
 0x1de   : > { %v2946_v15 = vmax.f32 %v2938_v37, %v2926_v46 }
 0x1df   : > { %v2632_v49 = vpop.f32.mrf.mxu2 }
 0x1e0   : > { %v2954_v27 = vadd.f32 %v2946_v15, %v5012_v36  ;;  %v2698_v48 = vadd.f32 %v5049_v56, %v2632_v49 }
 0x1e2   : > { %v2962_v3 = vmax.f32 %v2954_v27, 0.0  ;;  %2785 = vst.msk [vmem:[#allocation3 + $0xe1] sm:$0xff] %vm1526_vm2, %v2698_v48 }
 0x1e4   : > { %2970 = vst.msk [vmem:[%s5238_s21 + $0x18] sm:$0xff] %vm1526_vm2, %v2962_v3 }
 0x1e7   : > { %v2635_v58 = vpop.f32.mrf.mxu2 }
 0x1e8   : > { %v2699_v12 = vadd.f32 %v5049_v56, %v2635_v58 }
 0x1e9   : > { %v2818_v54 = vld [vmem:[#allocation3 + $0xd8] ss:$2 sm:$0xff]  ;;  %v2852_v45 = vld [vmem:[#allocation3 + $0xd9] ss:$2 sm:$0xff] }
 0x1ea   : > { %2786 = vst.msk [vmem:[#allocation3 + $0xf1] sm:$0xff] %vm1526_vm2, %v2699_v12  ;;  %v2910_v36 = vmax.f32 %v2818_v54, %v2852_v45  ;;  %v2886_v13 = vld [vmem:[#allocation3 + $0xda] ss:$2 sm:$0xff] }
 0x1ec   : > { %v2927_v23 = vmax.f32 %v2910_v36, %v2886_v13 }
 0x1ee   : > { %v2939_v4 = vmax.f32 %v2926_v46, %v2927_v23 }
 0x1ef   : > { %v2638_v53 = vpop.f32.mrf.mxu2 }
 0x1f0   : > { %v2700_v57 = vadd.f32 %v5049_v56, %v2638_v53 }
 0x1f2   : > { %2787 = vst.msk [vmem:[#allocation3 + $0xf9] sm:$0xff] %vm1526_vm2, %v2700_v57 }
 0x1f7   : > { %v2641_v11 = vpop.f32.mrf.mxu2 }
 0x1f8   : > { %v2701_v55 = vadd.f32 %v5049_v56, %v2641_v11 }
 0x1f9   : > { %v2820_v19 = vld [vmem:[#allocation3 + $0xf0] ss:$2 sm:$0xff]  ;;  %v2854_v9 = vld [vmem:[#allocation3 + $0xf1] ss:$2 sm:$0xff] }
 0x1fa   : > { %v2911_v5 = vmax.f32 %v2820_v19, %v2854_v9  ;;  %2788 = vst.msk [vmem:[#allocation3 + $0x109] sm:$0xff] %vm1526_vm2, %v2701_v55  ;;  %v2888_v6 = vld [vmem:[#allocation3 + $0xf2] ss:$2 sm:$0xff] }
 0x1fc   : > { %v2928_v42 = vmax.f32 %v2911_v5, %v2888_v6 }
 0x1fe   : > { %v2947_v39 = vmax.f32 %v2939_v4, %v2928_v42 }
 0x1ff   : > { %v2644_v52 = vpop.f32.mrf.mxu2 }
 0x200   : > { %v2955_v20 = vadd.f32 %v2947_v39, %v5444_v43  ;;  %v2702_v8 = vadd.f32 %v5049_v56, %v2644_v52 }
 0x202   : > { %v2963_v32 = vmax.f32 %v2955_v20, 0.0  ;;  %2789 = vst.msk [vmem:[#allocation3 + $0x111] sm:$0xff] %vm1526_vm2, %v2702_v8 }
 0x204   : > { %2971 = vst.msk [vmem:[%s5238_s21 + $0x20] sm:$0xff] %vm1526_vm2, %v2963_v32 }
 0x207   : > { %v2647_v40 = vpop.f32.mrf.mxu2 }
 0x208   : > { %v2703_v25 = vadd.f32 %v5049_v56, %v2647_v40 }
 0x209   : > { %v2822_v47 = vld [vmem:[#allocation3 + $0x108] ss:$2 sm:$0xff]  ;;  %v2856_v34 = vld [vmem:[#allocation3 + $0x109] ss:$2 sm:$0xff] }
 0x20a   : > { %2790 = vst.msk [vmem:[#allocation3 + $0x121] sm:$0xff] %vm1526_vm2, %v2703_v25  ;;  %v2912_v63 = vmax.f32 %v2822_v47, %v2856_v34  ;;  %v2890_v21 = vld [vmem:[#allocation3 + $0x10a] ss:$2 sm:$0xff] }
 0x20c   : > { %v2929_v24 = vmax.f32 %v2912_v63, %v2890_v21 }
 0x20e   : > { %v2940_v2 = vmax.f32 %v2928_v42, %v2929_v24 }
 0x20f   : > { %v2650_v31 = vpop.f32.mrf.mxu2 }
 0x210   : > { %v2704_v59 = vadd.f32 %v5049_v56, %v2650_v31 }
 0x212   : > { %2791 = vst.msk [vmem:[#allocation3 + $0x129] sm:$0xff] %vm1526_vm2, %v2704_v59 }
 0x217   : > { %v2653_v29 = vpop.f32.mrf.mxu2 }
 0x218   : > { %v2705_v0 = vadd.f32 %v3440_v33, %v2653_v29 }
 0x219   : > { %v2824_v1 = vld [vmem:[#allocation3 + $0x120] ss:$2 sm:$0xff]  ;;  %v2858_v60 = vld [vmem:[#allocation3 + $0x121] ss:$2 sm:$0xff] }
 0x21a   : > { %v2913_v7 = vmax.f32 %v2824_v1, %v2858_v60  ;;  %2792 = vst.msk [vmem:[#allocation3 + $0x139] sm:$0xff] %vm1526_vm2, %v2705_v0  ;;  %v2892_v56 = vld [vmem:[#allocation3 + $0x122] ss:$2 sm:$0xff] }
 0x21c   : > { %v2930_v62 = vmax.f32 %v2913_v7, %v2892_v56 }
 0x21e   : > { %v2948_v35 = vmax.f32 %v2940_v2, %v2930_v62 }
 0x21f   : > { %v2656_v10 = vpop.f32.mrf.mxu2 }
 0x220   : > { %v2956_v50 = vadd.f32 %v2948_v35, %v4716_v17  ;;  %v2706_v28 = vadd.f32 %v3440_v33, %v2656_v10 }
 0x222   : > { %v2964_v44 = vmax.f32 %v2956_v50, 0.0  ;;  %2793 = vst.msk [vmem:[#allocation3 + $0x141] sm:$0xff] %vm1526_vm2, %v2706_v28 }
 0x224   : > { %2972 = vst.msk [vmem:[%s5238_s21 + $0x28] sm:$0xff] %vm1526_vm2, %v2964_v44 }
 0x227   : > { %v2659_v22 = vpop.f32.mrf.mxu2 }
 0x228   : > { %v2707_v14 = vadd.f32 %v3440_v33, %v2659_v22 }
 0x229   : > { %v2826_v51 = vld [vmem:[#allocation3 + $0x138] ss:$2 sm:$0xff]  ;;  %v2860_v38 = vld [vmem:[#allocation3 + $0x139] ss:$2 sm:$0xff] }
 0x22a   : > { %2794 = vst.msk [vmem:[#allocation3 + $0x151] sm:$0xff] %vm1526_vm2, %v2707_v14  ;;  %v2914_v30 = vmax.f32 %v2826_v51, %v2860_v38  ;;  %v2894_v16 = vld [vmem:[#allocation3 + $0x13a] ss:$2 sm:$0xff] }
 0x22c   : > { %v2931_v17 = vmax.f32 %v2914_v30, %v2894_v16 }
 0x22e   : > { %v2941_v3 = vmax.f32 %v2930_v62, %v2931_v17 }
 0x22f   : > { %v2662_v41 = vpop.f32.mrf.mxu2 }
 0x230   : > { %v2708_v61 = vadd.f32 %v3440_v33, %v2662_v41 }
 0x232   : > { %2795 = vst.msk [vmem:[#allocation3 + $0x159] sm:$0xff] %vm1526_vm2, %v2708_v61 }
 0x237   : > { %v2665_v37 = vpop.f32.mrf.mxu2 }
 0x238   : > { %v2709_v46 = vadd.f32 %v3440_v33, %v2665_v37 }
 0x239   : > { %v2828_v15 = vld [vmem:[#allocation3 + $0x150] ss:$2 sm:$0xff]  ;;  %v2862_v49 = vld [vmem:[#allocation3 + $0x151] ss:$2 sm:$0xff] }
 0x23a   : > { %v2915_v27 = vmax.f32 %v2828_v15, %v2862_v49  ;;  %2796 = vst.msk [vmem:[#allocation3 + $0x169] sm:$0xff] %vm1526_vm2, %v2709_v46  ;;  %v2896_v48 = vld [vmem:[#allocation3 + $0x152] ss:$2 sm:$0xff] }
 0x23c   : > { %v2932_v58 = vmax.f32 %v2915_v27, %v2896_v48 }
 0x23e   : > { %v2949_v12 = vmax.f32 %v2941_v3, %v2932_v58 }
 0x23f   : > { %v2668_v53 = vpop.f32.mrf.mxu2 }
 0x240   : > { %v2957_v57 = vadd.f32 %v2949_v12, %v4754_v26  ;;  %v2710_v54 = vadd.f32 %v3440_v33, %v2668_v53 }
 0x242   : > { %v2965_v45 = vmax.f32 %v2957_v57, 0.0  ;;  %2797 = vst.msk [vmem:[#allocation3 + $0x171] sm:$0xff] %vm1526_vm2, %v2710_v54 }
 0x244   : > { %2973 = vst.msk [vmem:[%s5238_s21 + $0x30] sm:$0xff] %vm1526_vm2, %v2965_v45 }
 0x247   : > { %v2671_v36 = vpop.f32.mrf.mxu2 }
 0x248   : > { %v2711_v13 = vadd.f32 %v3440_v33, %v2671_v36 }
 0x249   : > { %v2830_v55 = vld [vmem:[#allocation3 + $0x168] ss:$2 sm:$0xff]  ;;  %v2864_v19 = vld [vmem:[#allocation3 + $0x169] ss:$2 sm:$0xff] }
 0x24a   : > { %2798 = vst.msk [vmem:[#allocation3 + $0x181] sm:$0xff] %vm1526_vm2, %v2711_v13  ;;  %v2916_v9 = vmax.f32 %v2830_v55, %v2864_v19  ;;  %v2898_v26 = vld [vmem:[#allocation3 + $0x16a] ss:$2 sm:$0xff] }
 0x24c   : > { %v2933_v5 = vmax.f32 %v2916_v9, %v2898_v26 }
 0x24e   : > { %v2942_v52 = vmax.f32 %v2932_v58, %v2933_v5 }
 0x24f   : > { %v2674_v11 = vpop.f32.mrf.mxu2 }
 0x250   : > { %v2712_v23 = vadd.f32 %v3440_v33, %v2674_v11 }
 0x252   : > { %2799 = vst.msk [vmem:[#allocation3 + $0x189] sm:$0xff] %vm1526_vm2, %v2712_v23 }
 0x259   : > { %v2832_v6 = vld [vmem:[#allocation3 + $0x180] ss:$2 sm:$0xff]  ;;  %v2866_v4 = vld [vmem:[#allocation3 + $0x181] ss:$2 sm:$0xff] }
 0x25a   : > { %v2917_v42 = vmax.f32 %v2832_v6, %v2866_v4  ;;  %v2900_v39 = vld [vmem:[#allocation3 + $0x182] ss:$2 sm:$0xff] }
 0x25c   : > { %v2934_v43 = vmax.f32 %v2917_v42, %v2900_v39 }
 0x25e   : > { %v2950_v20 = vmax.f32 %v2942_v52, %v2934_v43 }
 0x260   : > { %v2958_v8 = vadd.f32 %v2950_v20, %v4772_v18 }
 0x262   : > { %v2966_v32 = vmax.f32 %v2958_v8, 0.0 }
 0x264   : > { %2974 = vst.msk [vmem:[%s5238_s21 + $0x38] sm:$0xff] %vm1526_vm2, %v2966_v32 }
 0x265   : > { %3468 = shalt.err (!%p3465_p3)
}
 0x266   : > { %s3507_s19 = smov 128   ;;  %s3508_s21 = smov 8  }
 0x267   : > { %3355 = dma.vmem_to_hbm [thread:$0]  (%p3592_p5), %s2989_s13, 1024, %s2991_s23, %s2976_s9, %s3507_s19, %s3507_s19, %s3508_s21  }
 0x268 PF: > { %p3361_p4 = scmp.ge.s32.totalorder %s3503_s30, 2  ;;  %s3005_s20 = sand.u32 1, %s3491_s27  }
 0x269   : > { %s3006_s22 = scalar_lea.sflag [#allocation5], %s3005_s20 }
 0x26a   : > { %p3358_p7 = pnand %p3361_p4, %p3596_p6 }
 0x26c   : > { %p3359_p8 = pneg %p3358_p7 }
 0x26e   : > { %3486 = dma.done.wait (%p3359_p8), %s3006_s22, 1024  }
 0x26f   : > { %3488 = vsyncadd (%p3359_p8), %s3006_s22, 4294966272  ;;  %p18_p9 = scmp.ge.s32.totalorder %s3579_s11, 4   ;;  %s5445_s27 = smov %s3495_s28 }
 0x270   : > { %s5446_s28 = smov %s3499_s29  ;;  %s5447_s29 = smov %s3590_s14 }
 0x271   : > { %s5448_s30 = smov %s3579_s11  ;;  %20 = sbr.rel (!%p18_p9) target bundleno = 3 (0x3), region = 154 }
 0x276   :  { %3012 = vsyncpa [#allocation5], 1 }
 0x277   :  { %3014 = vsyncpa [#allocation5 + $0x1], 1 }

</bundles_post_ra>
